<compile_context>
chip_gen: v5e
topology: v5e:2x2
jax: 0.10.0
libtpu: 0.0.40
codegen_flags: <defaults>
</compile_context>

<pallas_src>
from functools import partial

import jax
import jax.numpy as jnp
from jax.experimental import pallas as pl
from jax.experimental.pallas import tpu as pltpu


def _graph_feature2_kernel(x_ref, nm_ref, w_ref, b_ref, out_ref, wt_ref,
                           *, n_node, n_sub):
    # x_ref  : (TB*N, D) bf16     nm_ref : (TB, S*N) bf16
    # w_ref  : (D, 2H)   bf16     b_ref  : (1, 2H)   f32
    # out_ref: (TB, S*H) f32      wt_ref : (TB, S*N) f32
    N, S = n_node, n_sub
    TB = nm_ref.shape[0]
    H = w_ref.shape[1] // 2

    # --- fused fc_i / fc_j over all TB*N node rows: one bf16 MXU matmul -----
    z = jnp.dot(x_ref[...], w_ref[...],
                preferred_element_type=jnp.float32) + b_ref[...]       # (TB*N, 2H)
    x_all2 = jax.nn.sigmoid(z[:, :H]) * jnp.tanh(z[:, H:])             # (TB*N, H)
    x_all = x_all2.reshape(TB, N, H)                                   # same tiling

    # --- L2 norm over hidden dim, broadcast to node axis of node_map --------
    norm = jnp.sqrt(jnp.sum(x_all * x_all, axis=-1, keepdims=True))    # (TB, N, 1)
    norm_row = jnp.transpose(norm, (0, 2, 1))                          # (TB, 1, N)

    # --- masked "mysoftmax" over nodes with explicit partition>0 guard ------
    nm = nm_ref[...].astype(jnp.float32).reshape(TB, S, N) * norm_row  # (TB, S, N)
    x_exp = jnp.where(nm > 0, jnp.exp(nm), 0.0)
    part = jnp.sum(x_exp, axis=-1, keepdims=True)                      # (TB, S, 1)
    inv = pl.reciprocal(jnp.where(part > 0, part, 1.0), approx=False)
    weight = jnp.where(part > 0, x_exp * inv, 0.0)                     # (TB, S, N)

    # lane-dense weight writeback: (TB, S*N)
    wt_ref[...] = weight.reshape(TB, S * N)

    # --- weighted node aggregation on the VPU (S is tiny: static unroll) ----
    cols = []
    for s in range(S):
        w_s = weight[:, s, :]                                          # (TB, N)
        agg_s = jnp.sum(w_s[:, :, None] * x_all, axis=1)               # (TB, H)
        cols.append(jnp.tanh(agg_s))
    out_ref[...] = jnp.concatenate(cols, axis=-1)                      # (TB, S*H)


def _pick_tb(batch, tb_req):
    """Batch tile: clamp to batch, multiple of 8 (sublane) unless == batch,
    and prefer >= 2 grid steps so the 'parallel' axis can use both TCs."""
    tb = max(1, min(tb_req, batch))
    if tb >= batch and batch > 8:
        tb = -(-batch // 2)                       # ceil(batch / 2)
    if tb != batch:
        tb = max(8, (tb // 8) * 8)
    return tb


def _compiler_params():
    kwargs = {"dimension_semantics": ("parallel",)}
    try:
        cap = pltpu.get_tpu_info().vmem_capacity_bytes
        kwargs["vmem_limit_bytes"] = int(min(cap * 3 // 4, 100 * 1024 * 1024))
    except Exception:
        pass  # keep compiler defaults if the query is unavailable
    return pltpu.CompilerParams(**kwargs)


def graph_feature2(x, node_map, wi_t, bi, wj_t, bj, *, tb=256):
    """x: [B, N, D]; node_map: [B, S, N]; wi_t/wj_t: [D, H]; bi/bj: [H]."""
    B, N, D = x.shape
    S = node_map.shape[1]
    H = wi_t.shape[1]

    # Fuse the two Linear layers into one [D, 2H] weight / [1, 2H] bias.
    w_fused = jnp.concatenate([wi_t, wj_t], axis=1).astype(jnp.bfloat16)   # (D, 2H)
    b_fused = jnp.concatenate([bi, bj], axis=0).reshape(1, 2 * H).astype(jnp.float32)

    # bf16 inputs (DMA-bound kernel), pre-flattened for clean block layouts.
    x_flat = x.reshape(B * N, D).astype(jnp.bfloat16)                      # [B*N, D]
    nm_flat = node_map.reshape(B, S * N).astype(jnp.bfloat16)              # [B, S*N]

    tb = _pick_tb(B, tb)
    grid = (pl.cdiv(B, tb),)

    grid_spec = pltpu.PrefetchScalarGridSpec(
        num_scalar_prefetch=0,
        grid=grid,
        in_specs=[
            pl.BlockSpec((tb * N, D), lambda b: (b, 0)),
            pl.BlockSpec((tb, S * N), lambda b: (b, 0)),
            pl.BlockSpec((D, 2 * H), lambda b: (0, 0)),
            pl.BlockSpec((1, 2 * H), lambda b: (0, 0)),
        ],
        out_specs=[
            pl.BlockSpec((tb, S * H), lambda b: (b, 0)),
            pl.BlockSpec((tb, S * N), lambda b: (b, 0)),
        ],
    )

    out_flat, wt_flat = pl.pallas_call(
        partial(_graph_feature2_kernel, n_node=N, n_sub=S),
        out_shape=(
            jax.ShapeDtypeStruct((B, S * H), jnp.float32),
            jax.ShapeDtypeStruct((B, S * N), jnp.float32),
        ),
        grid_spec=grid_spec,
        compiler_params=_compiler_params(),
    )(x_flat, nm_flat, w_fused, b_fused)

    # Match the PyTorch return: (tanh(x_all) [B,S,H], weight [B,S,N,1]).
    return out_flat.reshape(B, S, H), wt_flat.reshape(B, S, N)[..., None]


def graph_feature2_ref(x, node_map, wi_t, bi, wj_t, bj):
    """Pure-JAX reference mirroring the PyTorch forward (f32 math)."""
    zi = jnp.einsum('bnd,dh->bnh', x, wi_t) + bi
    zj = jnp.einsum('bnd,dh->bnh', x, wj_t) + bj
    x_all = jax.nn.sigmoid(zi) * jnp.tanh(zj)                          # [B,N,H]
    norm = jnp.sqrt(jnp.sum(x_all * x_all, axis=-1, keepdims=True))    # [B,N,1]
    norm = jnp.transpose(norm, (0, 2, 1))                              # [B,1,N]
    nm = node_map * norm                                               # [B,S,N]
    x_exp = jnp.where(nm > 0, jnp.exp(nm), 0.0)
    part = jnp.sum(x_exp, axis=-1, keepdims=True)
    sm = x_exp / part
    w = jnp.where(jnp.isnan(sm), 0.0, sm)
    out = jnp.tanh(jnp.einsum('bsn,bnh->bsh', w, x_all))
    return out, w[..., None]


if __name__ == "__main__":
    B, N, S = 40, 16, 4          # batch, num_node, sub_graph_cnt (non-dividing batch)
    H, A = 32, 8                 # hidden_dim, n_anno
    D = H + A

    key = jax.random.PRNGKey(0)
    kx, knm, k1, k2, k3, k4 = jax.random.split(key, 6)

    x = jax.random.normal(kx, (B, N, D), dtype=jnp.float32)
    node_map = jax.random.bernoulli(knm, p=0.5, shape=(B, S, N)).astype(jnp.float32)

    bound = 1.0 / jnp.sqrt(jnp.float32(D))
    wi_t = jax.random.uniform(k1, (D, H), jnp.float32, -bound, bound)
    bi = jax.random.uniform(k2, (H,), jnp.float32, -bound, bound)
    wj_t = jax.random.uniform(k3, (D, H), jnp.float32, -bound, bound)
    bj = jax.random.uniform(k4, (H,), jnp.float32, -bound, bound)

    out, weight = graph_feature2(x, node_map, wi_t, bi, wj_t, bj)
    out = jax.block_until_ready(out)
    weight = jax.block_until_ready(weight)

    # Reference sees the same bf16-rounded operands the kernel is fed (all math f32),
    # so the comparison isolates kernel correctness from input-quantization noise.
    x_r = x.astype(jnp.bfloat16).astype(jnp.float32)
    nm_r = node_map.astype(jnp.bfloat16).astype(jnp.float32)
    wi_r = wi_t.astype(jnp.bfloat16).astype(jnp.float32)
    wj_r = wj_t.astype(jnp.bfloat16).astype(jnp.float32)
    out_ref, w_ref = graph_feature2_ref(x_r, nm_r, wi_r, bi, wj_r, bj)

    assert out.shape == (B, S, H) and weight.shape == (B, S, N, 1)
    assert jnp.allclose(out, out_ref, atol=5e-4, rtol=5e-4), \
        float(jnp.max(jnp.abs(out - out_ref)))
    assert jnp.allclose(weight, w_ref, atol=5e-4, rtol=5e-4), \
        float(jnp.max(jnp.abs(weight - w_ref)))

    print("KERNEL_OK")
</pallas_src>

<mosaic_0001>
module attributes {stable_mosaic.version = 11 : i64} {
  func.func @_graph_feature2_kernel(%arg0: i32, %arg1: memref<256x40xbf16, #tpu.memory_space<vmem>>, %arg2: memref<16x64xbf16, #tpu.memory_space<vmem>>, %arg3: memref<40x64xbf16, #tpu.memory_space<vmem>>, %arg4: memref<1x64xf32, #tpu.memory_space<vmem>>, %arg5: memref<16x128xf32, #tpu.memory_space<vmem>>, %arg6: memref<16x64xf32, #tpu.memory_space<vmem>>) attributes {dimension_semantics = [#tpu.dimension_semantics<parallel>], iteration_bounds = array<i64: 3>, scalar_prefetch = 0 : i64, scratch_operands = 0 : i64, tpu.core_type = #tpu.core_type<tc>, window_params = [{transform_indices = @transform_0, window_bounds = array<i64: 256, 40>}, {transform_indices = @transform_1, window_bounds = array<i64: 16, 64>}, {pipeline_mode = #tpu.pipeline_mode<synchronous>, transform_indices = @transform_2, window_bounds = array<i64: 40, 64>}, {pipeline_mode = #tpu.pipeline_mode<synchronous>, transform_indices = @transform_3, window_bounds = array<i64: 1, 64>}, {transform_indices = @transform_4, window_bounds = array<i64: 16, 128>}, {transform_indices = @transform_5, window_bounds = array<i64: 16, 64>}]} {
    %c0 = arith.constant 0 : index
    %c0_0 = arith.constant 0 : index
    %0 = vector.load %arg1[%c0, %c0_0] : memref<256x40xbf16, #tpu.memory_space<vmem>>, vector<256x40xbf16>
    %c0_1 = arith.constant 0 : index
    %c0_2 = arith.constant 0 : index
    %1 = vector.load %arg3[%c0_1, %c0_2] : memref<40x64xbf16, #tpu.memory_space<vmem>>, vector<40x64xbf16>
    %cst = arith.constant dense<0.000000e+00> : vector<256x64xf32>
    %2 = tpu.matmul %0, %1, %cst {dimension_numbers = #tpu.dot_dimension_numbers<[1], [0], [0], [1], [0, 0, 1, 1], [], []>} : vector<256x40xbf16>, vector<40x64xbf16>, vector<256x64xf32> -> vector<256x64xf32>
    %c0_3 = arith.constant 0 : index
    %c0_4 = arith.constant 0 : index
    %3 = vector.load %arg4[%c0_3, %c0_4] : memref<1x64xf32, #tpu.memory_space<vmem>>, vector<1x64xf32>
    %4 = vector.broadcast %3 : vector<1x64xf32> to vector<256x64xf32>
    %5 = arith.addf %2, %4 : vector<256x64xf32>
    %6 = vector.extract_strided_slice %5 {offsets = [0, 0], sizes = [256, 32], strides = [1, 1]} : vector<256x64xf32> to vector<256x32xf32>
    %7 = arith.negf %6 : vector<256x32xf32>
    %8 = math.exp %7 : vector<256x32xf32>
    %cst_5 = arith.constant 1.000000e+00 : f32
    %9 = vector.broadcast %cst_5 : f32 to vector<256x32xf32>
    %10 = arith.addf %9, %8 : vector<256x32xf32>
    %11 = arith.divf %9, %10 : vector<256x32xf32>
    %12 = vector.extract_strided_slice %5 {offsets = [0, 32], sizes = [256, 32], strides = [1, 1]} : vector<256x64xf32> to vector<256x32xf32>
    %13 = math.tanh %12 : vector<256x32xf32>
    %14 = arith.mulf %11, %13 : vector<256x32xf32>
    %15 = vector.shape_cast %14 : vector<256x32xf32> to vector<16x16x32xf32>
    %16 = arith.mulf %15, %15 : vector<16x16x32xf32>
    %cst_6 = arith.constant dense<0.000000e+00> : vector<16x16xf32>
    %17 = vector.multi_reduction <add>, %16, %cst_6 [2] : vector<16x16x32xf32> to vector<16x16xf32>
    %18 = vector.shape_cast %17 : vector<16x16xf32> to vector<16x16x1xf32>
    %19 = math.sqrt %18 : vector<16x16x1xf32>
    %20 = tpu.transpose %19, [0, 2, 1] : vector<16x16x1xf32> -> vector<16x1x16xf32>
    %c0_7 = arith.constant 0 : index
    %c0_8 = arith.constant 0 : index
    %21 = vector.load %arg2[%c0_7, %c0_8] : memref<16x64xbf16, #tpu.memory_space<vmem>>, vector<16x64xbf16>
    %22 = arith.extf %21 : vector<16x64xbf16> to vector<16x64xf32>
    %23 = vector.shape_cast %22 : vector<16x64xf32> to vector<16x4x16xf32>
    %24 = vector.broadcast %20 : vector<16x1x16xf32> to vector<16x4x16xf32>
    %25 = arith.mulf %23, %24 : vector<16x4x16xf32>
    %cst_9 = arith.constant 0.000000e+00 : f32
    %26 = vector.broadcast %cst_9 : f32 to vector<16x4x16xf32>
    %27 = arith.cmpf ogt, %25, %26 : vector<16x4x16xf32>
    %28 = math.exp %25 : vector<16x4x16xf32>
    %cst_10 = arith.constant 0.000000e+00 : f32
    %29 = vector.broadcast %cst_10 : f32 to vector<16x4x16xf32>
    %30 = arith.select %27, %28, %29 : vector<16x4x16xi1>, vector<16x4x16xf32>
    %cst_11 = arith.constant dense<0.000000e+00> : vector<16x4xf32>
    %31 = vector.multi_reduction <add>, %30, %cst_11 [2] : vector<16x4x16xf32> to vector<16x4xf32>
    %32 = vector.shape_cast %31 : vector<16x4xf32> to vector<16x4x1xf32>
    %cst_12 = arith.constant 0.000000e+00 : f32
    %33 = vector.broadcast %cst_12 : f32 to vector<16x4x1xf32>
    %34 = arith.cmpf ogt, %32, %33 : vector<16x4x1xf32>
    %cst_13 = arith.constant 1.000000e+00 : f32
    %35 = vector.broadcast %cst_13 : f32 to vector<16x4x1xf32>
    %36 = arith.select %34, %32, %35 : vector<16x4x1xi1>, vector<16x4x1xf32>
    %37 = tpu.reciprocal %36 : vector<16x4x1xf32> -> vector<16x4x1xf32>
    %cst_14 = arith.constant 0.000000e+00 : f32
    %38 = vector.broadcast %cst_14 : f32 to vector<16x4x1xf32>
    %39 = arith.cmpf ogt, %32, %38 : vector<16x4x1xf32>
    %40 = vector.broadcast %37 : vector<16x4x1xf32> to vector<16x4x16xf32>
    %41 = arith.mulf %30, %40 : vector<16x4x16xf32>
    %cst_15 = arith.constant 0.000000e+00 : f32
    %42 = vector.shape_cast %39 : vector<16x4x1xi1> to vector<16x4x1xi1>
    %43 = vector.broadcast %42 : vector<16x4x1xi1> to vector<16x4x16xi1>
    %44 = vector.broadcast %cst_15 : f32 to vector<16x4x16xf32>
    %45 = arith.select %43, %41, %44 : vector<16x4x16xi1>, vector<16x4x16xf32>
    %46 = vector.shape_cast %45 : vector<16x4x16xf32> to vector<16x64xf32>
    %c0_16 = arith.constant 0 : index
    %c0_17 = arith.constant 0 : index
    %47 = vector.load %arg6[%c0_16, %c0_17] : memref<16x64xf32, #tpu.memory_space<vmem>>, vector<16x64xf32>
    tpu.vector_store %arg6[%c0_16, %c0_17], %46 {strides = array<i32>} : memref<16x64xf32, #tpu.memory_space<vmem>>, vector<16x64xf32>,
    %48 = vector.extract_strided_slice %45 {offsets = [0, 0, 0], sizes = [16, 1, 16], strides = [1, 1, 1]} : vector<16x4x16xf32> to vector<16x1x16xf32>
    %49 = vector.shape_cast %48 : vector<16x1x16xf32> to vector<16x16xf32>
    %50 = vector.shape_cast %49 : vector<16x16xf32> to vector<16x16x1xf32>
    %51 = vector.broadcast %50 : vector<16x16x1xf32> to vector<16x16x32xf32>
    %52 = arith.mulf %51, %15 : vector<16x16x32xf32>
    %cst_18 = arith.constant dense<0.000000e+00> : vector<16x32xf32>
    %53 = vector.multi_reduction <add>, %52, %cst_18 [1] : vector<16x16x32xf32> to vector<16x32xf32>
    %54 = math.tanh %53 : vector<16x32xf32>
    %55 = vector.extract_strided_slice %45 {offsets = [0, 1, 0], sizes = [16, 1, 16], strides = [1, 1, 1]} : vector<16x4x16xf32> to vector<16x1x16xf32>
    %56 = vector.shape_cast %55 : vector<16x1x16xf32> to vector<16x16xf32>
    %57 = vector.shape_cast %56 : vector<16x16xf32> to vector<16x16x1xf32>
    %58 = vector.broadcast %57 : vector<16x16x1xf32> to vector<16x16x32xf32>
    %59 = arith.mulf %58, %15 : vector<16x16x32xf32>
    %cst_19 = arith.constant dense<0.000000e+00> : vector<16x32xf32>
    %60 = vector.multi_reduction <add>, %59, %cst_19 [1] : vector<16x16x32xf32> to vector<16x32xf32>
    %61 = math.tanh %60 : vector<16x32xf32>
    %62 = vector.extract_strided_slice %45 {offsets = [0, 2, 0], sizes = [16, 1, 16], strides = [1, 1, 1]} : vector<16x4x16xf32> to vector<16x1x16xf32>
    %63 = vector.shape_cast %62 : vector<16x1x16xf32> to vector<16x16xf32>
    %64 = vector.shape_cast %63 : vector<16x16xf32> to vector<16x16x1xf32>
    %65 = vector.broadcast %64 : vector<16x16x1xf32> to vector<16x16x32xf32>
    %66 = arith.mulf %65, %15 : vector<16x16x32xf32>
    %cst_20 = arith.constant dense<0.000000e+00> : vector<16x32xf32>
    %67 = vector.multi_reduction <add>, %66, %cst_20 [1] : vector<16x16x32xf32> to vector<16x32xf32>
    %68 = math.tanh %67 : vector<16x32xf32>
    %69 = vector.extract_strided_slice %45 {offsets = [0, 3, 0], sizes = [16, 1, 16], strides = [1, 1, 1]} : vector<16x4x16xf32> to vector<16x1x16xf32>
    %70 = vector.shape_cast %69 : vector<16x1x16xf32> to vector<16x16xf32>
    %71 = vector.shape_cast %70 : vector<16x16xf32> to vector<16x16x1xf32>
    %72 = vector.broadcast %71 : vector<16x16x1xf32> to vector<16x16x32xf32>
    %73 = arith.mulf %72, %15 : vector<16x16x32xf32>
    %cst_21 = arith.constant dense<0.000000e+00> : vector<16x32xf32>
    %74 = vector.multi_reduction <add>, %73, %cst_21 [1] : vector<16x16x32xf32> to vector<16x32xf32>
    %75 = math.tanh %74 : vector<16x32xf32>
    %76 = tpu.concatenate %54, %61, %68, %75 in 1 : vector<16x32xf32>, vector<16x32xf32>, vector<16x32xf32>, vector<16x32xf32> -> vector<16x128xf32>
    %c0_22 = arith.constant 0 : index
    %c0_23 = arith.constant 0 : index
    %77 = vector.load %arg5[%c0_22, %c0_23] : memref<16x128xf32, #tpu.memory_space<vmem>>, vector<16x128xf32>
    tpu.vector_store %arg5[%c0_22, %c0_23], %76 {strides = array<i32>} : memref<16x128xf32, #tpu.memory_space<vmem>>, vector<16x128xf32>,
    return
  }
  func.func @transform_0(%arg0: i32) -> (i32, i32) {
    %c0_i32 = arith.constant 0 : i32
    %c0_i32_0 = arith.constant 0 : i32
    return %arg0, %c0_i32 : i32, i32
  }
  func.func @transform_1(%arg0: i32) -> (i32, i32) {
    %c0_i32 = arith.constant 0 : i32
    %c0_i32_0 = arith.constant 0 : i32
    return %arg0, %c0_i32 : i32, i32
  }
  func.func @transform_2(%arg0: i32) -> (i32, i32) {
    %c0_i32 = arith.constant 0 : i32
    %c0_i32_0 = arith.constant 0 : i32
    %c0_i32_1 = arith.constant 0 : i32
    return %c0_i32, %c0_i32_0 : i32, i32
  }
  func.func @transform_3(%arg0: i32) -> (i32, i32) {
    %c0_i32 = arith.constant 0 : i32
    %c0_i32_0 = arith.constant 0 : i32
    %c0_i32_1 = arith.constant 0 : i32
    return %c0_i32, %c0_i32_0 : i32, i32
  }
  func.func @transform_4(%arg0: i32) -> (i32, i32) {
    %c0_i32 = arith.constant 0 : i32
    %c0_i32_0 = arith.constant 0 : i32
    return %arg0, %c0_i32 : i32, i32
  }
  func.func @transform_5(%arg0: i32) -> (i32, i32) {
    %c0_i32 = arith.constant 0 : i32
    %c0_i32_0 = arith.constant 0 : i32
    return %arg0, %c0_i32 : i32, i32
  }
}

</mosaic_0001>

<bundles_post_ra>
// kernel: tpu_custom_call.1
= control target key start
LH: loop header
LB: loop body
LE: loop exit
PB: predicated region body
PF: predicated region fallthrough
CT: control target
= control target key end

     0   :  { %s9265_s0 = inlined_call_operand.vmem [shape: bf16[640,40], index: 0, kind: input, shape index: {}]   ;;  %s9266_s1 = inlined_call_operand.vmem [shape: bf16[40,64], index: 1, kind: input, shape index: {}]   ;;  %s9267_s2 = inlined_call_operand.vmem [shape: bf16[40,64], index: 2, kind: input, shape index: {}]   ;;  %s9268_s3 = inlined_call_operand.vmem [shape: f32[1,64], index: 3, kind: input, shape index: {}]   ;;  %s9269_s4 = inlined_call_operand.hbm [shape: f32[40,128], index: 4, kind: output, shape index: {0}]   ;;  %s9270_s5 = inlined_call_operand.hbm [shape: f32[40,64], index: 5, kind: output, shape index: {1}]  }
   0x1   :  { %9414 = sst [smem:[#allocation59_spill]] %s9265_s0 }
   0x2   :  { %9415 = sst [smem:[#allocation60_spill]] %s9266_s1 }
   0x3   :  { %11 = vsyncpa [#allocation3], 0 }
   0x4   :  { %13 = vsyncpa [#allocation3 + $0x1], 0 }
   0x5   :  { %14 = vsyncpa [#allocation5], 0 }
   0x6   :  { %16 = vsyncpa [#allocation5 + $0x1], 0  ;;  %s5997_s18 = smov 0   ;;  %s5999_s19 = smov 0  }
   0x7   :  { %s6001_s20 = smov 0   ;;  %s6003_s21 = smov 0  }
   0x8 LB: > { %s6018_s22 = sadd.s32 4294967295, %s5950_s21   ;;  %s5076_s23 = sadd.s32 4294967294, %s5950_s21   ;;  %s5950_s21 = sphi %s6003_s21, %s9863_s21   ;;  %s5946_s20 = sphi %s6001_s20, %s9862_s20   ;;  %s5942_s19 = sphi %s5999_s19, %s9861_s19   ;;  %s5938_s18 = sphi %s5997_s18, %s9860_s18  }
   0x9   : > { %s6022_s24 = sadd.s32 1, %s5950_s21   ;;  %s123_s25 = sadd.s32 1, %s5946_s20 }
   0xa   : > { %s120_s26 = ssub.s32 %s5950_s21, %s6022_s24  ;;  %p133_p0 = scmp.ne.s32.totalorder %s5946_s20, %s5942_s19 }
   0xb   : > { %p121_p1 = scmp.eq.s32.totalorder %s120_s26, 0  ;;  %p134_p2 = scmp.eq.s32.totalorder %s6018_s22, 2 }
   0xc   : > { %p139_p3 = scmp.ne.s32.totalorder %s5942_s19, %s5938_s18  ;;  %p140_p4 = scmp.eq.s32.totalorder %s5076_s23, 2 }
   0xd   : > { %s6033_s27 = scalar_select %p121_p1, %s5946_s20, %s123_s25  }
   0xe   : > { %p6035_p5 = por %p134_p2, %p133_p0  ;;  %p6039_p6 = por %p140_p4, %p139_p3 }
   0xf   : > { %p5079_p7 = scmp.ge.s32.totalorder %s5950_s21, 1  ;;  %p224_p8 = scmp.lt.s32.totalorder %s5950_s21, 4 }
  0x11   : > { %p225_p9 = pnand %p5079_p7, %p224_p8 }
  0x13   : > { %228 = sbr.rel (%p225_p9) target bundleno = 1726 (0x6be), region = 36 }
  0x18   : > { %v345_v0 = vld [vmem:[%s9267_s2 + $0x10] sm:$0xf]  ;;  %s5082_s7 = sshll.u32 %s6018_s22, 5  ;;  %vm494_vm0 = vcmask 1043456   ;;  %v5239_v4 = vld [vmem:[%s9267_s2 + $0x8] sm:$0xff]  ;;  %v5238_v5 = vld [vmem:[%s9267_s2] sm:$0xff] }
  0x19   : > { %v439_v1 = vunpack.c.l.b16 %v345_v0  ;;  %p275_p10 = scmp.lt.s32.totalorder %s5082_s7, 79  ;;  %s9418_s0 = sld [smem:[#allocation59_spill]]  ;;  %vm445_vm1 = vcmask 326656   ;;  %v6110_v26 = vld [vmem:[%s9268_s3] ss:$0 sm:$0xff] }
  0x1a   : > { %s6069_s16 = sshll.u32 %s6018_s22, 1  ;;  %s9419_s1 = sld [smem:[#allocation60_spill]] }
  0x1b   : > { %v442_v2 = vpack.c.b16 %v439_v1, %v439_v1  ;;  %s9865_s7 = smov (!%p275_p10, %s5082_s7), 79  ;;  %p289_p11 = scmp.lt.s32.totalorder %s6069_s16, 4 }
  0x1c   : > { %s5083_s10 = sshll.u32 %s9865_s7, 2  ;;  %s5952_s6 = smov 96  }
  0x1d   : > { %v496_v3 = vsel %vm494_vm0, %v442_v2, 0  ;;  %s290_s17 = scalar_select %p289_p11, %s6069_s16, 4 }
  0x1e   : > { %503 = vmatpush.bf16.msra.mxu0 %v496_v3  ;;  %5246 = vmatpush.bf16.msra.mxu1 %v496_v3  ;;  %s5953_s7 = smov 80   ;;  %s5954_s8 = smov 112  }
  0x1f   : > { %5247 = vmatpush.bf16.msra.mxu2 %v496_v3  ;;  %5248 = vmatpush.bf16.msra.mxu3 %v496_v3  ;;  %s6058_s15 = scalar_lea.vmem %s9418_s0, %s5083_s10  ;;  %s5085_s23 = sshll.u32 %s290_s17, 2 }
  0x20   : > { %v5222_v6 = vld [vmem:[%s6058_s15] sm:$0xff]  ;;  %v5223_v10 = vld [vmem:[%s6058_s15 + $0x8] sm:$0xff]  ;;  %s292_s30 = scalar_lea.vmem %s9419_s1, %s5085_s23  ;;  %v5224_v18 = vld [vmem:[%s6058_s15 + $0x10] sm:$0xff]  ;;  %s5957_s11 = smov 32  }
  0x21   : > { %v5226_v7 = vld [vmem:[%s6058_s15 + $0x20] sm:$0xff]  ;;  %v5227_v11 = vld [vmem:[%s6058_s15 + $0x28] sm:$0xff]  ;;  %v5228_v19 = vld [vmem:[%s6058_s15 + $0x30] sm:$0xff]  ;;  %s5958_s12 = smov 16   ;;  %s8568_s13 = sand.u32 1, %s5942_s19  }
  0x22   : > { %504 = vmatpush.bf16.msra.mxu0 %v5239_v4  ;;  %5249 = vmatpush.bf16.msra.mxu1 %v5239_v4  ;;  %v5230_v8 = vld [vmem:[%s6058_s15 + $0x40] sm:$0xff]  ;;  %v5231_v12 = vld [vmem:[%s6058_s15 + $0x48] sm:$0xff]  ;;  %v5232_v20 = vld [vmem:[%s6058_s15 + $0x50] sm:$0xff]  ;;  %s5959_s14 = smov 48   ;;  %s5960_s23 = smov 64  }
  0x23   : > { %5250 = vmatpush.bf16.msra.mxu2 %v5239_v4  ;;  %5251 = vmatpush.bf16.msra.mxu3 %v5239_v4  ;;  %v5234_v9 = vld [vmem:[%s6058_s15 + $0x60] sm:$0xff]  ;;  %v5235_v13 = vld [vmem:[%s6058_s15 + $0x68] sm:$0xff]  ;;  %v5236_v21 = vld [vmem:[%s6058_s15 + $0x70] sm:$0xff]  ;;  %s9412_s26 = scalar_lea.sflag [#allocation3], %s8568_s13 }
  0x24   : > { %v5243_v14 = vld [vmem:[%s292_s30] sm:$0xff]   ;;  %v5225_v22 = vld [vmem:[%s6058_s15 + $0x18] sm:$0xff] }
  0x25   : > { %v6084_v15 = vunpack.c.l.bf16 %v5243_v14  ;;  %v6086_v16 = vunpack.c.h.bf16 %v5243_v14  ;;  %v5229_v23 = vld [vmem:[%s6058_s15 + $0x38] sm:$0xff] }
  0x26   : > { %505 = vmatpush.bf16.msra.mxu0 %v5238_v5  ;;  %5252 = vmatpush.bf16.msra.mxu1 %v5238_v5  ;;  %v5233_v24 = vld [vmem:[%s6058_s15 + $0x58] sm:$0xff] }
  0x27   : > { %5253 = vmatpush.bf16.msra.mxu2 %v5238_v5  ;;  %5254 = vmatpush.bf16.msra.mxu3 %v5238_v5  ;;  %9420 = vst [vmem:[#allocation8_spill] sm:$0xff] %v6084_v15  ;;  %v5316_v17 = vpack.i.bf16 %v6086_v16, %v6084_v15  ;;  %v5237_v25 = vld [vmem:[%s6058_s15 + $0x78] sm:$0xff]  ;;  %s5080_s15 = sshll.u32 %s8568_s13, 4 }
  0x28   : > { %9421 = vst [vmem:[#allocation9_spill] sm:$0xff] %v6086_v16  ;;  %s8808_s17 = scalar_lea.vmem [#allocation4], %s5080_s15  ;;  %s262_s25 = scalar_lea.vmem [#allocation2], %s5080_s15 }
  0x29   : > { %5158 = vmatmul.msk.bf16.vlgmr.msra.gmra.mxu0 %vm445_vm1, %v5222_v6  ;;  %5162 = vmatmul.msk.bf16.vlgmr.msra.gmra.mxu1 %vm445_vm1, %v5226_v7 }
  0x2a   : > { %5166 = vmatmul.msk.bf16.vlgmr.msra.gmra.mxu2 %vm445_vm1, %v5230_v8  ;;  %5170 = vmatmul.msk.bf16.vlgmr.msra.gmra.mxu3 %vm445_vm1, %v5234_v9 }
  0x2b   : > { %5317 = vrot.lane.b32.xlu0 %v5316_v17, %s5952_s6  ;;  %5322 = vrot.lane.b32.xlu1 %v5316_v17, %s5953_s7 }
  0x2c   : > { %5312 = vrot.lane.b32.xlu2 %v5316_v17, %s5954_s8 }
  0x39   : > { %5159 = vmatmul.msk.bf16.gmra.mxu0 %vm445_vm1, %v5223_v10  ;;  %5163 = vmatmul.msk.bf16.gmra.mxu1 %vm445_vm1, %v5227_v11 }
  0x3a   : > { %5167 = vmatmul.msk.bf16.gmra.mxu2 %vm445_vm1, %v5231_v12  ;;  %5171 = vmatmul.msk.bf16.gmra.mxu3 %vm445_vm1, %v5235_v13 }
  0x49   : > { %5160 = vmatmul.msk.bf16.gmra.mxu0 %vm445_vm1, %v5224_v18  ;;  %5164 = vmatmul.msk.bf16.gmra.mxu1 %vm445_vm1, %v5228_v19 }
  0x4a   : > { %5168 = vmatmul.msk.bf16.gmra.mxu2 %vm445_vm1, %v5232_v20  ;;  %5172 = vmatmul.msk.bf16.gmra.mxu3 %vm445_vm1, %v5236_v21 }
  0x59   : > { %5161 = vmatmul.msk.bf16.gmra.mxu0 %vm445_vm1, %v5225_v22  ;;  %5165 = vmatmul.msk.bf16.gmra.mxu1 %vm445_vm1, %v5229_v23 }
  0x5a   : > { %5169 = vmatmul.msk.bf16.gmra.mxu2 %vm445_vm1, %v5233_v24  ;;  %5173 = vmatmul.msk.bf16.gmra.mxu3 %vm445_vm1, %v5237_v25 }
  0x9d   : > { %v6689_v15 = vpop.permute.xlu1 %5322 }
  0x9e   : > { %9459 = vst [vmem:[#allocation15_spill] sm:$0xff] %v6689_v15 }
  0xa6   : > { %v507_v27 = vpop.f32.mrf.mxu0  ;;  %v527_v28 = vpop.f32.mrf.mxu1 }
  0xa7   : > { %v508_v29 = vadd.f32 %v6110_v26, %v507_v27  ;;  %v528_v30 = vadd.f32 %v6110_v26, %v527_v28 }
  0xa9   : > { %5386 = vtanh.f32 %v508_v29  ;;  %v5182_v60 = vmul.f32 -1.442695, %v528_v30  ;;  %v5174_v0 = vmul.f32 -1.442695, %v508_v29 }
  0xaa   : > { %5388 = vtanh.f32 %v528_v30 }
  0xad   : > { %v547_v31 = vpop.f32.mrf.mxu2  ;;  %v567_v32 = vpop.f32.mrf.mxu3 }
  0xae   : > { %v548_v33 = vadd.f32 %v6110_v26, %v547_v31  ;;  %v568_v35 = vadd.f32 %v6110_v26, %v567_v32  ;;  %v509_v37 = vpop.f32.mrf.mxu0  ;;  %v529_v42 = vpop.f32.mrf.mxu1 }
  0xaf   : > { %v5387_v34 = vpop.eup %5386  ;;  %v510_v38 = vadd.f32 %v6110_v26, %v509_v37  ;;  %v530_v47 = vadd.f32 %v6110_v26, %v529_v42 }
  0xb0   : > { %v5389_v36 = vpop.eup %5388  ;;  %5390 = vtanh.f32 %v548_v33  ;;  %1259 = vrot.lane.b32.xlu0 %v5387_v34, %s5952_s6  ;;  %v5190_v2 = vmul.f32 -1.442695, %v548_v33  ;;  %v5198_v5 = vmul.f32 -1.442695, %v568_v35 }
  0xb1   : > { %5392 = vtanh.f32 %v568_v35  ;;  %1275 = vrot.lane.b32.xlu2 %v5389_v36, %s5952_s6  ;;  %v5175_v10 = vmul.f32 -1.442695, %v510_v38  ;;  %v5183_v11 = vmul.f32 -1.442695, %v530_v47 }
  0xb2   : > { %5394 = vtanh.f32 %v510_v38 }
  0xb5   : > { %v549_v40 = vpop.f32.mrf.mxu2  ;;  %v569_v44 = vpop.f32.mrf.mxu3 }
  0xb6   : > { %v5391_v39 = vpop.eup %5390  ;;  %v550_v43 = vadd.f32 %v6110_v26, %v549_v40  ;;  %v6123_v45 = vadd.f32 %v6110_v26, %v569_v44  ;;  %v512_v48 = vpop.f32.mrf.mxu0 }
  0xb7   : > { %v5393_v41 = vpop.eup %5392  ;;  %1291 = vrot.lane.b32.xlu1 %v5391_v39, %s5952_s6  ;;  %v532_v50 = vpop.f32.mrf.mxu1  ;;  %v6129_v51 = vadd.f32 %v6110_v26, %v512_v48 }
  0xb8   : > { %1307 = vrot.lane.b32.xlu0 %v5393_v41, %s5952_s6  ;;  %5396 = vtanh.f32 %v550_v43  ;;  %v5395_v46 = vpop.eup %5394  ;;  %v6143_v59 = vadd.f32 %v6110_v26, %v532_v50  ;;  %v5191_v17 = vmul.f32 -1.442695, %v550_v43  ;;  %v5199_v37 = vmul.f32 -1.442695, %v6123_v45 }
  0xb9   : > { %5398 = vtanh.f32 %v6123_v45  ;;  %v5176_v44 = vmul.f32 -1.442695, %v6129_v51 }
  0xba   : > { %5400 = vtanh.f32 %v530_v47 }
  0xbb   : > { %5402 = vtanh.f32 %v6129_v51 }
  0xbd   : > { %v572_v52 = vpop.f32.mrf.mxu3  ;;  %v552_v54 = vpop.f32.mrf.mxu2 }
  0xbe   : > { %v5397_v49 = vpop.eup %5396  ;;  %v6134_v56 = vadd.f32 %v6110_v26, %v552_v54  ;;  %v6138_v57 = vadd.f32 %v6110_v26, %v572_v52  ;;  %v514_v62 = vpop.f32.mrf.mxu0 }
  0xbf   : > { %1293 = vrot.lane.b32.xlu2 %v5397_v49, %s5952_s6  ;;  %v5399_v53 = vpop.eup %5398  ;;  %v534_v61 = vpop.f32.mrf.mxu1  ;;  %v6154_v6 = vadd.f32 %v6110_v26, %v514_v62 }
  0xc0   : > { %1261 = vrot.lane.b32.xlu0 %v5395_v46, %s5952_s6  ;;  %v5401_v55 = vpop.eup %5400  ;;  %1309 = vrot.lane.b32.xlu1 %v5399_v53, %s5952_s6  ;;  %5404 = vtanh.f32 %v6134_v56  ;;  %v6149_v1 = vadd.f32 %v6110_v26, %v534_v61  ;;  %v5200_v49 = vmul.f32 -1.442695, %v6138_v57 }
  0xc1   : > { %v5403_v58 = vpop.eup %5402  ;;  %5406 = vtanh.f32 %v6138_v57  ;;  %v5184_v57 = vmul.f32 -1.442695, %v6143_v59 }
  0xc2   : > { %5408 = vtanh.f32 %v6143_v59  ;;  %v5185_v61 = vmul.f32 -1.442695, %v6149_v1 }
  0xc3   : > { %5410 = vpow2.f32 %v5182_v60 }
  0xc4   : > { %5412 = vtanh.f32 %v6149_v1 }
  0xc5   : > { %v574_v3 = vpop.f32.mrf.mxu3  ;;  %5414 = vpow2.f32 %v5174_v0  ;;  %v554_v8 = vpop.f32.mrf.mxu2 }
  0xc6   : > { %v5405_v63 = vpop.eup %5404  ;;  %v6158_v9 = vadd.f32 %v6110_v26, %v574_v3  ;;  %5416 = vpow2.f32 %v5190_v2  ;;  %v517_v14 = vpop.f32.mrf.mxu0  ;;  %v6176_v29 = vadd.f32 %v6110_v26, %v554_v8  ;;  %v5192_v3 = vmul.f32 -1.442695, %v6134_v56 }
  0xc7   : > { %v5407_v4 = vpop.eup %5406  ;;  %5418 = vpow2.f32 %v5198_v5  ;;  %v6164_v18 = vadd.f32 %v6110_v26, %v517_v14  ;;  %v537_v22 = vpop.f32.mrf.mxu1 }
  0xc8   : > { %1277 = vrot.lane.b32.xlu0 %v5401_v55, %s5952_s6  ;;  %1263 = vrot.lane.b32.xlu1 %v5403_v58, %s5952_s6  ;;  %v5409_v7 = vpop.eup %5408  ;;  %5420 = vtanh.f32 %v6154_v6  ;;  %v6171_v24 = vadd.f32 %v6110_v26, %v537_v22 }
  0xc9   : > { %1311 = vrot.lane.b32.xlu2 %v5407_v4, %s5952_s6  ;;  %v5411_v12 = vpop.eup %5410  ;;  %5422 = vtanh.f32 %v6158_v9 }
  0xca   : > { %v5413_v13 = vpop.eup %5412  ;;  %5424 = vpow2.f32 %v5175_v10  ;;  %v6166_v21 = vadd.f32 1.0, %v5411_v12 }
  0xcb   : > { %v5415_v19 = vpop.eup %5414  ;;  %5426 = vpow2.f32 %v5183_v11 }
  0xcc   : > { %v5417_v20 = vpop.eup %5416  ;;  %5428 = vtanh.f32 %v6164_v18  ;;  %v6173_v27 = vadd.f32 1.0, %v5415_v19  ;;  %v846_v22 = vand.u32 2147483648, %v6166_v21  ;;  %vm840_vm3 = vweird.f32 %v6166_v21 }
  0xcd   : > { %v5419_v23 = vpop.eup %5418  ;;  %5430 = vpow2.f32 %v5191_v17  ;;  %v557_v30 = vpop.f32.mrf.mxu2  ;;  %v6180_v32 = vadd.f32 1.0, %v5417_v20 }
  0xce   : > { %v5421_v25 = vpop.eup %5420  ;;  %5432 = vtanh.f32 %v6171_v24  ;;  %v6184_v34 = vadd.f32 1.0, %v5419_v23  ;;  %v6188_v35 = vadd.f32 %v6110_v26, %v557_v30  ;;  %v577_v40 = vpop.f32.mrf.mxu3  ;;  %vm720_vm2 = vweird.f32 %v6173_v27 }
  0xcf   : > { %v5423_v28 = vpop.eup %5422  ;;  %5434 = vrcp.f32 %v6166_v21  ;;  %v6204_v45 = vadd.f32 %v6110_v26, %v577_v40  ;;  %v519_v50 = vpop.f32.mrf.mxu0  ;;  %v724_v23 = vand.u32 2147483647, %v6173_v27  ;;  %vm960_vm11 = vweird.f32 %v6180_v32 }
  0xd0   : > { %1295 = vrot.lane.b32.xlu0 %v5405_v63, %s5952_s6  ;;  %1279 = vrot.lane.b32.xlu1 %v5409_v7, %s5952_s6  ;;  %v5425_v31 = vpop.eup %5424  ;;  %5436 = vtanh.f32 %v6176_v29  ;;  %v6225_v58 = vadd.f32 %v6110_v26, %v519_v50  ;;  %v539_v62 = vpop.f32.mrf.mxu1 }
  0xd1   : > { %1281 = vrot.lane.b32.xlu2 %v5413_v13, %s5952_s6  ;;  %v5427_v33 = vpop.eup %5426  ;;  %5438 = vrcp.f32 %v6173_v27  ;;  %v6192_v38 = vadd.f32 1.0, %v5425_v31  ;;  %v6242_v7 = vadd.f32 %v6110_v26, %v539_v62  ;;  %vm6303_vm7 = vcmp.eq.f32.partialorder %v724_v23, 8.507059e+37 }
  0xd2   : > { %v5429_v36 = vpop.eup %5428  ;;  %5440 = vtanh.f32 %v6188_v35  ;;  %v6198_v42 = vadd.f32 1.0, %v5427_v33 }
  0xd3   : > { %v5431_v39 = vpop.eup %5430  ;;  %5442 = vrcp.f32 %v6180_v32 }
  0xd4   : > { %v5433_v41 = vpop.eup %5432  ;;  %5444 = vrcp.f32 %v6184_v34  ;;  %v6207_v47 = vadd.f32 1.0, %v5431_v39 }
  0xd5   : > { %v6200_v43 = vpop.eup %5434  ;;  %5446 = vpow2.f32 %v5199_v37  ;;  %v559_v52 = vpop.f32.mrf.mxu2 }
  0xd6   : > { %v5437_v46 = vpop.eup %5436  ;;  %5448 = vrcp.f32 %v6192_v38  ;;  %v836_v54 = vmul.f32 %v6200_v43, %v6166_v21  ;;  %v6229_v63 = vadd.f32 %v6110_v26, %v559_v52  ;;  %v579_v4 = vpop.f32.mrf.mxu3  ;;  %vm841_vm4 = vweird.f32 %v6200_v43 }
  0xd7   : > { %v6209_v48 = vpop.eup %5438  ;;  %5450 = vtanh.f32 %v6204_v45  ;;  %v6249_v56 = vadd.f32 %v6110_v26, %v579_v4  ;;  %v522_v11 = vpop.f32.mrf.mxu0  ;;  %vm6285_vm5 = vmor %vm840_vm3, %vm841_vm4  ;;  %v847_v52 = vor.u32 1.1754944e-38, %v846_v22  ;;  %vm975_vm9 = vweird.f32 %v6207_v47 }
  0xd8   : > { %1265 = vrot.lane.b32.xlu1 %v5421_v25, %s5952_s6  ;;  %1313 = vrot.lane.b32.xlu0 %v5423_v28, %s5952_s6  ;;  %v5441_v51 = vpop.eup %5440  ;;  %5452 = vrcp.f32 %v6198_v42  ;;  %v716_v59 = vmul.f32 %v6209_v48, %v6173_v27  ;;  %v837_v1 = vsub.f32 1.0, %v836_v54  ;;  %v6254_v17 = vadd.f32 %v6110_v26, %v522_v11  ;;  %v542_v50 = vpop.f32.mrf.mxu1 }
  0xd9   : > { %1267 = vrot.lane.b32.xlu2 %v5429_v36, %s5952_s6  ;;  %v6216_v53 = vpop.eup %5442  ;;  %5454 = vpow2.f32 %v5176_v44  ;;  %v726_v54 = vand.u32 2147483648, %v6173_v27  ;;  %vm721_vm6 = vweird.f32 %v6209_v48  ;;  %v6300_v62 = vadd.f32 %v6110_v26, %v542_v50 }
  0xda   : > { %v6220_v55 = vpop.eup %5444  ;;  %5456 = vrcp.f32 %v6207_v47  ;;  %v717_v12 = vsub.f32 1.0, %v716_v59  ;;  %v838_v19 = vmul.f32 %v6200_v43, %v837_v1  ;;  %v981_v23 = vand.u32 2147483648, %v6207_v47  ;;  %vm6330_vm10 = vmor %vm720_vm2, %vm721_vm6 }
  0xdb   : > { %v5447_v60 = vpop.eup %5446  ;;  %5458 = vpow2.f32 %v5200_v49  ;;  %vm961_vm14 = vweird.f32 %v6216_v53  ;;  %vm1080_vm3 = vweird.f32 %v6184_v34 }
  0xdc   : > { %v6232_v0 = vpop.eup %5448  ;;  %5460 = vtanh.f32 %v6225_v58  ;;  %v6251_v14 = vadd.f32 1.0, %v5447_v60  ;;  %v718_v39 = vmul.f32 %v6209_v48, %v717_v12  ;;  %v839_v44 = vadd.f32 %v6200_v43, %v838_v19  ;;  %vm6420_vm1 = vmor %vm960_vm11, %vm961_vm14 }
  0xdd   : > { %v5451_v2 = vpop.eup %5450  ;;  %5462 = vtanh.f32 %v6229_v63  ;;  %v562_v30 = vpop.f32.mrf.mxu2 }
  0xde   : > { %v6239_v5 = vpop.eup %5452  ;;  %5464 = vpow2.f32 %v5184_v57  ;;  %v6270_v36 = vadd.f32 %v6110_v26, %v562_v30 }
  0xdf   : > { %v5455_v8 = vpop.eup %5454  ;;  %5466 = vpow2.f32 %v5185_v61  ;;  %v5177_v61 = vmul.f32 -1.442695, %v6154_v6  ;;  %v582_v6 = vpop.f32.mrf.mxu3 }
  0xe0   : > { %1297 = vrot.lane.b32.xlu1 %v5437_v46, %s5952_s6  ;;  %1283 = vrot.lane.b32.xlu0 %v5433_v41, %s5952_s6  ;;  %v6245_v10 = vpop.eup %5456  ;;  %5468 = vtanh.f32 %v6242_v7  ;;  %v6261_v28 = vadd.f32 1.0, %v5455_v8  ;;  %v5178_v41 = vmul.f32 -1.442695, %v6164_v18  ;;  %v844_v46 = vand.u32 2147483647, %v6166_v21  ;;  %v524_v22 = vpop.f32.mrf.mxu0 }
  0xe1   : > { %1299 = vrot.lane.b32.xlu2 %v5441_v51, %s5952_s6  ;;  %v5459_v13 = vpop.eup %5458  ;;  %5470 = vpow2.f32 %v5192_v3  ;;  %v971_v37 = vmul.f32 %v6245_v10, %v6207_v47  ;;  %v956_v18 = vmul.f32 %v6216_v53, %v6180_v32  ;;  %v843_v8 = vsel %vm6285_vm5, %v6200_v43, %v839_v44 }
  0xe2   : > { %v5461_v20 = vpop.eup %5460  ;;  %5472 = vtanh.f32 %v6249_v56  ;;  %v6267_v33 = vadd.f32 1.0, %v5459_v13  ;;  %vm6312_vm8 = vcmp.eq.f32.partialorder %v844_v46, 8.507059e+37  ;;  %v727_v13 = vor.u32 1.1754944e-38, %v726_v54 }
  0xe3   : > { %v5463_v25 = vpop.eup %5462  ;;  %5474 = vtanh.f32 %v6254_v17  ;;  %v972_v59 = vsub.f32 1.0, %v971_v37  ;;  %v957_v19 = vsub.f32 1.0, %v956_v18  ;;  %v979_v43 = vand.u32 2147483647, %v6207_v47 }
  0xe4   : > { %v5465_v31 = vpop.eup %5464  ;;  %5476 = vrcp.f32 %v6251_v14  ;;  %v6350_v44 = vadd.f32 %v6110_v26, %v582_v6  ;;  %v964_v51 = vand.u32 2147483647, %v6180_v32  ;;  %vm976_vm12 = vweird.f32 %v6245_v10 }
  0xe5   : > { %v5467_v40 = vpop.eup %5466  ;;  %5478 = vtanh.f32 %v6270_v36  ;;  %v6293_v60 = vadd.f32 1.0, %v5465_v31  ;;  %v6337_v31 = vsel %vm6312_vm8, %v847_v52, %v843_v8  ;;  %v973_v37 = vmul.f32 %v6245_v10, %v972_v59  ;;  %v564_v46 = vpop.f32.mrf.mxu2  ;;  %vm6401_vm0 = vmor %vm975_vm9, %vm976_vm12 }
  0xe6   : > { %v5469_v49 = vpop.eup %5468  ;;  %5480 = vrcp.f32 %v6261_v28  ;;  %v6307_v1 = vadd.f32 1.0, %v5467_v40  ;;  %v5193_v40 = vmul.f32 -1.442695, %v6176_v29  ;;  %v958_v50 = vmul.f32 %v6216_v53, %v957_v19 }
  0xe7   : > { %v5471_v57 = vpop.eup %5470  ;;  %5482 = vrcp.f32 %v6267_v33  ;;  %v5186_v29 = vmul.f32 -1.442695, %v6171_v24  ;;  %v6367_v18 = vadd.f32 %v6110_v26, %v564_v46  ;;  %v1076_v24 = vmul.f32 %v6220_v55, %v6184_v34 }
  0xe8   : > { %1315 = vrot.lane.b32.xlu1 %v5451_v2, %s5952_s6  ;;  %1301 = vrot.lane.b32.xlu0 %v5463_v25, %s5952_s6  ;;  %v5473_v21 = vpop.eup %5472  ;;  %v719_v2 = vadd.f32 %v6209_v48, %v718_v39  ;;  %5484 = vpow2.f32 %v5178_v41  ;;  %v6316_v12 = vadd.f32 1.0, %v5471_v57  ;;  %v5201_v41 = vmul.f32 -1.442695, %v6158_v9  ;;  %v544_v57 = vpop.f32.mrf.mxu1 }
  0xe9   : > { %1269 = vrot.lane.b32.xlu2 %v5461_v20, %s5952_s6  ;;  %v5475_v4 = vpop.eup %5474  ;;  %5486 = vtanh.f32 %v6300_v62  ;;  %v966_v9 = vand.u32 2147483648, %v6180_v32  ;;  %vm6374_vm13 = vcmp.eq.f32.partialorder %v979_v43, 8.507059e+37  ;;  %v959_v8 = vadd.f32 %v6216_v53, %v958_v50 }
  0xea   : > { %v6319_v20 = vpop.eup %5476  ;;  %5488 = vrcp.f32 %v6293_v60  ;;  %v723_v39 = vsel %vm6330_vm10, %v6209_v48, %v719_v2  ;;  %v6356_v48 = vadd.f32 %v6110_v26, %v524_v22  ;;  %v982_v2 = vor.u32 1.1754944e-38, %v981_v23 }
  0xeb   : > { %v5479_v30 = vpop.eup %5478  ;;  %5490 = vpow2.f32 %v5177_v61  ;;  %v974_v61 = vadd.f32 %v6245_v10, %v973_v37  ;;  %vm6385_vm15 = vcmp.eq.f32.partialorder %v964_v51, 8.507059e+37  ;;  %v6394_v3 = vadd.f32 %v6110_v26, %v544_v57 }
  0xec   : > { %v6344_v27 = vpop.eup %5480  ;;  %5492 = vrcp.f32 %v6307_v1  ;;  %v967_v37 = vor.u32 1.1754944e-38, %v966_v9  ;;  %v5202_v47 = vmul.f32 -1.442695, %v6204_v45  ;;  %v1116_v46 = vand.u32 2147483648, %v6267_v33 }
  0xed   : > { %5494 = vrcp.f32 %v6316_v12  ;;  %v5179_v51 = vmul.f32 -1.442695, %v6225_v58  ;;  %vm1110_vm2 = vweird.f32 %v6267_v33  ;;  %vm885_vm4 = vweird.f32 %v6307_v1 }
  0xee   : > { %5496 = vtanh.f32 %v6350_v44  ;;  %v5203_v43 = vmul.f32 -1.442695, %v6249_v56  ;;  %vm1081_vm5 = vweird.f32 %v6220_v55  ;;  %v5180_v56 = vmul.f32 -1.442695, %v6254_v17 }
  0xef   : > { %5498 = vtanh.f32 %v6356_v48  ;;  %vm6493_vm8 = vmor %vm1080_vm3, %vm1081_vm5 }
  0xf0   : > { %1285 = vrot.lane.b32.xlu1 %v5469_v49, %s5952_s6  ;;  %1271 = vrot.lane.b32.xlu0 %v5475_v4, %s5952_s6  ;;  %v6352_v49 = vpop.eup %5482  ;;  %5500 = vpow2.f32 %v5193_v40  ;;  %v6380_v4 = vsel %vm6303_vm7, %v727_v13, %v723_v39  ;;  %v584_v13 = vpop.f32.mrf.mxu3  ;;  %v1077_v39 = vsub.f32 1.0, %v1076_v24 }
  0xf1   : > { %1317 = vrot.lane.b32.xlu2 %v5473_v21, %s5952_s6  ;;  %v5485_v52 = vpop.eup %5484  ;;  %5502 = vtanh.f32 %v6367_v18  ;;  %v1106_v23 = vmul.f32 %v6352_v49, %v6267_v33  ;;  %vm1111_vm7 = vweird.f32 %v6352_v49 }
  0xf2   : > { %v5487_v54 = vpop.eup %5486  ;;  %5504 = vpow2.f32 %v5201_v41  ;;  %v6391_v22 = vadd.f32 1.0, %v5485_v52  ;;  %v5194_v41 = vmul.f32 -1.442695, %v6188_v35  ;;  %v6426_v52 = vadd.f32 %v6110_v26, %v584_v13  ;;  %vm6519_vm10 = vmor %vm1110_vm2, %vm1111_vm7 }
  0xf3   : > { %v6372_v21 = vpop.eup %5488  ;;  %5506 = vpow2.f32 %v5186_v29  ;;  %v963_v35 = vsel %vm6420_vm1, %v6216_v53, %v959_v8  ;;  %v5187_v29 = vmul.f32 -1.442695, %v6242_v7  ;;  %v1107_v58 = vsub.f32 1.0, %v1106_v23 }
  0xf4   : > { %v5491_v6 = vpop.eup %5490  ;;  %5508 = vtanh.f32 %v6394_v3  ;;  %v1078_v53 = vmul.f32 %v6220_v55, %v1077_v39  ;;  %v6447_v7 = vor.u32 1.1754944e-38, %v1116_v46  ;;  %v6451_v24 = vsel %vm6385_vm15, %v967_v37, %v963_v35 }
  0xf5   : > { %v6389_v19 = vpop.eup %5492  ;;  %5510 = vrcp.f32 %v6391_v22  ;;  %v1108_v11 = vmul.f32 %v6352_v49, %v1107_v58  ;;  %v891_v23 = vand.u32 2147483648, %v6307_v1  ;;  %v1084_v35 = vand.u32 2147483647, %v6184_v34 }
  0xf6   : > { %v6407_v25 = vpop.eup %5494  ;;  %v881_v45 = vmul.f32 %v6389_v19, %v6307_v1  ;;  %5512 = vtanh.f32 %v6426_v52  ;;  %v6466_v37 = vadd.f32 %v6220_v55, %v1078_v53  ;;  %vm886_vm9 = vweird.f32 %v6389_v19 }
  0xf7   : > { %v5497_v40 = vpop.eup %5496  ;;  %5514 = vpow2.f32 %v5194_v41  ;;  %v1091_v41 = vmul.f32 %v6319_v20, %v6251_v14  ;;  %v1086_v53 = vand.u32 2147483648, %v6184_v34  ;;  %vm6543_vm11 = vmor %vm885_vm4, %vm886_vm9  ;;  %vm1085_vm12 = vcmp.eq.f32.partialorder %v1084_v35, 8.507059e+37 }
  0xf8   : > { %1303 = vrot.lane.b32.xlu1 %v5479_v30, %s5952_s6  ;;  %v978_v30 = vsel %vm6401_vm0, %v6245_v10, %v974_v61  ;;  %v5499_v10 = vpop.eup %5498  ;;  %1319 = vrot.lane.b32.xlu0 %v5497_v40, %s5952_s6  ;;  %v1114_v61 = vand.u32 2147483647, %v6267_v33  ;;  %v882_v8 = vsub.f32 1.0, %v881_v45  ;;  %5516 = vpow2.f32 %v5179_v51 }
  0xf9   : > { %1287 = vrot.lane.b32.xlu2 %v5487_v54, %s5952_s6  ;;  %v5501_v32 = vpop.eup %5500  ;;  %v6439_v26 = vsel %vm6374_vm13, %v982_v2, %v978_v30  ;;  %v6441_v54 = vadd.f32 1.0, %v5491_v6  ;;  %v5195_v6 = vmul.f32 -1.442695, %v6229_v63  ;;  %v889_v40 = vand.u32 2147483647, %v6307_v1 }
  0xfa   : > { %v5503_v9 = vpop.eup %5502  ;;  %v6454_v2 = vadd.f32 1.0, %v5501_v32  ;;  %vm6472_vm6 = vcmp.eq.f32.partialorder %v1114_v61, 8.507059e+37  ;;  %v883_v17 = vmul.f32 %v6389_v19, %v882_v8  ;;  %v1083_v32 = vsel %vm6493_vm8, %v6220_v55, %v6466_v37 }
  0xfb   : > { %v5505_v57 = vpop.eup %5504  ;;  %5518 = vrcp.f32 %v6441_v54  ;;  %v5181_v8 = vmul.f32 -1.442695, %v6356_v48  ;;  %vm1095_vm13 = vweird.f32 %v6251_v14  ;;  %v731_v35 = vmul.f32 %v6232_v0, %v6192_v38 }
  0xfc   : > { %v5507_v59 = vpop.eup %5506  ;;  %v6463_v30 = vadd.f32 1.0, %v5505_v57  ;;  %5520 = vpow2.f32 %v5202_v47  ;;  %v1109_v47 = vadd.f32 %v6352_v49, %v1108_v11  ;;  %v1092_v57 = vsub.f32 1.0, %v1091_v41 }
  0xfd   : > { %v5509_v13 = vpop.eup %5508  ;;  %5522 = vrcp.f32 %v6454_v2  ;;  %v6480_v50 = vadd.f32 1.0, %v5507_v59  ;;  %v5188_v59 = vmul.f32 -1.442695, %v6300_v62  ;;  %v6524_v34 = vadd.f32 %v6389_v19, %v883_v17 }
  0xfe   : > { %v6469_v63 = vpop.eup %5510  ;;  %5524 = vpow2.f32 %v5187_v29  ;;  %v6529_v62 = vmul.f32 -1.442695, %v6394_v3  ;;  %v1113_v48 = vsel %vm6519_vm10, %v6352_v49, %v1109_v47  ;;  %v1087_v49 = vor.u32 1.1754944e-38, %v1086_v53  ;;  %v6586_v53 = vpop.permute.xlu0 %5317 }
  0xff   : > { %v5513_v46 = vpop.eup %5512  ;;  %5526 = vrcp.f32 %v6463_v30  ;;  %v776_v29 = vmul.f32 %v6469_v63, %v6391_v22  ;;  %v888_v1 = vsel %vm6543_vm11, %v6389_v19, %v6524_v34  ;;  %v5197_v47 = vmul.f32 -1.442695, %v6367_v18  ;;  %9449 = vst [vmem:[#allocation11_spill] sm:$0xff] %v6586_v53 }
 0x100   : > { %1273 = vrot.lane.b32.xlu1 %v5499_v10, %s5952_s6  ;;  %1289 = vrot.lane.b32.xlu0 %v5509_v13, %s5952_s6  ;;  %v6487_v10 = vor.u32 1.1754944e-38, %v891_v23  ;;  %v5515_v45 = vpop.eup %5514  ;;  %5528 = vpow2.f32 %v5195_v6  ;;  %v6513_v13 = vpop.permute.xlu2 %5312  ;;  %v5204_v23 = vmul.f32 -1.442695, %v6350_v44  ;;  %v6555_v44 = vsel %vm6472_vm6, %v6447_v7, %v1113_v48 }
 0x101   : > { %1305 = vrot.lane.b32.xlu2 %v5503_v9, %s5952_s6  ;;  %v5517_v58 = vpop.eup %5516  ;;  %v5196_v9 = vmul.f32 -1.442695, %v6270_v36  ;;  %5530 = vrcp.f32 %v6480_v50  ;;  %9442 = vst [vmem:[#allocation10_spill] sm:$0xff] %v6513_v13  ;;  %v6526_v6 = vadd.f32 1.0, %v5515_v45  ;;  %v777_v37 = vsub.f32 1.0, %v776_v29 }
 0x102   : > { %v6508_v61 = vpop.eup %5518  ;;  %5532 = vpow2.f32 %v5203_v43  ;;  %v6536_v33 = vadd.f32 1.0, %v5517_v58  ;;  %v1093_v43 = vmul.f32 %v6319_v20, %v1092_v57  ;;  %v6564_v51 = vsel %vm1085_vm12, %v1087_v49, %v1083_v32 }
 0x103   : > { %v5521_v36 = vpop.eup %5520  ;;  %5534 = vpow2.f32 %v5180_v56  ;;  %vm6573_vm14 = vcmp.eq.f32.partialorder %v889_v40, 8.507059e+37  ;;  %vm1096_vm15 = vweird.f32 %v6319_v20  ;;  %v778_v45 = vmul.f32 %v6469_v63, %v777_v37 }
 0x104   : > { %v6534_v11 = vpop.eup %5522  ;;  %5536 = vpow2.f32 %v5196_v9  ;;  %v6550_v56 = vadd.f32 1.0, %v5521_v36  ;;  %v1094_v32 = vadd.f32 %v6319_v20, %v1093_v43  ;;  %v1099_v29 = vand.u32 2147483647, %v6251_v14  ;;  %vm6601_vm2 = vmor %vm1095_vm13, %vm1096_vm15 }
 0x105   : > { %v5525_v41 = vpop.eup %5524  ;;  %5538 = vrcp.f32 %v6526_v6  ;;  %v746_v58 = vmul.f32 %v6344_v27, %v6261_v28  ;;  %vm780_vm0 = vweird.f32 %v6391_v22  ;;  %vm781_vm1 = vweird.f32 %v6469_v63 }
 0x106   : > { %5540 = vrcp.f32 %v6536_v33  ;;  %v6571_v7 = vadd.f32 1.0, %v5525_v41  ;;  %v786_v55 = vand.u32 2147483648, %v6391_v22  ;;  %v732_v34 = vsub.f32 1.0, %v731_v35  ;;  %vm6616_vm3 = vmor %vm780_vm0, %vm781_vm1 }
 0x107   : > { %5542 = vpow2.f32 %v5188_v59  ;;  %v1101_v59 = vand.u32 2147483648, %v6251_v14  ;;  %v784_v41 = vand.u32 2147483647, %v6391_v22  ;;  %v5205_v43 = vmul.f32 -1.442695, %v6426_v52 }
 0x108   : > { %1321 = vrot.lane.b32.xlu1 %v5513_v46, %s5952_s6  ;;  %v6548_v46 = vpop.eup %5526  ;;  %5544 = vrcp.f32 %v6550_v56  ;;  %vm1100_vm4 = vcmp.eq.f32.partialorder %v1099_v29, 8.507059e+37  ;;  %v787_v22 = vor.u32 1.1754944e-38, %v786_v55  ;;  %vm735_vm6 = vweird.f32 %v6192_v38 }
 0x109   : > { %v5529_v17 = vpop.eup %5528  ;;  %5546 = vpow2.f32 %v5181_v8  ;;  %v779_v8 = vadd.f32 %v6469_v63, %v778_v45  ;;  %vm785_vm5 = vcmp.eq.f32.partialorder %v784_v41, 8.507059e+37  ;;  %vm736_vm7 = vweird.f32 %v6232_v0 }
 0x10a   : > { %v6568_v39 = vpop.eup %5530  ;;  %v6584_v40 = vadd.f32 1.0, %v5529_v17  ;;  %5548 = vrcp.f32 %v6571_v7  ;;  %v747_v17 = vsub.f32 1.0, %v746_v58  ;;  %v741_v19 = vand.u32 2147483648, %v6192_v38  ;;  %vm6681_vm10 = vmor %vm735_vm6, %vm736_vm7 }
 0x10b   : > { %v5533_v18 = vpop.eup %5532  ;;  %v6595_v48 = vpop.permute.xlu2 %1275  ;;  %5550 = vpow2.f32 %v5204_v23  ;;  %v1098_v23 = vsel %vm6601_vm2, %v6319_v20, %v1094_v32  ;;  %v783_v58 = vsel %vm6616_vm3, %v6469_v63, %v779_v8  ;;  %vm750_vm8 = vweird.f32 %v6261_v28 }
 0x10c   : > { %v5535_v9 = vpop.eup %5534  ;;  %v6593_v36 = vadd.f32 1.0, %v5533_v18  ;;  %5552 = vrcp.f32 %v6584_v40  ;;  %v1102_v18 = vor.u32 1.1754944e-38, %v1101_v59  ;;  %v748_v29 = vmul.f32 %v6344_v27, %v747_v17 }
 0x10d   : > { %v5537_v57 = vpop.eup %5536  ;;  %v6609_v49 = vadd.f32 1.0, %v5535_v9  ;;  %5554 = vpow2.f32 %v5197_v47  ;;  %v733_v9 = vmul.f32 %v6232_v0, %v732_v34  ;;  %v6641_v47 = vsel %vm6573_vm14, %v6487_v10, %v888_v1 }
 0x10e   : > { %v6607_v3 = vpop.eup %5538  ;;  %v6623_v45 = vadd.f32 1.0, %v5537_v57  ;;  %5556 = vrcp.f32 %v6593_v36  ;;  %v851_v57 = vmul.f32 %v6239_v5, %v6198_v42  ;;  %v6643_v32 = vsel %vm1100_vm4, %v1102_v18, %v1098_v23 }
 0x10f   : > { %v6620_v35 = vpop.eup %5540  ;;  %5558 = vrcp.f32 %v6609_v49  ;;  %v6653_v37 = vsel %vm785_vm5, %v787_v22, %v783_v58  ;;  %v734_v10 = vadd.f32 %v6232_v0, %v733_v9  ;;  %v739_v1 = vand.u32 2147483647, %v6192_v38 }
 0x110   : > { %9454 = vst [vmem:[#allocation12_spill] sm:$0xff] %v6623_v45  ;;  %v5543_v52 = vpop.eup %5542  ;;  %5560 = vrcp.f32 %v6623_v45  ;;  %v1016_v17 = vmul.f32 %v6607_v3, %v6526_v6  ;;  %v852_v23 = vsub.f32 1.0, %v851_v57  ;;  %v749_v18 = vadd.f32 %v6344_v27, %v748_v29 }
 0x111   : > { %v6629_v16 = vpop.eup %5544  ;;  %v6649_v63 = vadd.f32 1.0, %v5543_v52  ;;  %5562 = vpow2.f32 %v6529_v62  ;;  %vm751_vm9 = vweird.f32 %v6344_v27  ;;  %v791_v22 = vmul.f32 %v6620_v35, %v6536_v33 }
 0x112   : > { %v5547_v20 = vpop.eup %5546  ;;  %v754_v57 = vand.u32 2147483647, %v6261_v28  ;;  %vm740_vm11 = vcmp.eq.f32.partialorder %v739_v1, 8.507059e+37  ;;  %v742_v53 = vor.u32 1.1754944e-38, %v741_v19  ;;  %v1017_v45 = vsub.f32 1.0, %v1016_v17  ;;  %vm6703_vm12 = vmor %vm750_vm8, %vm751_vm9 }
 0x113   : > { %v6646_v59 = vpop.eup %5548  ;;  %v6660_v41 = vadd.f32 1.0, %v5547_v20  ;;  %5564 = vrcp.f32 %v6649_v63  ;;  %v756_v20 = vand.u32 2147483648, %v6261_v28  ;;  %v853_v58 = vmul.f32 %v6239_v5, %v852_v23 }
 0x114   : > { %v5551_v34 = vpop.eup %5550  ;;  %5566 = vpow2.f32 %v5205_v43  ;;  %vm9343_vm13 = vcmask 261120   ;;  %v792_v1 = vsub.f32 1.0, %v791_v22  ;;  %vm755_vm14 = vcmp.eq.f32.partialorder %v754_v57, 8.507059e+37 }
 0x115   : > { %v6658_v8 = vpop.eup %5552  ;;  %9455 = vst [vmem:[#allocation13_spill] sm:$0xff] %v6660_v41  ;;  %v6675_v62 = vadd.f32 1.0, %v5551_v34  ;;  %v738_v34 = vsel %vm6681_vm10, %v6232_v0, %v734_v10  ;;  %5568 = vrcp.f32 %v6660_v41  ;;  %v753_v10 = vsel %vm6703_vm12, %v6344_v27, %v749_v18 }
 0x116   : > { %v5555_v52 = vpop.eup %5554  ;;  %v743_v28 = vsel %vm740_vm11, %v742_v53, %v738_v34  ;;  %vm855_vm15 = vweird.f32 %v6198_v42  ;;  %vm856_vm0 = vweird.f32 %v6239_v5  ;;  %v1018_v27 = vmul.f32 %v6607_v3, %v1017_v45 }
 0x117   : > { %v6672_v9 = vpop.eup %5556  ;;  %9456 = vst [vmem:[#allocation14_spill] sm:$0xff] %v6675_v62  ;;  %v6697_v13 = vadd.f32 1.0, %v5555_v52  ;;  %5570 = vrcp.f32 %v6675_v62  ;;  %v757_v52 = vor.u32 1.1754944e-38, %v756_v20  ;;  %v854_v53 = vadd.f32 %v6239_v5, %v853_v58  ;;  %vm6751_vm3 = vmor %vm855_vm15, %vm856_vm0 }
 0x118   : > { %v6687_v29 = vpop.eup %5558  ;;  %v6730_v20 = vmul.f32 %v6595_v48, %v6337_v31  ;;  %v793_v43 = vmul.f32 %v6620_v35, %v792_v1  ;;  %vm1020_vm1 = vweird.f32 %v6526_v6  ;;  %vm1021_vm2 = vweird.f32 %v6607_v3 }
 0x119   : > { %v6663_v14 = vpop.permute.xlu2 %1293  ;;  %v6694_v38 = vpop.eup %5560  ;;  %5572 = vrcp.f32 %v6697_v13  ;;  %v6723_v18 = vsel %vm755_vm14, %v757_v52, %v753_v10  ;;  %v866_v31 = vmul.f32 %v6372_v21, %v6293_v60  ;;  %v1026_v58 = vand.u32 2147483648, %v6526_v6  ;;  %vm6776_vm6 = vmor %vm1020_vm1, %vm1021_vm2 }
 0x11a   : > { %v5563_v19 = vpop.eup %5562  ;;  %9464 = vst [vmem:[#allocation18_spill] sm:$0xff] %v6730_v20  ;;  %vm795_vm5 = vweird.f32 %v6536_v33  ;;  %v1019_v52 = vadd.f32 %v6607_v3, %v1018_v27  ;;  %v799_v27 = vand.u32 2147483647, %v6536_v33  ;;  %vm796_vm7 = vweird.f32 %v6620_v35 }
 0x11b   : > { %v6719_v23 = vpop.eup %5564  ;;  %v6726_v57 = vadd.f32 1.0, %v5563_v19  ;;  %vm6805_vm9 = vmor %vm795_vm5, %vm796_vm7  ;;  %vm870_vm11 = vweird.f32 %v6293_v60  ;;  %vm871_vm12 = vweird.f32 %v6372_v21  ;;  %vm990_vm14 = vweird.f32 %v6316_v12 }
 0x11c   : > { %v5567_v22 = vpop.eup %5566  ;;  %vm6809_vm10 = vcmp.eq.f32.partialorder %v799_v27, 8.507059e+37  ;;  %vm991_vm15 = vweird.f32 %v6407_v25  ;;  %vm6857_vm0 = vmor %vm870_vm11, %vm871_vm12  ;;  %vm1156_vm5 = vweird.f32 %v6672_v9  ;;  %vm1125_vm11 = vweird.f32 %v6463_v30 }
 0x11d   : > { %9463 = vst [vmem:[#allocation17_spill] sm:$0xff] %v6726_v57  ;;  %v6735_v15 = vpop.eup %5568  ;;  %5574 = vrcp.f32 %v6726_v57  ;;  %vm1126_vm12 = vweird.f32 %v6548_v46 }
 0x11e   : > { %9465 = vst [vmem:[#allocation19_spill] sm:$0xff] %v6735_v15  ;;  %v6760_v19 = vpop.eup %5570  ;;  %v1395_v15 = vmul.f32 %v6730_v20, %v6730_v20 }
 0x11f   : > { %9471 = vst [vmem:[#allocation21_spill] sm:$0xff] %v6760_v19  ;;  %v6783_v10 = vpop.eup %5572  ;;  %v1027_v19 = vor.u32 1.1754944e-38, %v1026_v58 }
 0x122   : > { %v1260_v55 = vpop.permute.xlu0 %1259 }
 0x123   : > { %v6709_v0 = vmul.f32 %v1260_v55, %v6380_v4  ;;  %v859_v4 = vand.u32 2147483647, %v6198_v42  ;;  %v861_v55 = vand.u32 2147483648, %v6198_v42  ;;  %v6737_v41 = vpop.permute.xlu2 %1311  ;;  %v858_v42 = vsel %vm6751_vm3, %v6239_v5, %v854_v53  ;;  %vm6883_vm3 = vmor %vm990_vm14, %vm991_vm15 }
 0x124   : > { %vm1005_vm15 = vweird.f32 %v6454_v2 }
 0x125   : > { %9462 = vst [vmem:[#allocation16_spill] sm:$0xff] %v6709_v0  ;;  %v1387_v34 = vmul.f32 %v6709_v0, %v6709_v0  ;;  %vm6755_vm4 = vcmp.eq.f32.partialorder %v859_v4, 8.507059e+37  ;;  %v862_v1 = vor.u32 1.1754944e-38, %v861_v55  ;;  %v1024_v0 = vand.u32 2147483647, %v6526_v6  ;;  %v6831_v55 = vpop.eup %5574 }
 0x126   : > { %v867_v6 = vsub.f32 1.0, %v866_v31  ;;  %v1444_v31 = vsel %vm9343_vm13, %v1395_v15, 0.0 }
 0x127   : > { %v1420_v4 = vsel %vm9343_vm13, %v1387_v34, 0.0  ;;  %v794_v34 = vadd.f32 %v6620_v35, %v793_v43  ;;  %v863_v62 = vsel %vm6755_vm4, %v862_v1, %v858_v42  ;;  %vm1025_vm8 = vcmp.eq.f32.partialorder %v1024_v0, 8.507059e+37 }
 0x128   : > { %v801_v43 = vand.u32 2147483648, %v6536_v33  ;;  %v868_v15 = vmul.f32 %v6372_v21, %v867_v6  ;;  %v1151_v33 = vmul.f32 %v6672_v9, %v6593_v36  ;;  %v876_v42 = vand.u32 2147483648, %v6293_v60 }
 0x129   : > { %v1292_v48 = vpop.permute.xlu1 %1291  ;;  %v798_v0 = vsel %vm6805_vm9, %v6620_v35, %v794_v34  ;;  %v874_v35 = vand.u32 2147483647, %v6293_v60  ;;  %vm1155_vm4 = vweird.f32 %v6593_v36  ;;  %vm766_vm9 = vweird.f32 %v6508_v61 }
 0x12a   : > { %v1308_v17 = vpop.permute.xlu0 %1307  ;;  %v6791_v20 = vmul.f32 %v1292_v48, %v6451_v24  ;;  %1421 = vadd.xlane.f32.xlu2 %v1420_v4  ;;  %1445 = vadd.xlane.f32.xlu0 %v1444_v31  ;;  %v994_v4 = vand.u32 2147483647, %v6316_v12  ;;  %v869_v6 = vadd.f32 %v6372_v21, %v868_v15  ;;  %v996_v15 = vand.u32 2147483648, %v6316_v12  ;;  %vm6922_vm7 = vmor %vm1155_vm4, %vm1156_vm5 }
 0x12b   : > { %v6740_v45 = vmul.f32 %v1308_v17, %v6564_v51  ;;  %v6762_v17 = vadd.f32 1.0, %v5567_v22  ;;  %v986_v22 = vmul.f32 %v6407_v25, %v6316_v12  ;;  %v6826_v1 = vpop.permute.xlu2 %1281  ;;  %vm6863_vm1 = vcmp.eq.f32.partialorder %v874_v35, 8.507059e+37 }
 0x12c   : > { %9474 = vst [vmem:[#allocation22_spill] sm:$0xff] %v6791_v20  ;;  %vm6867_vm2 = vcmp.eq.f32.partialorder %v994_v4, 8.507059e+37  ;;  %v873_v35 = vsel %vm6857_vm0, %v6372_v21, %v869_v6  ;;  %vm6982_vm0 = vmor %vm1125_vm11, %vm1126_vm12  ;;  %vm901_vm4 = vweird.f32 %v6568_v39  ;;  %vm1140_vm5 = vweird.f32 %v6550_v56 }
 0x12d   : > { %9466 = vst [vmem:[#allocation20_spill] sm:$0xff] %v6740_v45  ;;  %v1411_v5 = vmul.f32 %v6740_v45, %v6740_v45  ;;  %5576 = vrcp.f32 %v6762_v17  ;;  %v1023_v45 = vsel %vm6776_vm6, %v6607_v3, %v1019_v52  ;;  %v987_v58 = vsub.f32 1.0, %v986_v22 }
 0x12e   : > { %v6822_v51 = vsel %vm1025_vm8, %v1027_v19, %v1023_v45  ;;  %v802_v52 = vor.u32 1.1754944e-38, %v801_v43  ;;  %v761_v22 = vmul.f32 %v6508_v61, %v6441_v54  ;;  %v1152_v43 = vsub.f32 1.0, %v1151_v33 }
 0x12f   : > { %v1492_v3 = vsel %vm9343_vm13, %v1411_v5, 0.0  ;;  %v988_v19 = vmul.f32 %v6407_v25, %v987_v58  ;;  %vm765_vm6 = vweird.f32 %v6441_v54 }
 0x130   : > { %v6843_v34 = vsel %vm6809_vm10, %v802_v52, %v798_v0  ;;  %v762_v52 = vsub.f32 1.0, %v761_v22  ;;  %v1153_v4 = vmul.f32 %v6672_v9, %v1152_v43  ;;  %v1001_v0 = vmul.f32 %v6534_v11, %v6454_v2  ;;  %vm6964_vm14 = vmor %vm765_vm6, %vm766_vm9 }
 0x131   : > { %vm1141_vm6 = vweird.f32 %v6629_v16 }
 0x132   : > { %v1262_v53 = vpop.permute.xlu0 %1261  ;;  %v1310_v27 = vpop.permute.xlu1 %1309  ;;  %1493 = vadd.xlane.f32.xlu1 %v1492_v3  ;;  %v1121_v3 = vmul.f32 %v6548_v46, %v6463_v30  ;;  %vm7062_vm9 = vmor %vm1140_vm5, %vm1141_vm6  ;;  %vm915_vm6 = vweird.f32 %v6571_v7 }
 0x133   : > { %v6801_v57 = vmul.f32 %v1262_v53, %v743_v28  ;;  %v1403_v28 = vmul.f32 %v6791_v20, %v6791_v20  ;;  %v6839_v5 = vpop.eup %5576  ;;  %v6848_v31 = vmul.f32 %v1310_v27, %v6643_v32  ;;  %v877_v32 = vor.u32 1.1754944e-38, %v876_v42  ;;  %v6907_v48 = vpop.permute.xlu2 %1267 }
 0x134   : > { %v1159_v27 = vand.u32 2147483647, %v6593_v36  ;;  %v1122_v12 = vsub.f32 1.0, %v1121_v3 }
 0x135   : > { %9475 = vst [vmem:[#allocation23_spill] sm:$0xff] %v6801_v57  ;;  %v1388_v45 = vmul.f32 %v6801_v57, %v6801_v57  ;;  %v1468_v24 = vsel %vm9343_vm13, %v1403_v28, 0.0  ;;  %v989_v28 = vadd.f32 %v6407_v25, %v988_v19  ;;  %v6892_v19 = vmul.f32 %v6663_v14, %v6439_v26 }
 0x136   : > { %9480 = vst [vmem:[#allocation24_spill] sm:$0xff] %v6848_v31  ;;  %1469 = vadd.xlane.f32.xlu2 %v1468_v24  ;;  %v1412_v21 = vmul.f32 %v6848_v31, %v6848_v31  ;;  %v878_v43 = vsel %vm6863_vm1, %v877_v32, %v873_v35  ;;  %v763_v14 = vmul.f32 %v6508_v61, %v762_v52  ;;  %v769_v24 = vand.u32 2147483647, %v6441_v54 }
 0x137   : > { %v1423_v60 = vsel %vm9343_vm13, %v1388_v45, 0.0  ;;  %v1161_v45 = vand.u32 2147483648, %v6593_v36  ;;  %9490 = vst [vmem:[#allocation26_spill] sm:$0xff] %v6892_v19  ;;  %v993_v26 = vsel %vm6883_vm3, %v6407_v25, %v989_v28  ;;  %v1404_v25 = vmul.f32 %v6892_v19, %v6892_v19 }
 0x138   : > { %1424 = vadd.xlane.f32.xlu0 %v1423_v60  ;;  %v1495_v32 = vsel %vm9343_vm13, %v1412_v21, 0.0  ;;  %vm6926_vm8 = vcmp.eq.f32.partialorder %v1159_v27, 8.507059e+37  ;;  %v1123_v28 = vmul.f32 %v6548_v46, %v1122_v12  ;;  %v771_v35 = vand.u32 2147483648, %v6441_v54 }
 0x139   : > { %v1162_v60 = vor.u32 1.1754944e-38, %v1161_v45  ;;  %vm6938_vm10 = vcmp.eq.f32.partialorder %v769_v24, 8.507059e+37  ;;  %v1129_v21 = vand.u32 2147483647, %v6463_v30  ;;  %v1136_v12 = vmul.f32 %v6629_v16, %v6550_v56 }
 0x13a   : > { %v1278_v53 = vpop.permute.xlu0 %1277  ;;  %v1264_v6 = vpop.permute.xlu1 %1263  ;;  %v772_v24 = vor.u32 1.1754944e-38, %v771_v35  ;;  %vm900_vm3 = vweird.f32 %v6480_v50 }
 0x13b   : > { %v6851_v58 = vmul.f32 %v1278_v53, %v863_v62  ;;  %v997_v53 = vor.u32 1.1754944e-38, %v996_v15  ;;  %v6910_v3 = vmul.f32 %v1264_v6, %v6723_v18  ;;  %v1154_v15 = vadd.f32 %v6672_v9, %v1153_v4 }
 0x13c   : > { %v764_v4 = vadd.f32 %v6508_v61, %v763_v14  ;;  %v896_v62 = vmul.f32 %v6568_v39, %v6480_v50  ;;  %v1471_v6 = vsel %vm9343_vm13, %v1404_v25, 0.0  ;;  %vm6986_vm1 = vcmp.eq.f32.partialorder %v1129_v21, 8.507059e+37 }
 0x13d   : > { %9481 = vst [vmem:[#allocation25_spill] sm:$0xff] %v6851_v58  ;;  %v1396_v33 = vmul.f32 %v6851_v58, %v6851_v58  ;;  %v998_v52 = vsel %vm6867_vm2, %v997_v53, %v993_v26  ;;  %v1389_v36 = vmul.f32 %v6910_v3, %v6910_v3  ;;  %v1158_v45 = vsel %vm6922_vm7, %v6672_v9, %v1154_v15 }
 0x13e   : > { %9491 = vst [vmem:[#allocation27_spill] sm:$0xff] %v6910_v3  ;;  %1496 = vadd.xlane.f32.xlu2 %v1495_v32  ;;  %v6953_v53 = vmul.f32 %v6737_v41, %v6555_v44  ;;  %v1124_v26 = vadd.f32 %v6548_v46, %v1123_v28  ;;  %v1131_v41 = vand.u32 2147483648, %v6463_v30  ;;  %v768_v32 = vsel %vm6964_vm14, %v6508_v61, %v764_v4 }
 0x13f   : > { %v1447_v22 = vsel %vm9343_vm13, %v1396_v33, 0.0  ;;  %v1426_v44 = vsel %vm9343_vm13, %v1389_v36, 0.0  ;;  %v897_v54 = vsub.f32 1.0, %v896_v62  ;;  %v1137_v28 = vsub.f32 1.0, %v1136_v12 }
 0x140   : > { %1448 = vadd.xlane.f32.xlu1 %v1447_v22  ;;  %v1002_v22 = vsub.f32 1.0, %v1001_v0  ;;  %9498 = vst [vmem:[#allocation28_spill] sm:$0xff] %v6953_v53  ;;  %1472 = vadd.xlane.f32.xlu0 %v1471_v6  ;;  %v6972_v0 = vsel %vm6926_vm8, %v1162_v60, %v1158_v45  ;;  %v1413_v61 = vmul.f32 %v6953_v53, %v6953_v53  ;;  %vm1006_vm2 = vweird.f32 %v6534_v11  ;;  %vm7047_vm8 = vmor %vm900_vm3, %vm901_vm4 }
 0x141   : > { %v1009_v30 = vand.u32 2147483647, %v6454_v2  ;;  %v773_v36 = vsel %vm6938_vm10, %v772_v24, %v768_v32  ;;  %v1011_v62 = vand.u32 2147483648, %v6454_v2  ;;  %v898_v45 = vmul.f32 %v6568_v39, %v897_v54  ;;  %vm7031_vm7 = vmor %vm1005_vm15, %vm1006_vm2 }
 0x142   : > { %v1296_v42 = vpop.permute.xlu0 %1295  ;;  %v1280_v15 = vpop.permute.xlu1 %1279  ;;  %v1003_v60 = vmul.f32 %v6534_v11, %v1002_v22  ;;  %v1138_v22 = vmul.f32 %v6629_v16, %v1137_v28  ;;  %v7015_v12 = vmul.f32 %v6826_v1, %v6641_v47  ;;  %v1498_v6 = vsel %vm9343_vm13, %v1413_v61, 0.0 }
 0x143   : > { %v6958_v14 = vmul.f32 %v1296_v42, %v998_v52  ;;  %v6978_v25 = vmul.f32 %v1280_v15, %v878_v43  ;;  %v1128_v43 = vsel %vm6982_vm0, %v6548_v46, %v1124_v26  ;;  %v1300_v52 = vpop.permute.xlu2 %1299  ;;  %v1132_v42 = vor.u32 1.1754944e-38, %v1131_v41 }
 0x144   : > { %v1004_v27 = vadd.f32 %v6534_v11, %v1003_v60  ;;  %9507 = vst [vmem:[#allocation31_spill] sm:$0xff] %v7015_v12  ;;  %v904_v26 = vand.u32 2147483647, %v6480_v50  ;;  %v1031_v9 = vmul.f32 %v6658_v8, %v6584_v40  ;;  %v926_v1 = vmul.f32 %v6719_v23, %v6649_v63 }
 0x145   : > { %9499 = vst [vmem:[#allocation29_spill] sm:$0xff] %v6958_v14  ;;  %v1397_v35 = vmul.f32 %v6978_v25, %v6978_v25  ;;  %v1405_v4 = vmul.f32 %v6958_v14, %v6958_v14  ;;  %v1133_v21 = vsel %vm6986_vm1, %v1132_v42, %v1128_v43  ;;  %v899_v32 = vadd.f32 %v6568_v39, %v898_v45 }
 0x146   : > { %9502 = vst [vmem:[#allocation30_spill] sm:$0xff] %v6978_v25  ;;  %v1061_v54 = vmul.f32 %v6783_v10, %v6697_v13  ;;  %v1146_v33 = vand.u32 2147483648, %v6550_v56  ;;  %v1139_v28 = vadd.f32 %v6629_v16, %v1138_v22  ;;  %v1144_v61 = vand.u32 2147483647, %v6550_v56 }
 0x147   : > { %v1450_v46 = vsel %vm9343_vm13, %v1397_v35, 0.0  ;;  %v1474_v24 = vsel %vm9343_vm13, %v1405_v4, 0.0  ;;  %v1008_v43 = vsel %vm7031_vm7, %v6534_v11, %v1004_v27  ;;  %v1012_v35 = vor.u32 1.1754944e-38, %v1011_v62 }
 0x148   : > { %1427 = vadd.xlane.f32.xlu1 %v1426_v44  ;;  %1451 = vadd.xlane.f32.xlu2 %v1450_v46  ;;  %v906_v44 = vand.u32 2147483648, %v6480_v50  ;;  %v1032_v42 = vsub.f32 1.0, %v1031_v9  ;;  %vm7068_vm10 = vcmp.eq.f32.partialorder %v904_v26, 8.507059e+37  ;;  %v927_v46 = vsub.f32 1.0, %v926_v1 }
 0x149   : > { %1499 = vadd.xlane.f32.xlu0 %v1498_v6  ;;  %v903_v56 = vsel %vm7047_vm8, %v6568_v39, %v899_v32  ;;  %v1147_v27 = vor.u32 1.1754944e-38, %v1146_v33  ;;  %vm1010_vm11 = vcmp.eq.f32.partialorder %v1009_v30, 8.507059e+37  ;;  %v1143_v26 = vsel %vm7062_vm9, %v6629_v16, %v1139_v28 }
 0x14a   : > { %v1266_v41 = vpop.permute.xlu1 %1265  ;;  %v1314_v47 = vpop.permute.xlu0 %1313  ;;  %v907_v11 = vor.u32 1.1754944e-38, %v906_v44  ;;  %vm1145_vm12 = vcmp.eq.f32.partialorder %v1144_v61, 8.507059e+37  ;;  %v7082_v9 = vmul.f32 %v1300_v52, %v6822_v51  ;;  %v1033_v39 = vmul.f32 %v6658_v8, %v1032_v42 }
 0x14b   : > { %v7039_v18 = vmul.f32 %v1266_v41, %v773_v36  ;;  %v7041_v60 = vmul.f32 %v1314_v47, %v1133_v21  ;;  %v1398_v36 = vmul.f32 %v7015_v12, %v7015_v12  ;;  %v1062_v21 = vsub.f32 1.0, %v1061_v54  ;;  %v1270_v22 = vpop.permute.xlu2 %1269 }
 0x14c   : > { %9518 = vst [vmem:[#allocation34_spill] sm:$0xff] %v7082_v9  ;;  %v908_v41 = vsel %vm7068_vm10, %v907_v11, %v903_v56  ;;  %vm1035_vm14 = vweird.f32 %v6584_v40  ;;  %v911_v16 = vmul.f32 %v6646_v59, %v6571_v7  ;;  %v928_v51 = vmul.f32 %v6719_v23, %v927_v46 }
 0x14d   : > { %9510 = vst [vmem:[#allocation32_spill] sm:$0xff] %v7039_v18  ;;  %v1390_v4 = vmul.f32 %v7039_v18, %v7039_v18  ;;  %v1414_v62 = vmul.f32 %v7041_v60, %v7041_v60  ;;  %v1453_v44 = vsel %vm9343_vm13, %v1398_v36, 0.0  ;;  %v1063_v1 = vmul.f32 %v6783_v10, %v1062_v21 }
 0x14e   : > { %9511 = vst [vmem:[#allocation33_spill] sm:$0xff] %v7041_v60  ;;  %v1148_v15 = vsel %vm1145_vm12, %v1147_v27, %v1143_v26  ;;  %vm1036_vm15 = vweird.f32 %v6658_v8  ;;  %v1039_v33 = vand.u32 2147483647, %v6584_v40  ;;  %v806_v2 = vmul.f32 %v6687_v29, %v6609_v49 }
 0x14f   : > { %v1429_v6 = vsel %vm9343_vm13, %v1390_v4, 0.0  ;;  %v1501_v30 = vsel %vm9343_vm13, %v1414_v62, 0.0  ;;  %v1071_v28 = vand.u32 2147483648, %v6697_v13  ;;  %v1407_v61 = vmul.f32 %v7082_v9, %v7082_v9  ;;  %vm7136_vm4 = vmor %vm1035_vm14, %vm1036_vm15 }
 0x150   : > { %1475 = vadd.xlane.f32.xlu1 %v1474_v24  ;;  %1430 = vadd.xlane.f32.xlu2 %v1429_v6  ;;  %v1013_v24 = vsel %vm1010_vm11, %v1012_v35, %v1008_v43  ;;  %v1034_v43 = vadd.f32 %v6658_v8, %v1033_v39  ;;  %v1041_v35 = vand.u32 2147483648, %v6584_v40  ;;  %v936_v36 = vand.u32 2147483648, %v6649_v63 }
 0x151   : > { %1454 = vadd.xlane.f32.xlu0 %v1453_v44  ;;  %v912_v42 = vsub.f32 1.0, %v911_v16  ;;  %v7113_v45 = vadd.f32 %v6719_v23, %v928_v51  ;;  %v7116_v11 = vadd.f32 %v6783_v10, %v1063_v1  ;;  %vm1065_vm0 = vweird.f32 %v6697_v13  ;;  %v9547_v16 = vld [vmem:[#allocation13_spill] sm:$0xff] }
 0x152   : > { %v1298_v52 = vpop.permute.xlu1 %1297  ;;  %v1284_v47 = vpop.permute.xlu0 %1283  ;;  %vm1066_vm1 = vweird.f32 %v6783_v10  ;;  %v7122_v62 = vmul.f32 %v6907_v48, %v6653_v37  ;;  %vm930_vm2 = vweird.f32 %v6649_v63  ;;  %v807_v56 = vsub.f32 1.0, %v806_v2 }
 0x153   : > { %v7095_v32 = vmul.f32 %v1298_v52, %v1013_v24  ;;  %v7097_v54 = vmul.f32 %v1284_v47, %v908_v41  ;;  %v7127_v21 = vmul.f32 %v1270_v22, %v6843_v34  ;;  %vm931_vm3 = vweird.f32 %v6719_v23  ;;  %v1318_v26 = vpop.permute.xlu2 %1317  ;;  %v9525_v22 = vld [vmem:[#allocation12_spill] sm:$0xff] }
 0x154   : > { %9521 = vst [vmem:[#allocation37_spill] sm:$0xff] %v7122_v62  ;;  %v934_v27 = vand.u32 2147483647, %v6649_v63  ;;  %v1480_v6 = vsel %vm9343_vm13, %v1407_v61, 0.0  ;;  %v937_v24 = vor.u32 1.1754944e-38, %v936_v36  ;;  %v913_v34 = vmul.f32 %v6646_v59, %v912_v42  ;;  %vm7156_vm7 = vmor %vm930_vm2, %vm931_vm3  ;;  %v9534_v42 = vld [vmem:[#allocation14_spill] sm:$0xff] }
 0x155   : > { %9519 = vst [vmem:[#allocation35_spill] sm:$0xff] %v7095_v32  ;;  %v1406_v50 = vmul.f32 %v7095_v32, %v7095_v32  ;;  %v1399_v4 = vmul.f32 %v7097_v54, %v7097_v54  ;;  %v1046_v44 = vmul.f32 %v6694_v38, %v9525_v22  ;;  %v1038_v41 = vsel %vm7136_vm4, %v6658_v8, %v1034_v43  ;;  %vm7217_vm2 = vmor %vm1065_vm0, %vm1066_vm1 }
 0x156   : > { %9520 = vst [vmem:[#allocation36_spill] sm:$0xff] %v7097_v54  ;;  %vm7147_vm5 = vcmp.eq.f32.partialorder %v1039_v33, 8.507059e+37  ;;  %v1042_v40 = vor.u32 1.1754944e-38, %v1041_v35  ;;  %v1391_v51 = vmul.f32 %v7122_v62, %v7122_v62  ;;  %vm916_vm8 = vweird.f32 %v6646_v59 }
 0x157   : > { %v1477_v46 = vsel %vm9343_vm13, %v1406_v50, 0.0  ;;  %9522 = vst [vmem:[#allocation38_spill] sm:$0xff] %v7127_v21  ;;  %v1456_v48 = vsel %vm9343_vm13, %v1399_v4, 0.0  ;;  %v919_v8 = vand.u32 2147483647, %v6571_v7  ;;  %v808_v52 = vmul.f32 %v6687_v29, %v807_v56  ;;  %vm7185_vm12 = vmor %vm915_vm6, %vm916_vm8  ;;  %v9535_v4 = vld [vmem:[#allocation21_spill] sm:$0xff] }
 0x158   : > { %1502 = vadd.xlane.f32.xlu1 %v1501_v30  ;;  %1478 = vadd.xlane.f32.xlu2 %v1477_v46  ;;  %v921_v47 = vand.u32 2147483648, %v6571_v7  ;;  %v1392_v1 = vmul.f32 %v7127_v21, %v7127_v21  ;;  %vm810_vm9 = vweird.f32 %v6609_v49  ;;  %vm811_vm10 = vweird.f32 %v6687_v29 }
 0x159   : > { %1481 = vadd.xlane.f32.xlu0 %v1480_v6  ;;  %v914_v63 = vadd.f32 %v6646_v59, %v913_v34  ;;  %v814_v33 = vand.u32 2147483647, %v6609_v49  ;;  %v816_v2 = vand.u32 2147483648, %v6609_v49  ;;  %v1047_v61 = vsub.f32 1.0, %v1046_v44  ;;  %vm7209_vm15 = vmor %vm810_vm9, %vm811_vm10 }
 0x15a   : > { %v1316_v39 = vpop.permute.xlu1 %1315  ;;  %v933_v43 = vsel %vm7156_vm7, %v6719_v23, %v7113_v45  ;;  %vm7177_vm11 = vcmp.eq.f32.partialorder %v934_v27, 8.507059e+37  ;;  %v1043_v36 = vsel %vm7147_vm5, %v1042_v40, %v1038_v41  ;;  %v1166_v46 = vmul.f32 %v9535_v4, %v9534_v42  ;;  %v1302_v6 = vpop.permute.xlu0 %1301 }
 0x15b   : > { %v7191_v56 = vmul.f32 %v1316_v39, %v1148_v15  ;;  %v1432_v23 = vsel %vm9343_vm13, %v1391_v51, 0.0  ;;  %vm7194_vm14 = vcmp.eq.f32.partialorder %v919_v8, 8.507059e+37  ;;  %v809_v27 = vadd.f32 %v6687_v29, %v808_v52  ;;  %v9548_v51 = vld [vmem:[#allocation19_spill] sm:$0xff]  ;;  %v1288_v52 = vpop.permute.xlu2 %1287 }
 0x15c   : > { %v7200_v7 = vmul.f32 %v1318_v26, %v6972_v0  ;;  %v7202_v37 = vmul.f32 %v1302_v6, %v1043_v36  ;;  %v922_v34 = vor.u32 1.1754944e-38, %v921_v47  ;;  %v918_v26 = vsel %vm7185_vm12, %v6646_v59, %v914_v63 }
 0x15d   : > { %9536 = vst [vmem:[#allocation12_spill] sm:$0xff] %v7191_v56  ;;  %vm7224_vm3 = vcmp.eq.f32.partialorder %v814_v33, 8.507059e+37  ;;  %v817_v49 = vor.u32 1.1754944e-38, %v816_v2  ;;  %v1048_v39 = vmul.f32 %v6694_v38, %v1047_v61  ;;  %vm1050_vm4 = vweird.f32 %v9525_v22 }
 0x15e   : > { %9539 = vst [vmem:[#allocation14_spill] sm:$0xff] %v7200_v7  ;;  %v1408_v30 = vmul.f32 %v7202_v37, %v7202_v37  ;;  %v1167_v40 = vsub.f32 1.0, %v1166_v46  ;;  %v821_v8 = vmul.f32 %v9548_v51, %v9547_v16  ;;  %v813_v59 = vsel %vm7209_vm15, %v6687_v29, %v809_v27 }
 0x15f   : > { %9540 = vst [vmem:[#allocation21_spill] sm:$0xff] %v7202_v37  ;;  %v1415_v47 = vmul.f32 %v7191_v56, %v7191_v56  ;;  %vm1051_vm0 = vweird.f32 %v6694_v38  ;;  %v1068_v63 = vsel %vm7217_vm2, %v6783_v10, %v7116_v11  ;;  %v1069_v33 = vand.u32 2147483647, %v6697_v13 }
 0x160   : > { %1457 = vadd.xlane.f32.xlu1 %v1456_v48  ;;  %1433 = vadd.xlane.f32.xlu2 %v1432_v23  ;;  %v1435_v48 = vsel %vm9343_vm13, %v1392_v1, 0.0  ;;  %v1054_v1 = vand.u32 2147483647, %v9525_v22  ;;  %v1416_v2 = vmul.f32 %v7200_v7, %v7200_v7  ;;  %v1483_v61 = vsel %vm9343_vm13, %v1408_v30, 0.0  ;;  %vm7259_vm1 = vmor %vm1050_vm4, %vm1051_vm0 }
 0x161   : > { %1436 = vadd.xlane.f32.xlu0 %v1435_v48  ;;  %v938_v29 = vsel %vm7177_vm11, %v937_v24, %v933_v43  ;;  %v923_v36 = vsel %vm7194_vm14, %v922_v34, %v918_v26  ;;  %v1049_v50 = vadd.f32 %v6694_v38, %v1048_v39  ;;  %v1056_v46 = vand.u32 2147483648, %v9525_v22  ;;  %v9551_v43 = vld [vmem:[#allocation17_spill] sm:$0xff] }
 0x162   : > { %v1286_v41 = vpop.permute.xlu1 %1285  ;;  %v818_v10 = vsel %vm7224_vm3, %v817_v49, %v813_v59  ;;  %v1168_v35 = vmul.f32 %v9535_v4, %v1167_v40  ;;  %v822_v24 = vsub.f32 1.0, %v821_v8  ;;  %v941_v6 = vmul.f32 %v6831_v55, %v9551_v43  ;;  %v1272_v45 = vpop.permute.xlu0 %1271 }
 0x163   : > { %v7266_v23 = vmul.f32 %v1286_v41, %v923_v36  ;;  %v1504_v27 = vsel %vm9343_vm13, %v1415_v47, 0.0  ;;  %vm7269_vm5 = vcmp.eq.f32.partialorder %v1054_v1, 8.507059e+37  ;;  %vm1170_vm6 = vweird.f32 %v9534_v42 }
 0x164   : > { %v7274_v22 = vmul.f32 %v1288_v52, %v938_v29  ;;  %v7276_v48 = vmul.f32 %v1272_v45, %v818_v10  ;;  %v1507_v15 = vsel %vm9343_vm13, %v1416_v2, 0.0  ;;  %vm1171_vm7 = vweird.f32 %v9535_v4 }
 0x165   : > { %9552 = vst [vmem:[#allocation13_spill] sm:$0xff] %v7266_v23  ;;  %v1053_v0 = vsel %vm7259_vm1, %v6694_v38, %v1049_v50  ;;  %v1057_v26 = vor.u32 1.1754944e-38, %v1056_v46  ;;  %v1174_v44 = vand.u32 2147483647, %v9534_v42  ;;  %v1176_v49 = vand.u32 2147483648, %v9534_v42  ;;  %vm7297_vm9 = vmor %vm1170_vm6, %vm1171_vm7  ;;  %v1306_v42 = vpop.permute.xlu2 %1305 }
 0x166   : > { %9555 = vst [vmem:[#allocation19_spill] sm:$0xff] %v7274_v22  ;;  %v1169_v41 = vadd.f32 %v9535_v4, %v1168_v35  ;;  %v823_v30 = vmul.f32 %v9548_v51, %v822_v24  ;;  %v1393_v40 = vmul.f32 %v7276_v48, %v7276_v48  ;;  %v942_v8 = vsub.f32 1.0, %v941_v6 }
 0x167   : > { %9556 = vst [vmem:[#allocation17_spill] sm:$0xff] %v7276_v48  ;;  %vm7289_vm8 = vcmp.eq.f32.partialorder %v1069_v33, 8.507059e+37  ;;  %v1072_v38 = vor.u32 1.1754944e-38, %v1071_v28  ;;  %v1400_v47 = vmul.f32 %v7266_v23, %v7266_v23  ;;  %v1181_v1 = vmul.f32 %v6839_v5, %v6762_v17 }
 0x168   : > { %1484 = vadd.xlane.f32.xlu1 %v1483_v61  ;;  %1505 = vadd.xlane.f32.xlu2 %v1504_v27  ;;  %vm825_vm10 = vweird.f32 %v9547_v16  ;;  %vm826_vm11 = vweird.f32 %v9548_v51  ;;  %v1401_v13 = vmul.f32 %v7274_v22, %v7274_v22  ;;  %v1438_v28 = vsel %vm9343_vm13, %v1393_v40, 0.0 }
 0x169   : > { %1508 = vadd.xlane.f32.xlu0 %v1507_v15  ;;  %v1058_v33 = vsel %vm7269_vm5, %v1057_v26, %v1053_v0  ;;  %v1177_v2 = vor.u32 1.1754944e-38, %v1176_v49  ;;  %v829_v61 = vand.u32 2147483647, %v9547_v16  ;;  %v831_v29 = vand.u32 2147483648, %v9547_v16  ;;  %vm7328_vm14 = vmor %vm825_vm10, %vm826_vm11 }
 0x16a   : > { %v1304_v39 = vpop.permute.xlu1 %1303  ;;  %v1173_v36 = vsel %vm7297_vm9, %v9535_v4, %v1169_v41  ;;  %vm1175_vm12 = vcmp.eq.f32.partialorder %v1174_v44, 8.507059e+37  ;;  %v824_v50 = vadd.f32 %v9548_v51, %v823_v30  ;;  %v943_v46 = vmul.f32 %v6831_v55, %v942_v8  ;;  %v1320_v27 = vpop.permute.xlu0 %1319 }
 0x16b   : > { %v1073_v10 = vsel %vm7289_vm8, %v1072_v38, %v1068_v63  ;;  %v7321_v11 = vmul.f32 %v1304_v39, %v1058_v33  ;;  %v1459_v35 = vsel %vm9343_vm13, %v1400_v47, 0.0  ;;  %v1182_v4 = vsub.f32 1.0, %v1181_v1 }
 0x16c   : > { %v7332_v6 = vmul.f32 %v1306_v42, %v1073_v10  ;;  %v1462_v45 = vsel %vm9343_vm13, %v1401_v13, 0.0  ;;  %vm945_vm15 = vweird.f32 %v9551_v43  ;;  %vm946_vm2 = vweird.f32 %v6831_v55 }
 0x16d   : > { %9561 = vst [vmem:[#allocation39_spill] sm:$0xff] %v7321_v11  ;;  %v1178_v63 = vsel %vm1175_vm12, %v1177_v2, %v1173_v36  ;;  %vm830_vm3 = vcmp.eq.f32.partialorder %v829_v61, 8.507059e+37  ;;  %v832_v34 = vor.u32 1.1754944e-38, %v831_v29  ;;  %v951_v16 = vand.u32 2147483648, %v9551_v43  ;;  %vm7345_vm4 = vmor %vm945_vm15, %vm946_vm2 }
 0x16e   : > { %9564 = vst [vmem:[#allocation40_spill] sm:$0xff] %v7332_v6  ;;  %v7338_v15 = vmul.f32 %v1320_v27, %v1178_v63  ;;  %v828_v0 = vsel %vm7328_vm14, %v9548_v51, %v824_v50  ;;  %v944_v44 = vadd.f32 %v6831_v55, %v943_v46  ;;  %v949_v49 = vand.u32 2147483647, %v9551_v43 }
 0x16f   : > { %v1409_v41 = vmul.f32 %v7321_v11, %v7321_v11  ;;  %v1183_v30 = vmul.f32 %v6839_v5, %v1182_v4  ;;  %v1410_v40 = vmul.f32 %v7332_v6, %v7332_v6  ;;  %v833_v8 = vsel %vm830_vm3, %v832_v34, %v828_v0 }
 0x170   : > { %1439 = vadd.xlane.f32.xlu1 %v1438_v28  ;;  %1460 = vadd.xlane.f32.xlu2 %v1459_v35  ;;  %9565 = vst [vmem:[#allocation41_spill] sm:$0xff] %v7338_v15  ;;  %v1417_v51 = vmul.f32 %v7338_v15, %v7338_v15  ;;  %v952_v52 = vor.u32 1.1754944e-38, %v951_v16  ;;  %vm1185_vm0 = vweird.f32 %v6762_v17  ;;  %vm1186_vm1 = vweird.f32 %v6839_v5 }
 0x171   : > { %1463 = vadd.xlane.f32.xlu0 %v1462_v45  ;;  %v948_v43 = vsel %vm7345_vm4, %v6831_v55, %v944_v44  ;;  %vm950_vm5 = vcmp.eq.f32.partialorder %v949_v49, 8.507059e+37  ;;  %v1191_v38 = vand.u32 2147483648, %v6762_v17  ;;  %v1486_v1 = vsel %vm9343_vm13, %v1409_v41, 0.0  ;;  %vm1187_vm6 = vmor %vm1185_vm0, %vm1186_vm1 }
 0x172   : > { %v1274_v26 = vpop.permute.xlu1 %1273  ;;  %v1510_v59 = vsel %vm9343_vm13, %v1417_v51, 0.0  ;;  %v1184_v13 = vadd.f32 %v6839_v5, %v1183_v30  ;;  %v1189_v28 = vand.u32 2147483647, %v6762_v17  ;;  %v1489_v42 = vsel %vm9343_vm13, %v1410_v40, 0.0  ;;  %v1290_v55 = vpop.permute.xlu0 %1289 }
 0x173   : > { %v7363_v47 = vmul.f32 %v1274_v26, %v833_v8  ;;  %v953_v33 = vsel %vm950_vm5, %v952_v52, %v948_v43  ;;  %v1192_v61 = vor.u32 1.1754944e-38, %v1191_v38 }
 0x174   : > { %v7369_v2 = vmul.f32 %v1290_v55, %v953_v33  ;;  %v1188_v29 = vsel %vm1187_vm6, %v6839_v5, %v1184_v13  ;;  %vm1190_vm7 = vcmp.eq.f32.partialorder %v1189_v28, 8.507059e+37 }
 0x175   : > { %9568 = vst [vmem:[#allocation42_spill] sm:$0xff] %v7363_v47  ;;  %v1394_v36 = vmul.f32 %v7363_v47, %v7363_v47  ;;  %v1193_v46 = vsel %vm1190_vm7, %v1192_v61, %v1188_v29 }
 0x176   : > { %9569 = vst [vmem:[#allocation43_spill] sm:$0xff] %v7369_v2  ;;  %v1402_v17 = vmul.f32 %v7369_v2, %v7369_v2 }
 0x177   : > { %v1441_v24 = vsel %vm9343_vm13, %v1394_v36, 0.0 }
 0x178   : > { %1511 = vadd.xlane.f32.xlu1 %v1510_v59  ;;  %1487 = vadd.xlane.f32.xlu2 %v1486_v1  ;;  %v1465_v10 = vsel %vm9343_vm13, %v1402_v17, 0.0 }
 0x179   : > { %1490 = vadd.xlane.f32.xlu0 %v1489_v42 }
 0x17a   : > { %v1322_v50 = vpop.permute.xlu1 %1321 }
 0x17b   : > { %v7377_v35 = vmul.f32 %v1322_v50, %v1193_v46 }
 0x17d   : > { %9570 = vst [vmem:[#allocation44_spill] sm:$0xff] %v7377_v35  ;;  %v1418_v5 = vmul.f32 %v7377_v35, %v7377_v35 }
 0x17f   : > { %v1513_v4 = vsel %vm9343_vm13, %v1418_v5, 0.0 }
 0x180   : > { %1466 = vadd.xlane.f32.xlu1 %v1465_v10  ;;  %1442 = vadd.xlane.f32.xlu2 %v1441_v24 }
 0x188   : > { %1514 = vadd.xlane.f32.xlu2 %v1513_v4 }
 0x19d   : > { %v1422_v45 = vpop.xlane.xlu2 %1421  ;;  %v7383_v63 = vpop.xlane.xlu0 %1445 }
 0x19e   : > { %5578 = vrsqrt.f32 %v1422_v45  ;;  %vm1523_vm8 = vcmp.eq.f32.partialorder %v1422_v45, inf  ;;  %vm1525_vm9 = vcmp.eq.f32.partialorder %v1422_v45, 0.0  ;;  %v1526_v36 = vand.u32 2147483648, %v1422_v45 }
 0x19f   : > { %5580 = vrsqrt.f32 %v7383_v63  ;;  %vm1619_vm10 = vcmp.eq.f32.partialorder %v7383_v63, inf  ;;  %vm1621_vm11 = vcmp.eq.f32.partialorder %v7383_v63, 0.0 }
 0x1a4   : > { %v5579_v34 = vpop.eup %5578 }
 0x1a5   : > { %v7386_v27 = vpop.xlane.xlu1 %1493  ;;  %v1517_v0 = vmul.f32 %v5579_v34, %v1422_v45  ;;  %v5581_v44 = vpop.eup %5580 }
 0x1a6   : > { %5582 = vrsqrt.f32 %v7386_v27  ;;  %v1613_v30 = vmul.f32 %v5581_v44, %v7383_v63  ;;  %vm1811_vm12 = vcmp.eq.f32.partialorder %v7386_v27, inf  ;;  %vm1813_vm14 = vcmp.eq.f32.partialorder %v7386_v27, 0.0 }
 0x1a7   : > { %v1518_v26 = vmul.f32 %v5579_v34, %v1517_v0 }
 0x1a8   : > { %v1614_v52 = vmul.f32 %v5581_v44, %v1613_v30 }
 0x1a9   : > { %v7389_v16 = vpop.xlane.xlu2 %1469  ;;  %v1519_v41 = vmul.f32 0.5, %v1518_v26 }
 0x1aa   : > { %5584 = vrsqrt.f32 %v7389_v16  ;;  %v1615_v13 = vmul.f32 0.5, %v1614_v52  ;;  %vm1715_vm3 = vcmp.eq.f32.partialorder %v7389_v16, inf  ;;  %vm1717_vm1 = vcmp.eq.f32.partialorder %v7389_v16, 0.0 }
 0x1ab   : > { %v7392_v39 = vpop.xlane.xlu0 %1424  ;;  %v1520_v8 = vsub.f32 1.5, %v1519_v41 }
 0x1ac   : > { %v5583_v49 = vpop.eup %5582  ;;  %5586 = vrsqrt.f32 %v7392_v39  ;;  %v1616_v55 = vsub.f32 1.5, %v1615_v13  ;;  %vm1535_vm15 = vcmp.eq.f32.partialorder %v7392_v39, inf  ;;  %vm1537_vm2 = vcmp.eq.f32.partialorder %v7392_v39, 0.0 }
 0x1ad   : > { %v1805_v51 = vmul.f32 %v5583_v49, %v7386_v27  ;;  %v1521_v1 = vmul.f32 %v5579_v34, %v1520_v8 }
 0x1ae   : > { %v1617_v24 = vmul.f32 %v5581_v44, %v1616_v55 }
 0x1af   : > { %v1806_v38 = vmul.f32 %v5583_v49, %v1805_v51  ;;  %v1522_v33 = vmul.f32 %v1521_v1, %v1422_v45  ;;  %v1622_v51 = vand.u32 2147483648, %v7383_v63 }
 0x1b0   : > { %v7400_v43 = vpop.eup %5584  ;;  %v1618_v41 = vmul.f32 %v1617_v24, %v7383_v63 }
 0x1b1   : > { %v7402_v59 = vpop.xlane.xlu2 %1496  ;;  %v1709_v28 = vmul.f32 %v7400_v43, %v7389_v16  ;;  %v1807_v42 = vmul.f32 0.5, %v1806_v38  ;;  %v1524_v46 = vsel %vm1523_vm8, %v1422_v45, %v1522_v33  ;;  %v1814_v38 = vand.u32 2147483648, %v7386_v27 }
 0x1b2   : > { %v5587_v29 = vpop.eup %5586  ;;  %v1527_v4 = vsel %vm1525_vm9, %v1526_v36, %v1524_v46  ;;  %vm1823_vm5 = vcmp.eq.f32.partialorder %v7402_v59, inf  ;;  %vm1825_vm6 = vcmp.eq.f32.partialorder %v7402_v59, 0.0 }
 0x1b3   : > { %v7396_v40 = vpop.xlane.xlu1 %1448  ;;  %v1710_v61 = vmul.f32 %v7400_v43, %v1709_v28  ;;  %v1808_v50 = vsub.f32 1.5, %v1807_v42  ;;  %v7409_v10 = vpop.xlane.xlu0 %1472  ;;  %v1529_v5 = vmul.f32 %v5587_v29, %v7392_v39  ;;  %1900 = vxpose.xlu0.b32.start [1/2] (short) (narrow) %v1527_v4, 8 }
 0x1b4   : > { %5588 = vrsqrt.f32 %v7396_v40  ;;  %vm1631_vm4 = vcmp.eq.f32.partialorder %v7396_v40, inf  ;;  %vm1633_vm0 = vcmp.eq.f32.partialorder %v7396_v40, 0.0  ;;  %vm1727_vm7 = vcmp.eq.f32.partialorder %v7409_v10, inf }
 0x1b5   : > { %5590 = vrsqrt.f32 %v7402_v59  ;;  %v1809_v34 = vmul.f32 %v5583_v49, %v1808_v50  ;;  %v1530_v45 = vmul.f32 %v5587_v29, %v1529_v5  ;;  %v1711_v30 = vmul.f32 0.5, %v1710_v61 }
 0x1b6   : > { %5592 = vrsqrt.f32 %v7409_v10  ;;  %v1620_v49 = vsel %vm1619_vm10, %v7383_v63, %v1618_v41  ;;  %vm1729_vm8 = vcmp.eq.f32.partialorder %v7409_v10, 0.0 }
 0x1b7   : > { %v1810_v8 = vmul.f32 %v1809_v34, %v7386_v27  ;;  %v1531_v1 = vmul.f32 0.5, %v1530_v45  ;;  %v1623_v28 = vsel %vm1621_vm11, %v1622_v51, %v1620_v49  ;;  %v1712_v50 = vsub.f32 1.5, %v1711_v30 }
 0x1b8   : > { %2028 = vxpose.xlu2.b32.start [1/2] (short) (narrow) %v1623_v28, 8 }
 0x1b9   : > { %v1812_v42 = vsel %vm1811_vm12, %v7386_v27, %v1810_v8  ;;  %v1532_v61 = vsub.f32 1.5, %v1531_v1  ;;  %v1634_v1 = vand.u32 2147483648, %v7396_v40 }
 0x1ba   : > { %v5589_v17 = vpop.eup %5588  ;;  %v1815_v55 = vsel %vm1813_vm14, %v1814_v38, %v1812_v42 }
 0x1bb   : > { %v7414_v0 = vpop.xlane.xlu1 %1427  ;;  %v1625_v26 = vmul.f32 %v5589_v17, %v7396_v40  ;;  %v5591_v44 = vpop.eup %5590  ;;  %2284 = vxpose.xlu1.b32.start [1/2] (short) (narrow) %v1815_v55, 8  ;;  %v1533_v34 = vmul.f32 %v5587_v29, %v1532_v61  ;;  %v1713_v29 = vmul.f32 %v7400_v43, %v1712_v50 }
 0x1bc   : > { %5594 = vrsqrt.f32 %v7414_v0  ;;  %v1817_v13 = vmul.f32 %v5591_v44, %v7402_v59  ;;  %v7431_v46 = vpop.eup %5592  ;;  %v7433_v24 = vpop.xlane.xlu2 %1451  ;;  %vm1547_vm9 = vcmp.eq.f32.partialorder %v7414_v0, inf  ;;  %vm1549_vm11 = vcmp.eq.f32.partialorder %v7414_v0, 0.0 }
 0x1bd   : > { %v1626_v52 = vmul.f32 %v5589_v17, %v1625_v26  ;;  %5596 = vrsqrt.f32 %v7433_v24  ;;  %v7436_v63 = vpop.xlane.xlu0 %1499  ;;  %v1538_v26 = vand.u32 2147483648, %v7392_v39  ;;  %v1534_v30 = vmul.f32 %v1533_v34, %v7392_v39 }
 0x1be   : > { %v1818_v36 = vmul.f32 %v5591_v44, %v1817_v13  ;;  %5598 = vrsqrt.f32 %v7436_v63  ;;  %v1714_v61 = vmul.f32 %v1713_v29, %v7389_v16  ;;  %vm1835_vm10 = vcmp.eq.f32.partialorder %v7436_v63, inf }
 0x1bf   : > { %v1627_v33 = vmul.f32 0.5, %v1626_v52  ;;  %v1721_v52 = vmul.f32 %v7431_v46, %v7409_v10  ;;  %vm1837_vm12 = vcmp.eq.f32.partialorder %v7436_v63, 0.0  ;;  %vm1643_vm14 = vcmp.eq.f32.partialorder %v7433_v24, inf }
 0x1c0   : > { %v1819_v27 = vmul.f32 0.5, %v1818_v36 }
 0x1c1   : > { %v1628_v5 = vsub.f32 1.5, %v1627_v33  ;;  %v1722_v28 = vmul.f32 %v7431_v46, %v1721_v52 }
 0x1c2   : > { %v5595_v4 = vpop.eup %5594  ;;  %v1820_v51 = vsub.f32 1.5, %v1819_v27 }
 0x1c3   : > { %v7442_v41 = vpop.xlane.xlu1 %1475  ;;  %v1629_v45 = vmul.f32 %v5589_v17, %v1628_v5  ;;  %v1541_v49 = vmul.f32 %v5595_v4, %v7414_v0  ;;  %v1536_v17 = vsel %vm1535_vm15, %v7392_v39, %v1534_v30  ;;  %v5597_v33 = vpop.eup %5596  ;;  %v1826_v39 = vand.u32 2147483648, %v7402_v59 }
 0x1c4   : > { %v1821_v38 = vmul.f32 %v5591_v44, %v1820_v51  ;;  %5600 = vrsqrt.f32 %v7442_v41  ;;  %v1539_v43 = vsel %vm1537_vm2, %v1538_v26, %v1536_v17  ;;  %v5599_v36 = vpop.eup %5598  ;;  %v7468_v50 = vpop.xlane.xlu2 %1430  ;;  %v1723_v5 = vmul.f32 0.5, %v1722_v28 }
 0x1c5   : > { %v1630_v8 = vmul.f32 %v1629_v45, %v7396_v40  ;;  %v1542_v42 = vmul.f32 %v5595_v4, %v1541_v49  ;;  %1901 = vxpose.xlu0.b32.end [2/2] (short) (narrow) %v1539_v43, 8  ;;  %v1637_v27 = vmul.f32 %v5597_v33, %v7433_v24  ;;  %5602 = vrsqrt.f32 %v7468_v50 }
 0x1c6   : > { %v1822_v55 = vmul.f32 %v1821_v38, %v7402_v59  ;;  %v1829_v45 = vmul.f32 %v5599_v36, %v7436_v63  ;;  %v1724_v29 = vsub.f32 1.5, %v1723_v5  ;;  %v1716_v49 = vsel %vm1715_vm3, %v7389_v16, %v1714_v61 }
 0x1c7   : > { %v1632_v13 = vsel %vm1631_vm4, %v7396_v40, %v1630_v8  ;;  %v1543_v34 = vmul.f32 0.5, %v1542_v42  ;;  %v7475_v40 = vpop.xlane.xlu0 %1454  ;;  %v1638_v17 = vmul.f32 %v5597_v33, %v1637_v27  ;;  %v1718_v38 = vand.u32 2147483648, %v7389_v16 }
 0x1c8   : > { %v1635_v44 = vsel %vm1633_vm0, %v1634_v1, %v1632_v13  ;;  %v1824_v26 = vsel %vm1823_vm5, %v7402_v59, %v1822_v55  ;;  %5604 = vrsqrt.f32 %v7475_v40  ;;  %v1830_v59 = vmul.f32 %v5599_v36, %v1829_v45 }
 0x1c9   : > { %2029 = vxpose.xlu2.b32.end [2/2] (short) (narrow) %v1635_v44, 8  ;;  %v1827_v30 = vsel %vm1825_vm6, %v1826_v39, %v1824_v26  ;;  %v1544_v8 = vsub.f32 1.5, %v1543_v34  ;;  %v1725_v1 = vmul.f32 %v7431_v46, %v1724_v29  ;;  %v1730_v28 = vand.u32 2147483648, %v7409_v10 }
 0x1ca   : > { %v7481_v52 = vpop.eup %5600  ;;  %2285 = vxpose.xlu1.b32.end [2/2] (short) (narrow) %v1827_v30, 8  ;;  %v1831_v13 = vmul.f32 0.5, %v1830_v59  ;;  %v1639_v42 = vmul.f32 0.5, %v1638_v17  ;;  %v1719_v55 = vsel %vm1717_vm1, %v1718_v38, %v1716_v49  ;;  %vm1645_vm15 = vcmp.eq.f32.partialorder %v7433_v24, 0.0 }
 0x1cb   : > { %v7479_v51 = vpop.xlane.xlu1 %1502  ;;  %v1545_v43 = vmul.f32 %v5595_v4, %v1544_v8  ;;  %v1726_v44 = vmul.f32 %v1725_v1, %v7409_v10  ;;  %v5603_v39 = vpop.eup %5602  ;;  %v1550_v4 = vand.u32 2147483648, %v7414_v0  ;;  %v1733_v34 = vmul.f32 %v7481_v52, %v7442_v41 }
 0x1cc   : > { %5606 = vrsqrt.f32 %v7479_v51  ;;  %v1832_v46 = vsub.f32 1.5, %v1831_v13  ;;  %v1640_v5 = vsub.f32 1.5, %v1639_v42  ;;  %v7500_v26 = vpop.xlane.xlu2 %1478  ;;  %v1553_v45 = vmul.f32 %v5603_v39, %v7468_v50 }
 0x1cd   : > { %v1546_v61 = vmul.f32 %v1545_v43, %v7414_v0  ;;  %2156 = vxpose.xlu0.b32.start [1/2] (short) (narrow) %v1719_v55, 8  ;;  %5608 = vrsqrt.f32 %v7500_v26  ;;  %v1728_v59 = vsel %vm1727_vm7, %v7409_v10, %v1726_v44  ;;  %v1734_v13 = vmul.f32 %v7481_v52, %v1733_v34 }
 0x1ce   : > { %v5605_v27 = vpop.eup %5604  ;;  %v1833_v8 = vmul.f32 %v5599_v36, %v1832_v46  ;;  %v1641_v38 = vmul.f32 %v5597_v33, %v1640_v5  ;;  %v1554_v1 = vmul.f32 %v5603_v39, %v1553_v45  ;;  %v1838_v42 = vand.u32 2147483648, %v7436_v63 }
 0x1cf   : > { %v1548_v16 = vsel %vm1547_vm9, %v7414_v0, %v1546_v61  ;;  %v7507_v29 = vpop.xlane.xlu0 %1481  ;;  %v1649_v36 = vmul.f32 %v5605_v27, %v7475_v40  ;;  %v1646_v61 = vand.u32 2147483648, %v7433_v24  ;;  %v1731_v34 = vsel %vm1729_vm8, %v1730_v28, %v1728_v59 }
 0x1d0   : > { %v1551_v49 = vsel %vm1549_vm11, %v1550_v4, %v1548_v16  ;;  %v1834_v43 = vmul.f32 %v1833_v8, %v7436_v63  ;;  %v1555_v55 = vmul.f32 0.5, %v1554_v1  ;;  %v1735_v4 = vmul.f32 0.5, %v1734_v13 }
 0x1d1   : > { %v1650_v46 = vmul.f32 %v5605_v27, %v1649_v36  ;;  %vm1559_vm2 = vcmp.eq.f32.partialorder %v7468_v50, inf  ;;  %vm1561_vm3 = vcmp.eq.f32.partialorder %v7468_v50, 0.0  ;;  %vm1847_vm4 = vcmp.eq.f32.partialorder %v7479_v51, inf }
 0x1d2   : > { %v5607_v30 = vpop.eup %5606  ;;  %1932 = vxpose.xlu1.b32.start [1/2] (short) (narrow) %v1551_v49, 8  ;;  %v1836_v33 = vsel %vm1835_vm10, %v7436_v63, %v1834_v43  ;;  %v1556_v16 = vsub.f32 1.5, %v1555_v55  ;;  %v1642_v49 = vmul.f32 %v1641_v38, %v7433_v24  ;;  %v1562_v38 = vand.u32 2147483648, %v7468_v50 }
 0x1d3   : > { %v7513_v17 = vpop.xlane.xlu1 %1457  ;;  %v1841_v0 = vmul.f32 %v5607_v30, %v7479_v51  ;;  %v1839_v5 = vsel %vm1837_vm12, %v1838_v42, %v1836_v33  ;;  %v5609_v8 = vpop.eup %5608  ;;  %v1651_v1 = vmul.f32 0.5, %v1650_v46  ;;  %vm1849_vm0 = vcmp.eq.f32.partialorder %v7479_v51, 0.0 }
 0x1d4   : > { %5610 = vrsqrt.f32 %v7513_v17  ;;  %2316 = vxpose.xlu2.b32.start [1/2] (short) (narrow) %v1839_v5, 8  ;;  %v7533_v43 = vpop.xlane.xlu2 %1433  ;;  %v1557_v36 = vmul.f32 %v5603_v39, %v1556_v16  ;;  %v1745_v10 = vmul.f32 %v5609_v8, %v7500_v26  ;;  %v1644_v33 = vsel %vm1643_vm14, %v7433_v24, %v1642_v49 }
 0x1d5   : > { %v1842_v44 = vmul.f32 %v5607_v30, %v1841_v0  ;;  %2157 = vxpose.xlu0.b32.end [2/2] (short) (narrow) %v1731_v34, 8  ;;  %v1736_v0 = vsub.f32 1.5, %v1735_v4  ;;  %5612 = vrsqrt.f32 %v7533_v43  ;;  %v1652_v13 = vsub.f32 1.5, %v1651_v1 }
 0x1d6   : > { %v1558_v39 = vmul.f32 %v1557_v36, %v7468_v50  ;;  %v1647_v1 = vsel %vm1645_vm15, %v1646_v61, %v1644_v33  ;;  %vm1655_vm1 = vcmp.eq.f32.partialorder %v7475_v40, inf  ;;  %vm1739_vm5 = vcmp.eq.f32.partialorder %v7442_v41, inf }
 0x1d7   : > { %v1843_v45 = vmul.f32 0.5, %v1842_v44  ;;  %v7540_v59 = vpop.xlane.xlu0 %1436  ;;  %v1737_v42 = vmul.f32 %v7481_v52, %v1736_v0  ;;  %v1746_v44 = vmul.f32 %v5609_v8, %v1745_v10  ;;  %v1653_v46 = vmul.f32 %v5605_v27, %v1652_v13 }
 0x1d8   : > { %5614 = vrsqrt.f32 %v7540_v59  ;;  %v1560_v4 = vsel %vm1559_vm2, %v7468_v50, %v1558_v39  ;;  %vm1657_vm6 = vcmp.eq.f32.partialorder %v7475_v40, 0.0  ;;  %vm1741_vm7 = vcmp.eq.f32.partialorder %v7442_v41, 0.0 }
 0x1d9   : > { %v1844_v63 = vsub.f32 1.5, %v1843_v45  ;;  %5616 = vrsqrt.f32 %v7507_v29  ;;  %v1747_v5 = vmul.f32 0.5, %v1746_v44  ;;  %v1563_v34 = vsel %vm1561_vm3, %v1562_v38, %v1560_v4 }
 0x1da   : > { %v7537_v28 = vpop.eup %5610  ;;  %v1850_v45 = vand.u32 2147483648, %v7479_v51  ;;  %v1654_v49 = vmul.f32 %v1653_v46, %v7475_v40  ;;  %v1738_v27 = vmul.f32 %v1737_v42, %v7442_v41  ;;  %1933 = vxpose.xlu1.b32.end [2/2] (short) (narrow) %v1563_v34, 8  ;;  %v1658_v46 = vand.u32 2147483648, %v7475_v40 }
 0x1db   : > { %v1845_v55 = vmul.f32 %v5607_v30, %v1844_v63  ;;  %v1661_v30 = vmul.f32 %v7537_v28, %v7513_v17  ;;  %v7559_v16 = vpop.xlane.xlu1 %1484  ;;  %v1748_v36 = vsub.f32 1.5, %v1747_v5  ;;  %v5613_v63 = vpop.eup %5612  ;;  %v1742_v4 = vand.u32 2147483648, %v7442_v41 }
 0x1dc   : > { %v7569_v13 = vpop.xlane.xlu2 %1505  ;;  %v1565_v24 = vmul.f32 %v5613_v63, %v7533_v43  ;;  %v1656_v42 = vsel %vm1655_vm1, %v7475_v40, %v1654_v49  ;;  %v1740_v39 = vsel %vm1739_vm5, %v7442_v41, %v1738_v27  ;;  %vm1751_vm8 = vcmp.eq.f32.partialorder %v7500_v26, inf }
 0x1dd   : > { %v1846_v52 = vmul.f32 %v1845_v55, %v7479_v51  ;;  %2060 = vxpose.xlu0.b32.start [1/2] (short) (narrow) %v1647_v1, 8  ;;  %v1662_v10 = vmul.f32 %v7537_v28, %v1661_v30  ;;  %5618 = vrsqrt.f32 %v7569_v13  ;;  %v1749_v55 = vmul.f32 %v5609_v8, %v1748_v36 }
 0x1de   : > { %v5615_v38 = vpop.eup %5614  ;;  %v1566_v44 = vmul.f32 %v5613_v63, %v1565_v24  ;;  %v1659_v30 = vsel %vm1657_vm6, %v1658_v46, %v1656_v42  ;;  %v1743_v34 = vsel %vm1741_vm7, %v1742_v4, %v1740_v39  ;;  %vm1753_vm9 = vcmp.eq.f32.partialorder %v7500_v26, 0.0 }
 0x1df   : > { %v1848_v0 = vsel %vm1847_vm4, %v7479_v51, %v1846_v52  ;;  %v7574_v61 = vpop.eup %5616  ;;  %v7577_v51 = vpop.xlane.xlu0 %1508  ;;  %v1663_v33 = vmul.f32 0.5, %v1662_v10  ;;  %v1577_v52 = vmul.f32 %v5615_v38, %v7540_v59  ;;  %v1750_v27 = vmul.f32 %v1749_v55, %v7500_v26 }
 0x1e0   : > { %v1851_v50 = vsel %vm1849_vm0, %v1850_v45, %v1848_v0  ;;  %5620 = vrsqrt.f32 %v7577_v51  ;;  %v1567_v5 = vmul.f32 0.5, %v1566_v44  ;;  %v1757_v49 = vmul.f32 %v7574_v61, %v7507_v29 }
 0x1e1   : > { %2317 = vxpose.xlu2.b32.end [2/2] (short) (narrow) %v1851_v50, 8  ;;  %v1578_v8 = vmul.f32 %v5615_v38, %v1577_v52  ;;  %v1664_v40 = vsub.f32 1.5, %v1663_v33  ;;  %v1754_v41 = vand.u32 2147483648, %v7500_v26  ;;  %vm1571_vm10 = vcmp.eq.f32.partialorder %v7533_v43, inf }
 0x1e2   : > { %2188 = vxpose.xlu1.b32.start [1/2] (short) (narrow) %v1743_v34, 8  ;;  %v1568_v1 = vsub.f32 1.5, %v1567_v5  ;;  %v1758_v50 = vmul.f32 %v7574_v61, %v1757_v49  ;;  %vm1573_vm11 = vcmp.eq.f32.partialorder %v7533_v43, 0.0  ;;  %vm1667_vm12 = vcmp.eq.f32.partialorder %v7513_v17, inf }
 0x1e3   : > { %v7588_v45 = vpop.xlane.xlu1 %1439  ;;  %v5619_v0 = vpop.eup %5618  ;;  %v1579_v36 = vmul.f32 0.5, %v1578_v8  ;;  %v1752_v33 = vsel %vm1751_vm8, %v7500_v26, %v1750_v27  ;;  %v1665_v4 = vmul.f32 %v7537_v28, %v1664_v40  ;;  %v1574_v52 = vand.u32 2147483648, %v7533_v43 }
 0x1e4   : > { %5622 = vrsqrt.f32 %v7588_v45  ;;  %v7598_v24 = vpop.xlane.xlu2 %1460  ;;  %v1569_v42 = vmul.f32 %v5613_v63, %v1568_v1  ;;  %v1853_v39 = vmul.f32 %v5619_v0, %v7569_v13  ;;  %v1759_v34 = vmul.f32 0.5, %v1758_v50 }
 0x1e5   : > { %2061 = vxpose.xlu0.b32.end [2/2] (short) (narrow) %v1659_v30, 8  ;;  %5624 = vrsqrt.f32 %v7559_v16  ;;  %v1580_v55 = vsub.f32 1.5, %v1579_v36  ;;  %vm1669_vm14 = vcmp.eq.f32.partialorder %v7513_v17, 0.0  ;;  %v1670_v27 = vand.u32 2147483648, %v7513_v17 }
 0x1e6   : > { %v5621_v10 = vpop.eup %5620  ;;  %5626 = vrsqrt.f32 %v7598_v24  ;;  %v1570_v46 = vmul.f32 %v1569_v42, %v7533_v43  ;;  %v1854_v63 = vmul.f32 %v5619_v0, %v1853_v39  ;;  %vm1583_vm15 = vcmp.eq.f32.partialorder %v7540_v59, inf }
 0x1e7   : > { %v1865_v44 = vmul.f32 %v5621_v10, %v7577_v51  ;;  %v1581_v5 = vmul.f32 %v5615_v38, %v1580_v55  ;;  %v7614_v49 = vpop.xlane.xlu0 %1463  ;;  %v1755_v28 = vsel %vm1753_vm9, %v1754_v41, %v1752_v33  ;;  %vm1859_vm2 = vcmp.eq.f32.partialorder %v7569_v13, inf }
 0x1e8   : > { %v1572_v1 = vsel %vm1571_vm10, %v7533_v43, %v1570_v46  ;;  %v1855_v36 = vmul.f32 0.5, %v1854_v63  ;;  %vm1861_vm3 = vcmp.eq.f32.partialorder %v7569_v13, 0.0  ;;  %v1666_v39 = vmul.f32 %v1665_v4, %v7513_v17 }
 0x1e9   : > { %v1866_v30 = vmul.f32 %v5621_v10, %v1865_v44  ;;  %v1575_v38 = vsel %vm1573_vm11, %v1574_v52, %v1572_v1  ;;  %5628 = vrsqrt.f32 %v7614_v49  ;;  %v1582_v41 = vmul.f32 %v1581_v5, %v7540_v59 }
 0x1ea   : > { %v7612_v8 = vpop.eup %5622  ;;  %2189 = vxpose.xlu1.b32.end [2/2] (short) (narrow) %v1755_v28, 8  ;;  %1964 = vxpose.xlu2.b32.start [1/2] (short) (narrow) %v1575_v38, 8  ;;  %v1856_v42 = vsub.f32 1.5, %v1855_v36  ;;  %v1760_v33 = vsub.f32 1.5, %v1759_v34  ;;  %v1862_v52 = vand.u32 2147483648, %v7569_v13  ;;  %vm1585_vm4 = vcmp.eq.f32.partialorder %v7540_v59, 0.0 }
 0x1eb   : > { %v1867_v40 = vmul.f32 0.5, %v1866_v30  ;;  %v7627_v50 = vpop.eup %5624  ;;  %v1589_v55 = vmul.f32 %v7612_v8, %v7588_v45  ;;  %v7634_v43 = vpop.xlane.xlu1 %1511  ;;  %v1586_v30 = vand.u32 2147483648, %v7540_v59  ;;  %vm1871_vm0 = vcmp.eq.f32.partialorder %v7577_v51, inf }
 0x1ec   : > { %v5627_v26 = vpop.eup %5626  ;;  %v7637_v46 = vpop.xlane.xlu2 %1487  ;;  %5630 = vrsqrt.f32 %v7634_v43  ;;  %v1857_v63 = vmul.f32 %v5619_v0, %v1856_v42  ;;  %v1668_v34 = vsel %vm1667_vm12, %v7513_v17, %v1666_v39  ;;  %v1584_v28 = vsel %vm1583_vm15, %v7540_v59, %v1582_v41 }
 0x1ed   : > { %v1868_v44 = vsub.f32 1.5, %v1867_v40  ;;  %v1673_v4 = vmul.f32 %v5627_v26, %v7598_v24  ;;  %v1590_v1 = vmul.f32 %v7612_v8, %v1589_v55  ;;  %v1761_v38 = vmul.f32 %v7574_v61, %v1760_v33 }
 0x1ee   : > { %v1858_v5 = vmul.f32 %v1857_v63, %v7569_v13  ;;  %v1769_v42 = vmul.f32 %v7627_v50, %v7559_v16  ;;  %vm1873_vm1 = vcmp.eq.f32.partialorder %v7577_v51, 0.0  ;;  %v1874_v39 = vand.u32 2147483648, %v7577_v51 }
 0x1ef   : > { %v1869_v36 = vmul.f32 %v5621_v10, %v1868_v44  ;;  %v1674_v0 = vmul.f32 %v5627_v26, %v1673_v4  ;;  %v1591_v40 = vmul.f32 0.5, %v1590_v1  ;;  %v7661_v44 = vpop.eup %5628  ;;  %5632 = vrsqrt.f32 %v7637_v46 }
 0x1f0   : > { %v1860_v55 = vsel %vm1859_vm2, %v7569_v13, %v1858_v5  ;;  %v1671_v41 = vsel %vm1669_vm14, %v1670_v27, %v1668_v34  ;;  %v1770_v33 = vmul.f32 %v7627_v50, %v1769_v42  ;;  %v1587_v4 = vsel %vm1585_vm4, %v1586_v30, %v1584_v28  ;;  %v7683_v34 = vpop.xlane.xlu0 %1490 }
 0x1f1   : > { %v1675_v10 = vmul.f32 0.5, %v1674_v0  ;;  %v1863_v61 = vsel %vm1861_vm3, %v1862_v52, %v1860_v55  ;;  %v1870_v1 = vmul.f32 %v1869_v36, %v7577_v51  ;;  %v1592_v0 = vsub.f32 1.5, %v1591_v40 }
 0x1f2   : > { %v5631_v63 = vpop.eup %5630  ;;  %2348 = vxpose.xlu0.b32.start [1/2] (short) (narrow) %v1863_v61, 8  ;;  %2092 = vxpose.xlu1.b32.start [1/2] (short) (narrow) %v1671_v41, 8  ;;  %v1762_v13 = vmul.f32 %v1761_v38, %v7507_v29  ;;  %vm1763_vm5 = vcmp.eq.f32.partialorder %v7507_v29, inf  ;;  %v1771_v17 = vmul.f32 0.5, %v1770_v33  ;;  %vm1765_vm6 = vcmp.eq.f32.partialorder %v7507_v29, 0.0 }
 0x1f3   : > { %v1676_v5 = vsub.f32 1.5, %v1675_v10  ;;  %1965 = vxpose.xlu2.b32.end [2/2] (short) (narrow) %v1587_v4, 8  ;;  %v7672_v31 = vpop.xlane.xlu1 %1466  ;;  %v1877_v27 = vmul.f32 %v5631_v63, %v7634_v43  ;;  %v1685_v30 = vmul.f32 %v7661_v44, %v7614_v49  ;;  %vm1679_vm7 = vcmp.eq.f32.partialorder %v7598_v24, inf }
 0x1f4   : > { %v7677_v52 = vpop.xlane.xlu2 %1442  ;;  %5634 = vrsqrt.f32 %v7672_v31  ;;  %v1772_v36 = vsub.f32 1.5, %v1771_v17  ;;  %v1872_v38 = vsel %vm1871_vm0, %v7577_v51, %v1870_v1  ;;  %v1682_v42 = vand.u32 2147483648, %v7598_v24 }
 0x1f5   : > { %v1677_v59 = vmul.f32 %v5627_v26, %v1676_v5  ;;  %5636 = vrsqrt.f32 %v7677_v52  ;;  %v1878_v28 = vmul.f32 %v5631_v63, %v1877_v27  ;;  %v1593_v26 = vmul.f32 %v7612_v8, %v1592_v0  ;;  %v7693_v55 = vpop.eup %5632 }
 0x1f6   : > { %v1764_v10 = vsel %vm1763_vm5, %v7507_v29, %v1762_v13  ;;  %v1773_v61 = vmul.f32 %v7627_v50, %v1772_v36  ;;  %v1686_v33 = vmul.f32 %v7661_v44, %v1685_v30  ;;  %5638 = vrsqrt.f32 %v7683_v34 }
 0x1f7   : > { %v1678_v40 = vmul.f32 %v1677_v59, %v7598_v24  ;;  %v1879_v41 = vmul.f32 0.5, %v1878_v28  ;;  %v1766_v4 = vand.u32 2147483648, %v7507_v29  ;;  %vm1681_vm8 = vcmp.eq.f32.partialorder %v7598_v24, 0.0 }
 0x1f8   : > { %v1875_v8 = vsel %vm1873_vm1, %v1874_v39, %v1872_v38  ;;  %v1687_v17 = vmul.f32 0.5, %v1686_v33  ;;  %v1594_v27 = vmul.f32 %v1593_v26, %v7588_v45  ;;  %vm1595_vm9 = vcmp.eq.f32.partialorder %v7588_v45, inf }
 0x1f9   : > { %v1680_v1 = vsel %vm1679_vm7, %v7598_v24, %v1678_v40  ;;  %v1880_v0 = vsub.f32 1.5, %v1879_v41  ;;  %v1767_v50 = vsel %vm1765_vm6, %v1766_v4, %v1764_v10  ;;  %v1781_v59 = vmul.f32 %v7693_v55, %v7637_v46 }
 0x1fa   : > { %v1683_v5 = vsel %vm1681_vm8, %v1682_v42, %v1680_v1  ;;  %v5635_v13 = vpop.eup %5634  ;;  %2349 = vxpose.xlu0.b32.end [2/2] (short) (narrow) %v1875_v8, 8  ;;  %v1774_v51 = vmul.f32 %v1773_v61, %v7559_v16  ;;  %v1688_v30 = vsub.f32 1.5, %v1687_v17  ;;  %v1598_v29 = vand.u32 2147483648, %v7588_v45 }
 0x1fb   : > { %2093 = vxpose.xlu1.b32.end [2/2] (short) (narrow) %v1683_v5, 8  ;;  %v5637_v24 = vpop.eup %5636  ;;  %2220 = vxpose.xlu2.b32.start [1/2] (short) (narrow) %v1767_v50, 8  ;;  %v1881_v39 = vmul.f32 %v5631_v63, %v1880_v0  ;;  %v1697_v36 = vmul.f32 %v5635_v13, %v7672_v31  ;;  %vm1775_vm10 = vcmp.eq.f32.partialorder %v7559_v16, inf  ;;  %v1782_v40 = vmul.f32 %v7693_v55, %v1781_v59 }
 0x1fc   : > { %v7714_v28 = vpop.xlane.xlu2 %1514  ;;  %v1601_v38 = vmul.f32 %v5637_v24, %v7677_v52  ;;  %vm1883_vm11 = vcmp.eq.f32.partialorder %v7634_v43, inf  ;;  %vm1885_vm12 = vcmp.eq.f32.partialorder %v7634_v43, 0.0  ;;  %v5639_v63 = vpop.eup %5638  ;;  %v1596_v26 = vsel %vm1595_vm9, %v7588_v45, %v1594_v27 }
 0x1fd   : > { %5640 = vrsqrt.f32 %v7714_v28  ;;  %v1882_v42 = vmul.f32 %v1881_v39, %v7634_v43  ;;  %v1886_v10 = vand.u32 2147483648, %v7634_v43  ;;  %v1783_v41 = vmul.f32 0.5, %v1782_v40 }
 0x1fe   : > { %v1602_v61 = vmul.f32 %v5637_v24, %v1601_v38  ;;  %v1776_v33 = vsel %vm1775_vm10, %v7559_v16, %v1774_v51  ;;  %v1689_v1 = vmul.f32 %v7661_v44, %v1688_v30  ;;  %v1698_v8 = vmul.f32 %v5635_v13, %v1697_v36 }
 0x1ff   : > { %v1884_v4 = vsel %vm1883_vm11, %v7634_v43, %v1882_v42  ;;  %vm1597_vm14 = vcmp.eq.f32.partialorder %v7588_v45, 0.0  ;;  %v1778_v5 = vand.u32 2147483648, %v7559_v16  ;;  %vm1777_vm15 = vcmp.eq.f32.partialorder %v7559_v16, 0.0 }
 0x200   : > { %v1887_v0 = vsel %vm1885_vm12, %v1886_v10, %v1884_v4  ;;  %v1603_v17 = vmul.f32 0.5, %v1602_v61  ;;  %v1599_v50 = vsel %vm1597_vm14, %v1598_v29, %v1596_v26  ;;  %v1699_v27 = vmul.f32 0.5, %v1698_v8 }
 0x201   : > { %v1793_v59 = vmul.f32 %v5639_v63, %v7683_v34  ;;  %v1779_v39 = vsel %vm1777_vm15, %v1778_v5, %v1776_v33  ;;  %v1784_v43 = vsub.f32 1.5, %v1783_v41  ;;  %v1690_v44 = vmul.f32 %v1689_v1, %v7614_v49 }
 0x202   : > { %1996 = vxpose.xlu0.b32.start [1/2] (short) (narrow) %v1599_v50, 8  ;;  %v1604_v51 = vsub.f32 1.5, %v1603_v17  ;;  %v1700_v45 = vsub.f32 1.5, %v1699_v27  ;;  %vm1691_vm2 = vcmp.eq.f32.partialorder %v7614_v49, inf  ;;  %vm1607_vm3 = vcmp.eq.f32.partialorder %v7677_v52, inf }
 0x203   : > { %2380 = vxpose.xlu1.b32.start [1/2] (short) (narrow) %v1887_v0, 8  ;;  %v5641_v38 = vpop.eup %5640  ;;  %2221 = vxpose.xlu2.b32.end [2/2] (short) (narrow) %v1779_v39, 8  ;;  %v1794_v30 = vmul.f32 %v5639_v63, %v1793_v59  ;;  %v1785_v29 = vmul.f32 %v7693_v55, %v1784_v43  ;;  %v1610_v10 = vand.u32 2147483648, %v7677_v52  ;;  %v1692_v61 = vsel %vm1691_vm2, %v7614_v49, %v1690_v44 }
 0x204   : > { %v1605_v36 = vmul.f32 %v5637_v24, %v1604_v51  ;;  %v1889_v40 = vmul.f32 %v5641_v38, %v7714_v28  ;;  %v1701_v41 = vmul.f32 %v5635_v13, %v1700_v45  ;;  %vm1609_vm4 = vcmp.eq.f32.partialorder %v7677_v52, 0.0 }
 0x205   : > { %v1795_v26 = vmul.f32 0.5, %v1794_v30  ;;  %v1694_v24 = vand.u32 2147483648, %v7614_v49  ;;  %vm1693_vm0 = vcmp.eq.f32.partialorder %v7614_v49, 0.0  ;;  %v1786_v8 = vmul.f32 %v1785_v29, %v7637_v46 }
 0x206   : > { %v1606_v16 = vmul.f32 %v1605_v36, %v7677_v52  ;;  %v1890_v42 = vmul.f32 %v5641_v38, %v1889_v40  ;;  %v1702_v17 = vmul.f32 %v1701_v41, %v7672_v31  ;;  %vm1787_vm1 = vcmp.eq.f32.partialorder %v7637_v46, inf  ;;  %v9571_v36 = vld [vmem:[#allocation15_spill] sm:$0xff] }
 0x207   : > { %v1695_v55 = vsel %vm1693_vm0, %v1694_v24, %v1692_v61  ;;  %v1796_v0 = vsub.f32 1.5, %v1795_v26  ;;  %vm1703_vm5 = vcmp.eq.f32.partialorder %v7672_v31, inf  ;;  %v1790_v49 = vand.u32 2147483648, %v7637_v46 }
 0x208   : > { %v1608_v33 = vsel %vm1607_vm3, %v7677_v52, %v1606_v16  ;;  %v1891_v4 = vmul.f32 0.5, %v1890_v42  ;;  %v1788_v52 = vsel %vm1787_vm1, %v7637_v46, %v1786_v8  ;;  %vm1895_vm6 = vcmp.eq.f32.partialorder %v7714_v28, inf  ;;  %v9572_v16 = vld [vmem:[#allocation10_spill] sm:$0xff] }
 0x209   : > { %v1611_v1 = vsel %vm1609_vm4, %v1610_v10, %v1608_v33  ;;  %v1797_v27 = vmul.f32 %v5639_v63, %v1796_v0  ;;  %v1898_v59 = vand.u32 2147483648, %v7714_v28  ;;  %v1704_v39 = vsel %vm1703_vm5, %v7672_v31, %v1702_v17  ;;  %v9573_v10 = vld [vmem:[#allocation11_spill] sm:$0xff] }
 0x20a   : > { %1997 = vxpose.xlu0.b32.end [2/2] (short) (narrow) %v1611_v1, 8  ;;  %v1892_v5 = vsub.f32 1.5, %v1891_v4  ;;  %vm1789_vm7 = vcmp.eq.f32.partialorder %v7637_v46, 0.0  ;;  %vm1897_vm8 = vcmp.eq.f32.partialorder %v7714_v28, 0.0  ;;  %v1706_v43 = vand.u32 2147483648, %v7672_v31 }
 0x20b   : > { %2124 = vxpose.xlu2.b32.start [1/2] (short) (narrow) %v1695_v55, 8  ;;  %vm1705_vm9 = vcmp.eq.f32.partialorder %v7672_v31, 0.0  ;;  %v1798_v45 = vmul.f32 %v1797_v27, %v7683_v34  ;;  %vm1799_vm10 = vcmp.eq.f32.partialorder %v7683_v34, inf  ;;  %v1802_v30 = vand.u32 2147483648, %v7683_v34 }
 0x20c   : > { %v1893_v13 = vmul.f32 %v5641_v38, %v1892_v5  ;;  %v1791_v38 = vsel %vm1789_vm7, %v1790_v49, %v1788_v52  ;;  %v1707_v63 = vsel %vm1705_vm9, %v1706_v43, %v1704_v39  ;;  %vm1801_vm11 = vcmp.eq.f32.partialorder %v7683_v34, 0.0 }
 0x20d   : > { %v1800_v46 = vsel %vm1799_vm10, %v7683_v34, %v1798_v45  ;;  %v5324_v40 = vunpack.i.l.bf16 %v9571_v36  ;;  %v5314_v31 = vunpack.i.l.bf16 %v9572_v16  ;;  %v5955_v42 = vmov 1983009808   ;;  %v9574_v34 = vld [vmem:[#allocation8_spill] sm:$0xff] }
 0x20e   : > { %v1894_v50 = vmul.f32 %v1893_v13, %v7714_v28  ;;  %v2442_v26 = vunpack.c.l.s4 %v5955_v42  ;;  %v5319_v61 = vunpack.i.l.bf16 %v9573_v10  ;;  %vm2437_vm12 = vcmask 1047556  }
 0x20f   : > { %v2449_v29 = vrot.slane %v5324_v40, 4  ;;  %v5956_v8 = vmov 1934713408   ;;  %v2451_v0 = vrot.slane %v5314_v31, 4  ;;  %v5325_v52 = vunpack.i.h.bf16 %v9571_v36 }
 0x210   : > { %v1896_v51 = vsel %vm1895_vm6, %v7714_v28, %v1894_v50  ;;  %v1803_v28 = vsel %vm1801_vm11, %v1802_v30, %v1800_v46  ;;  %v7771_v33 = vunpack.c.0.s8 %v2442_v26  ;;  %v2436_v24 = vrot.slane %v5319_v61, 4  ;;  %v9575_v26 = vld [vmem:[#allocation9_spill] sm:$0xff] }
 0x211   : > { %v1899_v44 = vsel %vm1897_vm8, %v1898_v59, %v1896_v51  ;;  %v2450_v41 = vsel %vm2437_vm12, %v2449_v29, %v5314_v31  ;;  %v2466_v5 = vunpack.c.l.s4 %v5956_v8  ;;  %v5315_v27 = vunpack.i.h.bf16 %v9572_v16 }
 0x212   : > { %2252 = vxpose.xlu0.b32.start [1/2] (short) (narrow) %v1791_v38, 8  ;;  %2381 = vxpose.xlu1.b32.end [2/2] (short) (narrow) %v1899_v44, 8  ;;  %v7774_v4 = vperm.slane %v2450_v41, %v7771_v33  ;;  %v2438_v1 = vsel %vm2437_vm12, %v2436_v24, %v9574_v34  ;;  %v2452_v49 = vsel %vm2437_vm12, %v5324_v40, %v2451_v0  ;;  %v2439_v43 = vrot.slane %v9574_v34, 4 }
 0x213   : > { %2125 = vxpose.xlu2.b32.end [2/2] (short) (narrow) %v1707_v63, 8  ;;  %v7780_v17 = vperm.slane %v2438_v1, %v7771_v33  ;;  %v7785_v50 = vunpack.c.0.s8 %v2466_v5  ;;  %v2505_v38 = vrot.slane %v5325_v52, 4  ;;  %v7792_v44 = vperm.slane %v2452_v49, %v7771_v33 }
 0x214   : > { %v2461_v55 = vrot.slane %v7774_v4, 4  ;;  %v2507_v45 = vrot.slane %v5315_v27, 4  ;;  %v5320_v46 = vunpack.i.h.bf16 %v9573_v10  ;;  %v2495_v41 = vrot.slane %v9575_v26, 4 }
 0x215   : > { %v2473_v36 = vrot.slane %v7792_v44, 4  ;;  %v2506_v40 = vsel %vm2437_vm12, %v2505_v38, %v5315_v27  ;;  %vm2645_vm15 = vcmask 125952  }
 0x216   : > { %v2462_v13 = vsel %vm2437_vm12, %v2461_v55, %v7780_v17  ;;  %v2508_v16 = vsel %vm2437_vm12, %v5325_v52, %v2507_v45  ;;  %v2493_v31 = vrot.slane %v5320_v46, 4  ;;  %v7804_v24 = vperm.slane %v2506_v40, %v7771_v33 }
 0x217   : > { %v2468_v39 = vperm.slane %v2462_v13, %v7785_v50  ;;  %v7807_v10 = vperm.slane %v2508_v16, %v7771_v33  ;;  %v2496_v8 = vsel %vm2437_vm12, %v5320_v46, %v2495_v41 }
 0x218   : > { %v2494_v55 = vsel %vm2437_vm12, %v2493_v31, %v9575_v26  ;;  %v2517_v0 = vrot.slane %v7804_v24, 4 }
 0x219   : > { %v2529_v13 = vrot.slane %v7807_v10, 4  ;;  %v7820_v49 = vperm.slane %v2494_v55, %v7771_v33  ;;  %v2485_v26 = vrot.slane %v2468_v39, 4 }
 0x21a   : > { %2253 = vxpose.xlu0.b32.end [2/2] (short) (narrow) %v1803_v28, 8  ;;  %v2440_v28 = vsel %vm2437_vm12, %v5319_v61, %v2439_v43 }
 0x21b   : > { %v7800_v29 = vperm.slane %v2440_v28, %v7771_v33  ;;  %v2518_v38 = vsel %vm2437_vm12, %v2517_v0, %v7820_v49 }
 0x21d   : > { %v2474_v61 = vsel %vm2437_vm12, %v2473_v36, %v7800_v29  ;;  %v2524_v36 = vperm.slane %v2518_v38, %v7785_v50 }
 0x21e   : > { %v2480_v5 = vperm.slane %v2474_v61, %v7785_v50 }
 0x220   : > { %v2489_v0 = vrot.slane %v2480_v5, 4 }
 0x25a   : > { %v2044_v42 = vpop.trf.xlu2 }
 0x25b   : > { %v2553_v34 = vperm.slane %v2044_v42, 0 }
 0x25d   : > { %v2569_v27 = vmul.f32 %v2553_v34, %v2480_v5 }
 0x25f   : > { %vm2585_vm2 = vcmp.gt.f32.partialorder %v2569_v27, 0.0 }
 0x261   : > { %v1916_v59 = vpop.trf.xlu0 }
 0x262   : > { %v2549_v51 = vperm.slane %v1916_v59, 0 }
 0x264   : > { %v2565_v63 = vmul.f32 %v2549_v51, %v2468_v39  ;;  %v7823_v51 = vperm.slane %v2496_v8, %v7771_v33 }
 0x266   : > { %v2597_v30 = vmul.f32 1.442695, %v2565_v63  ;;  %vm2581_vm14 = vcmp.gt.f32.partialorder %v2565_v63, 0.0  ;;  %v2300_v43 = vpop.trf.xlu1  ;;  %v2530_v45 = vsel %vm2437_vm12, %v2529_v13, %v7823_v51 }
 0x267   : > { %v2561_v28 = vperm.slane %v2300_v43, 0  ;;  %v2536_v40 = vperm.slane %v2530_v45, %v7785_v50  ;;  %v2463_v43 = vrot.slane %v7780_v17, 4 }
 0x268   : > { %5642 = vpow2.f32 %v2597_v30  ;;  %v2605_v30 = vmul.f32 1.442695, %v2569_v27 }
 0x269   : > { %v2577_v31 = vmul.f32 %v2561_v28, %v2536_v40  ;;  %v2545_v8 = vrot.slane %v2536_v40, 4  ;;  %v2464_v5 = vsel %vm2437_vm12, %v7774_v4, %v2463_v43 }
 0x26a   : > { %5644 = vpow2.f32 %v2605_v30  ;;  %v2490_v30 = vsel %vm2437_vm12, 0.0, %v2489_v0 }
 0x26b   : > { %v2621_v61 = vmul.f32 1.442695, %v2577_v31  ;;  %v2546_v39 = vsel %vm2437_vm12, 0.0, %v2545_v8  ;;  %vm2593_vm4 = vcmp.gt.f32.partialorder %v2577_v31, 0.0 }
 0x26e   : > { %v5643_v1 = vpop.eup %5642 }
 0x26f   : > { %v7817_v52 = vsel %vm2581_vm14, %v5643_v1, 0.0 }
 0x270   : > { %v2646_v63 = vsel %vm2645_vm15, %v7817_v52, 0.0  ;;  %v5645_v55 = vpop.eup %5644 }
 0x271   : > { %v2172_v59 = vpop.trf.xlu0 }
 0x272   : > { %v2557_v46 = vperm.slane %v2172_v59, 0  ;;  %2647 = vadd.xlane.f32.xlu1 %v2646_v63  ;;  %v2332_v34 = vpop.trf.xlu2  ;;  %v2486_v59 = vsel %vm2437_vm12, 0.0, %v2485_v26 }
 0x273   : > { %v2562_v13 = vperm.slane %v2332_v34, 0 }
 0x274   : > { %v2573_v16 = vmul.f32 %v2557_v46, %v2524_v36  ;;  %v7835_v46 = vsel %vm2585_vm2, %v5645_v55, 0.0 }
 0x275   : > { %v2578_v28 = vmul.f32 %v2562_v13, %v2546_v39  ;;  %v2658_v17 = vsel %vm2645_vm15, %v7835_v46, 0.0 }
 0x276   : > { %v1948_v42 = vpop.trf.xlu1  ;;  %v2613_v41 = vmul.f32 1.442695, %v2573_v16  ;;  %vm2589_vm3 = vcmp.gt.f32.partialorder %v2573_v16, 0.0 }
 0x277   : > { %v2550_v1 = vperm.slane %v1948_v42, 0  ;;  %v2623_v8 = vmul.f32 1.442695, %v2578_v28  ;;  %vm2594_vm6 = vcmp.gt.f32.partialorder %v2578_v28, 0.0 }
 0x278   : > { %5646 = vpow2.f32 %v2613_v41  ;;  %v2541_v41 = vrot.slane %v2524_v36, 4 }
 0x279   : > { %5648 = vpow2.f32 %v2621_v61  ;;  %v2566_v38 = vmul.f32 %v2550_v1, %v2486_v59  ;;  %v7844_v1 = vperm.slane %v2464_v5, %v7785_v50 }
 0x27a   : > { %v2542_v36 = vsel %vm2437_vm12, 0.0, %v2541_v41  ;;  %v2519_v41 = vrot.slane %v7820_v49, 4 }
 0x27b   : > { %v2599_v42 = vmul.f32 1.442695, %v2566_v38  ;;  %vm2582_vm1 = vcmp.gt.f32.partialorder %v2566_v38, 0.0 }
 0x27e   : > { %v5647_v26 = vpop.eup %5646 }
 0x27f   : > { %v5649_v34 = vpop.eup %5648  ;;  %v7847_v59 = vsel %vm2589_vm3, %v5647_v26, 0.0 }
 0x280   : > { %v7850_v43 = vsel %vm2593_vm4, %v5649_v34, 0.0  ;;  %v2670_v39 = vsel %vm2645_vm15, %v7847_v59, 0.0 }
 0x281   : > { %v2076_v63 = vpop.trf.xlu0  ;;  %v2682_v16 = vsel %vm2645_vm15, %v7850_v43, 0.0 }
 0x282   : > { %v2554_v45 = vperm.slane %v2076_v63, 0 }
 0x284   : > { %v2570_v40 = vmul.f32 %v2554_v45, %v2490_v30  ;;  %2659 = vadd.xlane.f32.xlu2 %v2658_v17  ;;  %v1980_v27 = vpop.trf.xlu2  ;;  %v2475_v17 = vrot.slane %v7800_v29, 4  ;;  %v2520_v29 = vsel %vm2437_vm12, %v7804_v24, %v2519_v41 }
 0x285   : > { %v2551_v55 = vperm.slane %v1980_v27, 0  ;;  %v7880_v24 = vperm.slane %v2520_v29, %v7785_v50 }
 0x286   : > { %v2607_v61 = vmul.f32 1.442695, %v2570_v40  ;;  %v2204_v0 = vpop.trf.xlu1  ;;  %vm2586_vm0 = vcmp.gt.f32.partialorder %v2570_v40, 0.0 }
 0x287   : > { %v2567_v4 = vmul.f32 %v2551_v55, %v7844_v1  ;;  %v2558_v13 = vperm.slane %v2204_v0, 0 }
 0x288   : > { %5650 = vpow2.f32 %v2607_v61  ;;  %v2531_v61 = vrot.slane %v7823_v51, 4 }
 0x289   : > { %5652 = vpow2.f32 %v2599_v42  ;;  %v2601_v63 = vmul.f32 1.442695, %v2567_v4  ;;  %v2574_v45 = vmul.f32 %v2558_v13, %v2542_v36  ;;  %vm2583_vm5 = vcmp.gt.f32.partialorder %v2567_v4, 0.0 }
 0x28a   : > { %5654 = vpow2.f32 %v2623_v8  ;;  %v2476_v8 = vsel %vm2437_vm12, %v7792_v44, %v2475_v17  ;;  %v2532_v38 = vsel %vm2437_vm12, %v7807_v10, %v2531_v61 }
 0x28b   : > { %5656 = vpow2.f32 %v2601_v63  ;;  %v2615_v30 = vmul.f32 1.442695, %v2574_v45  ;;  %2671 = vadd.xlane.f32.xlu0 %v2670_v39  ;;  %v2540_v28 = vperm.slane %v2532_v38, %v7785_v50  ;;  %v2484_v63 = vperm.slane %v2476_v8, %v7785_v50 }
 0x28c   : > { %2683 = vadd.xlane.f32.xlu2 %v2682_v16  ;;  %vm2590_vm7 = vcmp.gt.f32.partialorder %v2574_v45, 0.0 }
 0x28d   : > { %5658 = vpow2.f32 %v2615_v30  ;;  %v2491_v38 = vrot.slane %v2484_v63, 4 }
 0x28e   : > { %v5651_v31 = vpop.eup %5650 }
 0x28f   : > { %v5653_v5 = vpop.eup %5652  ;;  %v7856_v42 = vsel %vm2586_vm0, %v5651_v31, 0.0 }
 0x290   : > { %v2661_v26 = vsel %vm2645_vm15, %v7856_v42, 0.0  ;;  %v5655_v27 = vpop.eup %5654  ;;  %v7863_v34 = vsel %vm2582_vm1, %v5653_v5, 0.0 }
 0x291   : > { %2662 = vadd.xlane.f32.xlu1 %v2661_v26  ;;  %v5657_v55 = vpop.eup %5656  ;;  %v2649_v49 = vsel %vm2645_vm15, %v7863_v34, 0.0  ;;  %v7877_v0 = vsel %vm2594_vm6, %v5655_v27, 0.0 }
 0x292   : > { %v7865_v40 = vsel %vm2583_vm5, %v5657_v55, 0.0  ;;  %v2685_v30 = vsel %vm2645_vm15, %v7877_v0, 0.0 }
 0x293   : > { %v2652_v51 = vsel %vm2645_vm15, %v7865_v40, 0.0  ;;  %v5659_v13 = vpop.eup %5658 }
 0x294   : > { %2650 = vadd.xlane.f32.xlu2 %v2649_v49  ;;  %2653 = vadd.xlane.f32.xlu0 %v2652_v51  ;;  %v2236_v4 = vpop.trf.xlu2  ;;  %v7887_v5 = vsel %vm2590_vm7, %v5659_v13, 0.0  ;;  %v2487_v13 = vrot.slane %v7844_v1, 4 }
 0x295   : > { %v2559_v44 = vperm.slane %v2236_v4, 0  ;;  %v2673_v55 = vsel %vm2645_vm15, %v7887_v5, 0.0 }
 0x296   : > { %v2364_v36 = vpop.trf.xlu0  ;;  %v2488_v1 = vsel %vm2437_vm12, 0.0, %v2487_v13 }
 0x297   : > { %v2108_v39 = vpop.trf.xlu1  ;;  %v2575_v10 = vmul.f32 %v2559_v44, %v7880_v24  ;;  %v2563_v16 = vperm.slane %v2364_v36, 0 }
 0x298   : > { %v2555_v31 = vperm.slane %v2108_v39, 0 }
 0x299   : > { %2686 = vadd.xlane.f32.xlu1 %v2685_v30  ;;  %v2617_v17 = vmul.f32 1.442695, %v2575_v10  ;;  %v2579_v26 = vmul.f32 %v2563_v16, %v2540_v28  ;;  %vm2591_vm8 = vcmp.gt.f32.partialorder %v2575_v10, 0.0 }
 0x29a   : > { %v2571_v41 = vmul.f32 %v2555_v31, %v2484_v63  ;;  %v2492_v63 = vsel %vm2437_vm12, 0.0, %v2491_v38 }
 0x29b   : > { %5660 = vpow2.f32 %v2617_v17  ;;  %v2625_v61 = vmul.f32 1.442695, %v2579_v26  ;;  %vm2595_vm9 = vcmp.gt.f32.partialorder %v2579_v26, 0.0 }
 0x29c   : > { %v2609_v27 = vmul.f32 1.442695, %v2571_v41  ;;  %2674 = vadd.xlane.f32.xlu2 %v2673_v55  ;;  %vm2587_vm10 = vcmp.gt.f32.partialorder %v2571_v41, 0.0 }
 0x29d   : > { %5662 = vpow2.f32 %v2625_v61  ;;  %v2547_v61 = vrot.slane %v2540_v28, 4 }
 0x29e   : > { %5664 = vpow2.f32 %v2609_v27 }
 0x2a1   : > { %v5661_v29 = vpop.eup %5660 }
 0x2a2   : > { %v7891_v8 = vsel %vm2591_vm8, %v5661_v29, 0.0 }
 0x2a3   : > { %v5663_v49 = vpop.eup %5662  ;;  %v2676_v45 = vsel %vm2645_vm15, %v7891_v8, 0.0 }
 0x2a4   : > { %v5665_v51 = vpop.eup %5664  ;;  %2677 = vadd.xlane.f32.xlu1 %v2676_v45  ;;  %v2140_v4 = vpop.trf.xlu2  ;;  %v7896_v44 = vsel %vm2595_vm9, %v5663_v49, 0.0  ;;  %v2548_v49 = vsel %vm2437_vm12, 0.0, %v2547_v61 }
 0x2a5   : > { %v2556_v36 = vperm.slane %v2140_v4, 0  ;;  %v2688_v39 = vsel %vm2645_vm15, %v7896_v44, 0.0  ;;  %v7900_v30 = vsel %vm2587_vm10, %v5665_v51, 0.0 }
 0x2a6   : > { %v2012_v10 = vpop.trf.xlu0  ;;  %2689 = vadd.xlane.f32.xlu0 %v2688_v39  ;;  %v2664_v16 = vsel %vm2645_vm15, %v7900_v30, 0.0  ;;  %v2543_v39 = vrot.slane %v7880_v24, 4 }
 0x2a7   : > { %v2552_v31 = vperm.slane %v2012_v10, 0  ;;  %2665 = vadd.xlane.f32.xlu2 %v2664_v16  ;;  %v2572_v17 = vmul.f32 %v2556_v36, %v2492_v63 }
 0x2a8   : > { %v2544_v16 = vsel %vm2437_vm12, 0.0, %v2543_v39 }
 0x2a9   : > { %v2568_v26 = vmul.f32 %v2552_v31, %v2488_v1  ;;  %v2611_v27 = vmul.f32 1.442695, %v2572_v17  ;;  %vm2588_vm14 = vcmp.gt.f32.partialorder %v2572_v17, 0.0 }
 0x2ab   : > { %v2603_v41 = vmul.f32 1.442695, %v2568_v26  ;;  %vm2584_vm11 = vcmp.gt.f32.partialorder %v2568_v26, 0.0 }
 0x2ad   : > { %5666 = vpow2.f32 %v2603_v41 }
 0x2ae   : > { %v2396_v55 = vpop.trf.xlu1  ;;  %5668 = vpow2.f32 %v2611_v27 }
 0x2af   : > { %v2564_v29 = vperm.slane %v2396_v55, 0 }
 0x2b1   : > { %v2580_v45 = vmul.f32 %v2564_v29, %v2548_v49  ;;  %v3162_v29 = vlaneseq }
 0x2b3   : > { %v5667_v51 = vpop.eup %5666  ;;  %v2627_v4 = vmul.f32 1.442695, %v2580_v45  ;;  %vm2596_vm2 = vcmp.gt.f32.partialorder %v2580_v45, 0.0  ;;  %v7925_v49 = vshrl.u32 %v3162_v29, 7 }
 0x2b4   : > { %v7908_v38 = vsel %vm2584_vm11, %v5667_v51, 0.0  ;;  %v5669_v36 = vpop.eup %5668 }
 0x2b5   : > { %5670 = vpow2.f32 %v2627_v4  ;;  %v2655_v13 = vsel %vm2645_vm15, %v7908_v38, 0.0  ;;  %v7913_v63 = vsel %vm2588_vm14, %v5669_v36, 0.0  ;;  %5326 = vset.pattern.permute.xlu0 %v7925_v49  ;;  %v7929_v45 = vadd.s32 8, %v7925_v49 }
 0x2b6   : > { %v2268_v28 = vpop.trf.xlu0  ;;  %2656 = vadd.xlane.f32.xlu1 %v2655_v13  ;;  %v2667_v61 = vsel %vm2645_vm15, %v7913_v63, 0.0 }
 0x2b7   : > { %v2560_v10 = vperm.slane %v2268_v28, 0  ;;  %5327 = vset.pattern.permute.xlu1 %v7929_v45  ;;  %5329 = vset.pattern.permute.xlu2 %v7929_v45 }
 0x2b9   : > { %v2576_v31 = vmul.f32 %v2560_v10, %v2544_v16 }
 0x2bb   : > { %v5671_v1 = vpop.eup %5670  ;;  %v2619_v26 = vmul.f32 1.442695, %v2576_v31  ;;  %vm2592_vm3 = vcmp.gt.f32.partialorder %v2576_v31, 0.0 }
 0x2bc   : > { %v7915_v24 = vsel %vm2596_vm2, %v5671_v1, 0.0 }
 0x2bd   : > { %5672 = vpow2.f32 %v2619_v26  ;;  %v2691_v41 = vsel %vm2645_vm15, %v7915_v24, 0.0 }
 0x2be   : > { %2692 = vadd.xlane.f32.xlu2 %v2691_v41  ;;  %2668 = vadd.xlane.f32.xlu1 %v2667_v61 }
 0x2c3   : > { %v5673_v27 = vpop.eup %5672 }
 0x2c4   : > { %v7921_v55 = vsel %vm2592_vm3, %v5673_v27, 0.0 }
 0x2c5   : > { %v2679_v17 = vsel %vm2645_vm15, %v7921_v55, 0.0 }
 0x2c6   : > { %2680 = vadd.xlane.f32.xlu0 %v2679_v17 }
 0x2e5   : > { %v2648_v51 = vpop.xlane.xlu1 %2647 }
 0x2e6   : > { %vm2694_vm4 = vcmp.gt.f32.partialorder %v2648_v51, 0.0 }
 0x2e7   : > { %v2710_v4 = vsel %vm2694_vm4, %v2648_v51, 1.0 }
 0x2e8   : > { %5674 = vrcp.f32 %v2710_v4  ;;  %v2737_v36 = vand.u32 2147483648, %v2710_v4  ;;  %v2735_v16 = vand.u32 2147483647, %v2710_v4  ;;  %vm2731_vm0 = vweird.f32 %v2710_v4 }
 0x2ea   : > { %v2738_v1 = vor.u32 1.1754944e-38, %v2737_v36  ;;  %vm2736_vm5 = vcmp.eq.f32.partialorder %v2735_v16, 8.507059e+37 }
 0x2ee   : > { %v5675_v39 = vpop.eup %5674 }
 0x2ef   : > { %v2727_v13 = vmul.f32 %v5675_v39, %v2710_v4  ;;  %vm2732_vm15 = vweird.f32 %v5675_v39 }
 0x2f0   : > { %vm2733_vm1 = vmor %vm2731_vm0, %vm2732_vm15 }
 0x2f1   : > { %v2728_v28 = vsub.f32 1.0, %v2727_v13 }
 0x2f3   : > { %v2729_v10 = vmul.f32 %v5675_v39, %v2728_v28 }
 0x2f5   : > { %v2730_v31 = vadd.f32 %v5675_v39, %v2729_v10 }
 0x2f7   : > { %v2734_v26 = vsel %vm2733_vm1, %v5675_v39, %v2730_v31  ;;  %v7934_v41 = vpop.xlane.xlu2 %2659 }
 0x2f8   : > { %v2739_v61 = vsel %vm2736_vm5, %v2738_v1, %v2734_v26  ;;  %vm2698_vm6 = vcmp.gt.f32.partialorder %v7934_v41, 0.0 }
 0x2f9   : > { %v2950_v27 = vmul.f32 %v2739_v61, %v7817_v52  ;;  %v2714_v17 = vsel %vm2698_vm6, %v7934_v41, 1.0 }
 0x2fa   : > { %5676 = vrcp.f32 %v2714_v17  ;;  %vm2787_vm14 = vweird.f32 %v2714_v17 }
 0x2fb   : > { %v7942_v29 = vsel %vm2694_vm4, %v2950_v27, 0.0  ;;  %v2793_v27 = vand.u32 2147483648, %v2714_v17 }
 0x2fc   : > { %v3161_v4 = vperm.slane %v7942_v29, 0  ;;  %v3561_v23 = vperm.slane %v7942_v29, 1 }
 0x2fd   : > { %v2794_v15 = vor.u32 1.1754944e-38, %v2793_v27 }
 0x2fe   : > { %3166 = vperm.xlu0 %5326, %v3161_v4   ;;  %3172 = vperm.xlu1 %5327, %v3161_v4   ;;  %v7945_v39 = vpop.xlane.xlu0 %2671  ;;  %v2791_v4 = vand.u32 2147483647, %v2714_v17 }
 0x2ff   : > { %vm2702_vm7 = vcmp.gt.f32.partialorder %v7945_v39, 0.0  ;;  %v7950_v10 = vpop.xlane.xlu2 %2683 }
 0x300   : > { %v5677_v13 = vpop.eup %5676  ;;  %v7956_v16 = vsel %vm2702_vm7, %v7945_v39, 1.0  ;;  %vm9350_vm11 = vcmp.gt.f32.partialorder %v7950_v10, 0.0  ;;  %vm2792_vm3 = vcmp.eq.f32.partialorder %v2791_v4, 8.507059e+37 }
 0x301   : > { %v2783_v28 = vmul.f32 %v5677_v13, %v2714_v17  ;;  %vm2788_vm10 = vweird.f32 %v5677_v13 }
 0x302   : > { %vm2789_vm2 = vmor %vm2787_vm14, %vm2788_vm10 }
 0x303   : > { %v2784_v52 = vsub.f32 1.0, %v2783_v28 }
 0x304   : > { %v7948_v36 = vpop.xlane.xlu1 %2662 }
 0x305   : > { %vm2699_vm8 = vcmp.gt.f32.partialorder %v7948_v36, 0.0  ;;  %v2785_v51 = vmul.f32 %v5677_v13, %v2784_v52  ;;  %v7973_v52 = vsel %vm9350_vm11, %v7950_v10, 1.0 }
 0x306   : > { %v2715_v31 = vsel %vm2699_vm8, %v7948_v36, 1.0  ;;  %5328 = vset.pattern.permute.xlu1 %v7925_v49  ;;  %v2905_v36 = vand.u32 2147483648, %v7973_v52 }
 0x307   : > { %5678 = vrcp.f32 %v2715_v31  ;;  %v7962_v1 = vpop.xlane.xlu0 %2653  ;;  %v2786_v26 = vadd.f32 %v5677_v13, %v2785_v51  ;;  %v7975_v11 = vpop.xlane.xlu2 %2650  ;;  %vm2801_vm0 = vweird.f32 %v2715_v31 }
 0x308   : > { %5680 = vrcp.f32 %v7956_v16  ;;  %vm2696_vm9 = vcmp.gt.f32.partialorder %v7962_v1, 0.0  ;;  %vm2695_vm4 = vcmp.gt.f32.partialorder %v7975_v11, 0.0 }
 0x309   : > { %v2712_v61 = vsel %vm2696_vm9, %v7962_v1, 1.0  ;;  %v2790_v35 = vsel %vm2789_vm2, %v5677_v13, %v2786_v26  ;;  %v2807_v13 = vand.u32 2147483648, %v2715_v31  ;;  %v7989_v27 = vsel %vm2695_vm4, %v7975_v11, 1.0 }
 0x30a   : > { %5682 = vrcp.f32 %v2712_v61  ;;  %v2795_v17 = vsel %vm2792_vm3, %v2794_v15, %v2790_v35  ;;  %v2765_v57 = vand.u32 2147483648, %v2712_v61  ;;  %vm2759_vm10 = vweird.f32 %v2712_v61 }
 0x30b   : > { %5684 = vrcp.f32 %v7973_v52  ;;  %v2954_v18 = vmul.f32 %v2795_v17, %v7835_v46  ;;  %v2847_v1 = vand.u32 2147483647, %v7956_v16  ;;  %v2751_v20 = vand.u32 2147483648, %v7989_v27 }
 0x30c   : > { %v7983_v47 = vpop.xlane.xlu1 %2686  ;;  %5686 = vrcp.f32 %v7989_v27 }
 0x30d   : > { %v5679_v28 = vpop.eup %5678  ;;  %vm9349_vm14 = vcmp.gt.f32.partialorder %v7983_v47, 0.0  ;;  %v2752_v53 = vor.u32 1.1754944e-38, %v2751_v20 }
 0x30e   : > { %v2797_v51 = vmul.f32 %v5679_v28, %v2715_v31  ;;  %v7977_v6 = vpop.eup %5680  ;;  %vm2802_vm15 = vweird.f32 %v5679_v28  ;;  %v8019_v19 = vsel %vm9349_vm14, %v7983_v47, 1.0 }
 0x30f   : > { %v2839_v22 = vmul.f32 %v7977_v6, %v7956_v16  ;;  %vm7993_vm1 = vmor %vm2801_vm0, %vm2802_vm15  ;;  %v8007_v7 = vpop.xlane.xlu2 %2674  ;;  %5688 = vrcp.f32 %v8019_v19 }
 0x310   : > { %v2798_v58 = vsub.f32 1.0, %v2797_v51  ;;  %v5683_v48 = vpop.eup %5682  ;;  %v2805_v51 = vand.u32 2147483647, %v2715_v31 }
 0x311   : > { %v2755_v26 = vmul.f32 %v5683_v48, %v2712_v61  ;;  %v7991_v35 = vpop.eup %5684  ;;  %v2840_v4 = vsub.f32 1.0, %v2839_v22  ;;  %vm2760_vm5 = vweird.f32 %v5683_v48 }
 0x312   : > { %v2799_v3 = vmul.f32 %v5679_v28, %v2798_v58  ;;  %v2763_v58 = vand.u32 2147483647, %v2712_v61  ;;  %v2895_v22 = vmul.f32 %v7991_v35, %v7973_v52  ;;  %vm2806_vm2 = vcmp.eq.f32.partialorder %v2805_v51, 8.507059e+37  ;;  %vm2761_vm3 = vmor %vm2759_vm10, %vm2760_vm5 }
 0x313   : > { %v2756_v15 = vsub.f32 1.0, %v2755_v26  ;;  %v2808_v26 = vor.u32 1.1754944e-38, %v2807_v13  ;;  %vm2843_vm5 = vweird.f32 %v7956_v16  ;;  %vm9348_vm10 = vcmp.gt.f32.partialorder %v8007_v7, 0.0 }
 0x314   : > { %v2800_v2 = vadd.f32 %v5679_v28, %v2799_v3  ;;  %v8000_v3 = vsel %vm2698_vm6, %v2954_v18, 0.0  ;;  %vm2764_vm15 = vcmp.eq.f32.partialorder %v2763_v58, 8.507059e+37  ;;  %v2766_v18 = vor.u32 1.1754944e-38, %v2765_v57 }
 0x315   : > { %v2757_v46 = vmul.f32 %v5683_v48, %v2756_v15  ;;  %9578 = vst [vmem:[#allocation15_spill] sm:$0xff] %v8000_v3  ;;  %v2841_v15 = vmul.f32 %v7977_v6, %v2840_v4  ;;  %v9326_v13 = vperm.slane %v8000_v3, 1  ;;  %v3213_v61 = vperm.slane %v8000_v3, 0  ;;  %v8021_v4 = vpop.eup %5686 }
 0x316   : > { %v2804_v17 = vsel %vm7993_vm1, %v5679_v28, %v2800_v2  ;;  %v2896_v51 = vsub.f32 1.0, %v2895_v22  ;;  %vm2844_vm1 = vweird.f32 %v7977_v6 }
 0x317   : > { %v2758_v31 = vadd.f32 %v5683_v48, %v2757_v46  ;;  %v8010_v41 = vpop.xlane.xlu1 %2677  ;;  %v2809_v2 = vsel %vm2806_vm2, %v2808_v26, %v2804_v17  ;;  %3618 = vperm.xlu0 %5326, %v9326_v13   ;;  %3224 = vperm.xlu2 %5329, %v3213_v61   ;;  %vm2848_vm2 = vcmp.eq.f32.partialorder %v2847_v1, 8.507059e+37  ;;  %v2906_v13 = vor.u32 1.1754944e-38, %v2905_v36 }
 0x318   : > { %vm2704_vm6 = vcmp.gt.f32.partialorder %v8010_v41, 0.0  ;;  %3218 = vperm.xlu1 %5328, %v3213_v61  }
 0x319   : > { %v8012_v56 = vpop.xlane.xlu0 %2689  ;;  %v2762_v28 = vsel %vm2761_vm3, %v5683_v48, %v2758_v31  ;;  %v2955_v48 = vmul.f32 %v2809_v2, %v7856_v42  ;;  %v8033_v58 = vsel %vm2704_vm6, %v8010_v41, 1.0  ;;  %v2849_v42 = vand.u32 2147483648, %v7956_v16 }
 0x31a   : > { %v2767_v46 = vsel %vm2764_vm15, %v2766_v18, %v2762_v28  ;;  %vm2708_vm0 = vcmp.gt.f32.partialorder %v8012_v56, 0.0  ;;  %v2741_v31 = vmul.f32 %v8021_v4, %v7989_v27  ;;  %5690 = vrcp.f32 %v8033_v58  ;;  %v8070_v16 = vpop.xlane.xlu2 %2665 }
 0x31b   : > { %v2952_v57 = vmul.f32 %v2767_v46, %v7865_v40  ;;  %v2842_v40 = vadd.f32 %v7977_v6, %v2841_v15  ;;  %v8044_v26 = vsel %vm2708_vm0, %v8012_v56, 1.0  ;;  %v2897_v15 = vmul.f32 %v7991_v35, %v2896_v51 }
 0x31c   : > { %v8062_v2 = vsel %vm2699_vm8, %v2955_v48, 0.0  ;;  %5692 = vrcp.f32 %v8044_v26  ;;  %v2903_v46 = vand.u32 2147483647, %v7973_v52  ;;  %v2850_v51 = vor.u32 1.1754944e-38, %v2849_v42  ;;  %v8078_v48 = vpop.eup %5688 }
 0x31d   : > { %v8038_v17 = vsel %vm2696_vm9, %v2952_v57, 0.0  ;;  %vm8056_vm9 = vmor %vm2843_vm5, %vm2844_vm1  ;;  %9581 = vst [vmem:[#allocation10_spill] sm:$0xff] %v8062_v2  ;;  %vm2899_vm8 = vweird.f32 %v7973_v52  ;;  %v2742_v57 = vsub.f32 1.0, %v2741_v31  ;;  %vm2700_vm3 = vcmp.gt.f32.partialorder %v8070_v16, 0.0 }
 0x31e   : > { %v3014_v22 = vrot.slane %v8038_v17, 4  ;;  %v2846_v61 = vsel %vm8056_vm9, %v7977_v6, %v2842_v40  ;;  %v2898_v42 = vadd.f32 %v7991_v35, %v2897_v15  ;;  %vm2900_vm15 = vweird.f32 %v7991_v35 }
 0x31f   : > { %5330 = vset.pattern.permute.xlu2 %v7925_v49  ;;  %v2851_v18 = vsel %vm2848_vm2, %v2850_v51, %v2846_v61  ;;  %v8094_v31 = vsel %vm2700_vm3, %v8070_v16, 1.0  ;;  %vm8096_vm1 = vcmp.eq.f32.partialorder %v2903_v46, 8.507059e+37  ;;  %v9584_v15 = vperm.slane %v8062_v2, 0  ;;  %vm8113_vm9 = vmor %vm2899_vm8, %vm2900_vm15 }
 0x320   : > { %v8066_v28 = vsel %vm2437_vm12, %v3014_v22, %v7942_v29  ;;  %v8083_v22 = vsel %vm9348_vm10, %v8007_v7, 1.0  ;;  %v5691_v40 = vpop.eup %5690  ;;  %5331 = vset.pattern.permute.xlu1 %v7929_v45  ;;  %5694 = vrcp.f32 %v8094_v31  ;;  %v2743_v51 = vmul.f32 %v8021_v4, %v2742_v57 }
 0x321   : > { %v2867_v6 = vmul.f32 %v5691_v40, %v8033_v58  ;;  %3231 = vperm.xlu0 %5326, %v9584_v15   ;;  %vm2745_vm5 = vweird.f32 %v7989_v27  ;;  %5696 = vrcp.f32 %v8083_v22  ;;  %v2958_v46 = vmul.f32 %v2851_v18, %v7847_v59 }
 0x322   : > { %v8104_v61 = vpop.eup %5692  ;;  %v2909_v15 = vmul.f32 %v8078_v48, %v8019_v19  ;;  %v2902_v9 = vsel %vm8113_vm9, %v7991_v35, %v2898_v42  ;;  %vm2872_vm2 = vweird.f32 %v5691_v40  ;;  %v2875_v59 = vand.u32 2147483647, %v8033_v58 }
 0x323   : > { %v2868_v37 = vsub.f32 1.0, %v2867_v6  ;;  %v2923_v57 = vmul.f32 %v8104_v61, %v8044_v26  ;;  %v2877_v52 = vand.u32 2147483648, %v8033_v58  ;;  %v8131_v6 = vadd.f32 %v8021_v4, %v2743_v51 }
 0x324   : > { %vm2746_vm15 = vweird.f32 %v8021_v4  ;;  %v2749_v35 = vand.u32 2147483647, %v7989_v27  ;;  %v2910_v54 = vsub.f32 1.0, %v2909_v15  ;;  %vm2871_vm9 = vweird.f32 %v8033_v58 }
 0x325   : > { %v2869_v62 = vmul.f32 %v5691_v40, %v2868_v37  ;;  %v2924_v21 = vsub.f32 1.0, %v2923_v57  ;;  %v8146_v51 = vsel %vm8096_vm1, %v2906_v13, %v2902_v9  ;;  %vm2873_vm13 = vmor %vm2871_vm9, %vm2872_vm2  ;;  %v2878_v60 = vor.u32 1.1754944e-38, %v2877_v52 }
 0x326   : > { %v5695_v36 = vpop.eup %5694  ;;  %vm8158_vm10 = vmor %vm2745_vm5, %vm2746_vm15  ;;  %vm2876_vm1 = vcmp.eq.f32.partialorder %v2875_v59, 8.507059e+37  ;;  %vm8167_vm2 = vcmp.eq.f32.partialorder %v2749_v35, 8.507059e+37  ;;  %v2821_v15 = vand.u32 2147483648, %v8094_v31  ;;  %v2819_v52 = vand.u32 2147483647, %v8094_v31 }
 0x327   : > { %v2870_v37 = vadd.f32 %v5691_v40, %v2869_v62  ;;  %3566 = vperm.xlu2 %5330, %v3561_v23   ;;  %v8142_v57 = vpop.eup %5696  ;;  %v2811_v14 = vmul.f32 %v5695_v36, %v8094_v31  ;;  %v8152_v62 = vsel %vm2702_vm7, %v2958_v46, 0.0  ;;  %v2925_v20 = vmul.f32 %v8104_v61, %v2924_v21 }
 0x328   : > { %3572 = vperm.xlu1 %5331, %v3561_v23   ;;  %9587 = vst [vmem:[#allocation11_spill] sm:$0xff] %v8152_v62  ;;  %v2748_v23 = vsel %vm8158_vm10, %v8021_v4, %v8131_v6  ;;  %v2911_v46 = vmul.f32 %v8078_v48, %v2910_v54  ;;  %v2933_v4 = vand.u32 2147483648, %v8044_v26  ;;  %vm2914_vm7 = vweird.f32 %v8078_v48 }
 0x329   : > { %v8126_v18 = vpop.xlane.xlu1 %2656  ;;  %v2874_v9 = vsel %vm2873_vm13, %v5691_v40, %v2870_v37  ;;  %v2812_v1 = vsub.f32 1.0, %v2811_v14  ;;  %v8175_v40 = vmul.f32 %v8142_v57, %v8083_v22  ;;  %vm2816_vm13 = vweird.f32 %v5695_v36 }
 0x32a   : > { %vm2697_vm8 = vcmp.gt.f32.partialorder %v8126_v18, 0.0  ;;  %v2879_v27 = vsel %vm2876_vm1, %v2878_v60, %v2874_v9  ;;  %v2926_v54 = vadd.f32 %v8104_v61, %v2925_v20  ;;  %vm2928_vm10 = vweird.f32 %v8104_v61 }
 0x32b   : > { %v8138_v42 = vsel %vm2697_vm8, %v8126_v18, 1.0  ;;  %v2960_v21 = vmul.f32 %v2879_v27, %v7891_v8  ;;  %v2813_v59 = vmul.f32 %v5695_v36, %v2812_v1  ;;  %vm2927_vm15 = vweird.f32 %v8044_v26 }
 0x32c   : > { %5698 = vrcp.f32 %v8138_v42  ;;  %vm2815_vm9 = vweird.f32 %v8094_v31  ;;  %vm2913_vm1 = vweird.f32 %v8019_v19  ;;  %v2931_v37 = vand.u32 2147483647, %v8044_v26  ;;  %vm8204_vm14 = vmor %vm2927_vm15, %vm2928_vm10 }
 0x32d   : > { %v8186_v14 = vsel %vm2704_vm6, %v2960_v21, 0.0  ;;  %v2814_v8 = vadd.f32 %v5695_v36, %v2813_v59  ;;  %vm2817_vm6 = vmor %vm2815_vm9, %vm2816_vm13  ;;  %v2822_v41 = vor.u32 1.1754944e-38, %v2821_v15  ;;  %v2934_v20 = vor.u32 1.1754944e-38, %v2933_v4 }
 0x32e   : > { %9592 = vst [vmem:[#allocation8_spill] sm:$0xff] %v8186_v14  ;;  %v3291_v58 = vperm.slane %v8186_v14, 0  ;;  %vm2820_vm11 = vcmp.eq.f32.partialorder %v2819_v52, 8.507059e+37  ;;  %v9595_v1 = vperm.slane %v8000_v3, 1  ;;  %v2930_v21 = vsel %vm8204_vm14, %v8104_v61, %v2926_v54 }
 0x32f   : > { %5333 = vset.pattern.permute.xlu2 %v7929_v45  ;;  %v2818_v27 = vsel %vm2817_vm6, %v5695_v36, %v2814_v8  ;;  %v2777_v59 = vand.u32 2147483647, %v8138_v42  ;;  %v2779_v13 = vand.u32 2147483648, %v8138_v42  ;;  %v2753_v52 = vsel %vm8167_vm2, %v2752_v53, %v2748_v23 }
 0x330   : > { %3624 = vperm.xlu1 %5331, %v9595_v1   ;;  %v2823_v15 = vsel %vm2820_vm11, %v2822_v41, %v2818_v27  ;;  %3296 = vperm.xlu0 %5326, %v3291_v58   ;;  %v2912_v8 = vadd.f32 %v8078_v48, %v2911_v46  ;;  %v2854_v61 = vsub.f32 1.0, %v8175_v40  ;;  %vm2932_vm11 = vcmp.eq.f32.partialorder %v2931_v37, 8.507059e+37 }
 0x331   : > { %v8181_v6 = vpop.xlane.xlu2 %2692  ;;  %v2956_v4 = vmul.f32 %v2823_v15, %v7900_v30  ;;  %v2935_v54 = vsel %vm2932_vm11, %v2934_v20, %v2930_v21  ;;  %vm2773_vm14 = vweird.f32 %v8138_v42  ;;  %v2780_v39 = vor.u32 1.1754944e-38, %v2779_v13  ;;  %v8262_v1 = vpop.xlane.xlu1 %2668 }
 0x332   : > { %v5699_v60 = vpop.eup %5698  ;;  %vm2709_vm5 = vcmp.gt.f32.partialorder %v8181_v6, 0.0  ;;  %v3265_v53 = vperm.slane %v8152_v62, 0  ;;  %v2919_v23 = vand.u32 2147483648, %v8019_v19  ;;  %vm2778_vm15 = vcmp.eq.f32.partialorder %v2777_v59, 8.507059e+37 }
 0x333   : > { %v2769_v35 = vmul.f32 %v5699_v60, %v8138_v42  ;;  %v8202_v9 = vsel %vm2709_vm5, %v8181_v6, 1.0  ;;  %vm2774_vm13 = vweird.f32 %v5699_v60  ;;  %v2951_v42 = vmul.f32 %v2753_v52, %v7863_v34 }
 0x334   : > { %5700 = vrcp.f32 %v8202_v9  ;;  %vm2775_vm10 = vmor %vm2773_vm14, %vm2774_vm13  ;;  %v2964_v40 = vmul.f32 %v2935_v54, %v7896_v44  ;;  %v2855_v27 = vmul.f32 %v8142_v57, %v2854_v61  ;;  %v2962_v44 = vmul.f32 %v8146_v51, %v7850_v43 }
 0x335   : > { %v2770_v26 = vsub.f32 1.0, %v2769_v35  ;;  %v8225_v35 = vsel %vm2700_vm3, %v2956_v4, 0.0  ;;  %vm8249_vm3 = vmor %vm2913_vm1, %vm2914_vm7  ;;  %v9599_v15 = vand.u32 2147483647, %v8019_v19  ;;  %v2920_v59 = vor.u32 1.1754944e-38, %v2919_v23 }
 0x336   : > { %9596 = vst [vmem:[#allocation9_spill] sm:$0xff] %v8225_v35  ;;  %v3026_v31 = vrot.slane %v8225_v35, 4  ;;  %vm2858_vm9 = vweird.f32 %v8142_v57  ;;  %v8274_v43 = vsel %vm2695_vm4, %v2951_v42, 0.0  ;;  %vm2701_vm1 = vcmp.gt.f32.partialorder %v8262_v1, 0.0 }
 0x337   : > { %v2771_v36 = vmul.f32 %v5699_v60, %v2770_v26  ;;  %3276 = vperm.xlu2 %5333, %v3265_v53   ;;  %v2916_v26 = vsel %vm8249_vm3, %v8078_v48, %v2912_v8  ;;  %vm2918_vm7 = vcmp.eq.f32.partialorder %v9599_v15, 8.507059e+37  ;;  %v8278_v48 = vsel %vm2708_vm0, %v2964_v40, 0.0 }
 0x338   : > { %v8243_v13 = vsel %vm2437_vm12, %v3026_v31, %v8000_v3  ;;  %5332 = vset.pattern.permute.xlu1 %v7925_v49  ;;  %v2921_v19 = vsel %vm2918_vm7, %v2920_v59, %v2916_v26  ;;  %v2947_v18 = vand.u32 2147483648, %v8202_v9  ;;  %v2945_v56 = vand.u32 2147483647, %v8202_v9 }
 0x339   : > { %v2772_v41 = vadd.f32 %v5699_v60, %v2771_v36  ;;  %v8228_v30 = vpop.xlane.xlu0 %2680  ;;  %v2856_v36 = vadd.f32 %v8142_v57, %v2855_v27  ;;  %vm9601_vm0 = vcmp.gt.f32.partialorder %v7950_v10, 0.0  ;;  %v3082_v54 = vrot.slane %v8278_v48, 4 }
 0x33a   : > { %vm2705_vm2 = vcmp.gt.f32.partialorder %v8228_v30, 0.0  ;;  %v5701_v20 = vpop.eup %5700  ;;  %v8291_v61 = vsel %vm9601_vm0, %v2962_v44, 0.0  ;;  %v8304_v31 = vsel %vm2701_vm1, %v8262_v1, 1.0  ;;  %vm2941_vm13 = vweird.f32 %v8202_v9 }
 0x33b   : > { %v2776_v46 = vsel %vm2775_vm10, %v5699_v60, %v2772_v41  ;;  %v8237_v16 = vsel %vm2705_vm2, %v8228_v30, 1.0  ;;  %v2937_v21 = vmul.f32 %v5701_v20, %v8202_v9  ;;  %vm2942_vm4 = vweird.f32 %v5701_v20 }
 0x33c   : > { %v2781_v37 = vsel %vm2778_vm15, %v2780_v39, %v2776_v46  ;;  %5702 = vrcp.f32 %v8237_v16  ;;  %v2963_v23 = vmul.f32 %v2921_v19, %v7877_v0  ;;  %v2861_v46 = vand.u32 2147483647, %v8083_v22  ;;  %vm2943_vm11 = vmor %vm2941_vm13, %vm2942_vm4 }
 0x33d   : > { %v2953_v34 = vmul.f32 %v2781_v37, %v7908_v38  ;;  %v2938_v4 = vsub.f32 1.0, %v2937_v21  ;;  %v2863_v42 = vand.u32 2147483648, %v8083_v22  ;;  %v2948_v40 = vor.u32 1.1754944e-38, %v2947_v18 }
 0x33e   : > { %vm2946_vm14 = vcmp.eq.f32.partialorder %v2945_v56, 8.507059e+37  ;;  %v3083_v27 = vsel %vm2437_vm12, %v3082_v54, %v8291_v61  ;;  %5704 = vrcp.f32 %v8304_v31  ;;  %vm2862_vm15 = vcmp.eq.f32.partialorder %v2861_v46, 8.507059e+37 }
 0x33f   : > { %v8270_v38 = vsel %vm2697_vm8, %v2953_v34, 0.0  ;;  %v2939_v11 = vmul.f32 %v5701_v20, %v2938_v4  ;;  %vm2857_vm8 = vweird.f32 %v8083_v22  ;;  %5334 = vset.pattern.permute.xlu2 %v7925_v49  ;;  %v2891_v34 = vand.u32 2147483648, %v8237_v16 }
 0x340   : > { %9600 = vst [vmem:[#allocation45_spill] sm:$0xff] %v8270_v38  ;;  %v3020_v51 = vrot.slane %v8270_v38, 4  ;;  %vm8297_vm6 = vmor %vm2857_vm8, %vm2858_vm9  ;;  %3270 = vperm.xlu1 %5332, %v3265_v53   ;;  %v2889_v53 = vand.u32 2147483647, %v8237_v16  ;;  %v2864_v26 = vor.u32 1.1754944e-38, %v2863_v42  ;;  %v8325_v21 = vperm.slane %v3083_v27, %v7771_v33 }
 0x341   : > { %v2940_v39 = vadd.f32 %v5701_v20, %v2939_v11  ;;  %v2860_v37 = vsel %vm8297_vm6, %v8142_v57, %v2856_v36  ;;  %v3070_v57 = vrot.slane %v8186_v14, 4  ;;  %vm2885_vm3 = vweird.f32 %v8237_v16 }
 0x342   : > { %v8286_v52 = vsel %vm2437_vm12, %v3020_v51, %v8274_v43  ;;  %v5703_v8 = vpop.eup %5702  ;;  %v2892_v4 = vor.u32 1.1754944e-38, %v2891_v34  ;;  %vm9605_vm9 = vcmp.gt.f32.partialorder %v7983_v47, 0.0  ;;  %vm2890_vm4 = vcmp.eq.f32.partialorder %v2889_v53, 8.507059e+37 }
 0x343   : > { %v2881_v10 = vmul.f32 %v5703_v8, %v8237_v16  ;;  %v2944_v60 = vsel %vm2943_vm11, %v5701_v20, %v2940_v39  ;;  %vm2886_vm10 = vweird.f32 %v5703_v8  ;;  %v3317_v20 = vperm.slane %v8291_v61, 0 }
 0x344   : > { %v2949_v0 = vsel %vm2946_vm14, %v2948_v40, %v2944_v60  ;;  %vm2887_vm7 = vmor %vm2885_vm3, %vm2886_vm10  ;;  %v8336_v36 = vsel %vm9605_vm9, %v2963_v23, 0.0  ;;  %v5705_v6 = vpop.eup %5704  ;;  %v3071_v16 = vsel %vm2437_vm12, %v3070_v57, %v8152_v62  ;;  %v3108_v41 = vrot.slane %v8325_v21, 4 }
 0x345   : > { %v2882_v9 = vsub.f32 1.0, %v2881_v10  ;;  %v2965_v22 = vmul.f32 %v2949_v0, %v7915_v24  ;;  %v2865_v24 = vsel %vm2862_vm15, %v2864_v26, %v2860_v37  ;;  %v2825_v39 = vmul.f32 %v5705_v6, %v8304_v31 }
 0x346   : > { %v2959_v56 = vmul.f32 %v2865_v24, %v7887_v5  ;;  %v8359_v23 = vperm.slane %v3071_v16, %v7771_v33  ;;  %v3174_v42 = vperm.slane %v8274_v43, 0  ;;  %v2835_v26 = vand.u32 2147483648, %v8304_v31 }
 0x347   : > { %v2883_v44 = vmul.f32 %v5703_v8, %v2882_v9  ;;  %v8329_v15 = vsel %vm2709_vm5, %v2965_v22, 0.0  ;;  %3322 = vperm.xlu2 %5334, %v3317_v20   ;;  %vm9607_vm5 = vcmp.gt.f32.partialorder %v8007_v7, 0.0  ;;  %v2826_v37 = vsub.f32 1.0, %v2825_v39 }
 0x348   : > { %9604 = vst [vmem:[#allocation46_spill] sm:$0xff] %v8329_v15  ;;  %v3088_v51 = vrot.slane %v8329_v15, 4  ;;  %v3356_v19 = vperm.slane %v8329_v15, 0  ;;  %5335 = vset.pattern.permute.xlu1 %v7929_v45  ;;  %v3096_v9 = vrot.slane %v8359_v23, 4  ;;  %v9609_v57 = vperm.slane %v8062_v2, 0 }
 0x349   : > { %v2884_v59 = vadd.f32 %v5703_v8, %v2883_v44  ;;  %v2827_v34 = vmul.f32 %v5705_v6, %v2826_v37  ;;  %v3574_v44 = vperm.slane %v8274_v43, 1  ;;  %vm2829_vm0 = vweird.f32 %v8304_v31 }
 0x34a   : > { %3361 = vperm.xlu0 %5326, %v3356_v19   ;;  %v3089_v47 = vsel %vm2437_vm12, %v3088_v51, %v8336_v36  ;;  %v3019_v16 = vperm.slane %v8066_v28, %v7771_v33  ;;  %v3031_v1 = vperm.slane %v8243_v13, %v7771_v33 }
 0x34b   : > { %v2888_v18 = vsel %vm2887_vm7, %v5703_v8, %v2884_v59  ;;  %v8350_v54 = vperm.slane %v3089_v47, %v7771_v33  ;;  %v2828_v53 = vadd.f32 %v5705_v6, %v2827_v34  ;;  %v2833_v59 = vand.u32 2147483647, %v8304_v31 }
 0x34c   : > { %v2893_v11 = vsel %vm2890_vm4, %v2892_v4, %v2888_v18  ;;  %v2836_v4 = vor.u32 1.1754944e-38, %v2835_v26  ;;  %v3626_v18 = vperm.slane %v8062_v2, 1  ;;  %v9357_v31 = vperm.slane %v8278_v48, 1 }
 0x34d   : > { %v2961_v8 = vmul.f32 %v2893_v11, %v7921_v55  ;;  %v3109_v46 = vsel %vm2437_vm12, %v8350_v54, %v3108_v41  ;;  %v8366_v55 = vsel %vm9607_vm5, %v2959_v56, 0.0  ;;  %vm2834_vm6 = vcmp.eq.f32.partialorder %v2833_v59, 8.507059e+37 }
 0x34e   : > { %9608 = vst [vmem:[#allocation48_spill] sm:$0xff] %v8366_v55  ;;  %v8372_v30 = vperm.slane %v3109_v46, %v7785_v50  ;;  %v9361_v51 = vperm.slane %v8366_v55, 1  ;;  %v3025_v56 = vperm.slane %v8286_v52, %v7771_v33  ;;  %v9356_v46 = vperm.slane %v8270_v38, 2 }
 0x34f   : > { %v8356_v10 = vsel %vm2705_vm2, %v2961_v8, 0.0  ;;  %3179 = vperm.xlu2 %5334, %v3174_v42   ;;  %vm2830_vm2 = vweird.f32 %v5705_v6  ;;  %v3040_v8 = vrot.slane %v3019_v16, 4  ;;  %v3106_v13 = vrot.slane %v8350_v54, 4 }
 0x350   : > { %9606 = vst [vmem:[#allocation47_spill] sm:$0xff] %v8356_v10  ;;  %v3076_v5 = vrot.slane %v8356_v10, 4  ;;  %3185 = vperm.xlu1 %5335, %v3174_v42   ;;  %v3122_v0 = vrot.slane %v8372_v30, 4  ;;  %vm2831_vm8 = vmor %vm2829_vm0, %vm2830_vm2  ;;  %v3038_v28 = vrot.slane %v3025_v56, 4  ;;  %v3278_v42 = vperm.slane %v8366_v55, 0 }
 0x351   : > { %v2832_v24 = vsel %vm2831_vm8, %v5705_v6, %v2828_v53  ;;  %v3041_v41 = vsel %vm2437_vm12, %v3025_v56, %v3040_v8  ;;  %v3107_v54 = vsel %vm2437_vm12, %v3106_v13, %v8325_v21 }
 0x352   : > { %v3077_v40 = vsel %vm2437_vm12, %v3076_v5, %v8366_v55  ;;  %v2837_v11 = vsel %vm2834_vm6, %v2836_v4, %v2832_v24  ;;  %v3039_v39 = vsel %vm2437_vm12, %v3038_v28, %v3019_v16  ;;  %v3049_v5 = vperm.slane %v3041_v41, %v7785_v50 }
 0x353   : > { %v3081_v60 = vperm.slane %v3077_v40, %v7771_v33  ;;  %v2957_v47 = vmul.f32 %v2837_v11, %v7913_v63  ;;  %v3330_v11 = vperm.slane %v8336_v36, 0  ;;  %v3113_v21 = vperm.slane %v3107_v54, %v7785_v50 }
 0x354   : > { %v3068_v53 = vrot.slane %v3049_v5, 4 }
 0x355   : > { %v3097_v27 = vsel %vm2437_vm12, %v3081_v60, %v3096_v9  ;;  %v8402_v6 = vsel %vm2701_vm1, %v2957_v47, 0.0  ;;  %v3094_v40 = vrot.slane %v3081_v60, 4  ;;  %v3052_v9 = vrot.slane %v3031_v1, 4 }
 0x356   : > { %v8378_v7 = vperm.slane %v3097_v27, %v7785_v50  ;;  %9610 = vst [vmem:[#allocation49_spill] sm:$0xff] %v8402_v6  ;;  %v3032_v63 = vrot.slane %v8402_v6, 4  ;;  %v3118_v41 = vrot.slane %v3113_v21, 4 }
 0x357   : > { %3579 = vperm.xlu2 %5334, %v3574_v44   ;;  %v3095_v26 = vsel %vm2437_vm12, %v3094_v40, %v8359_v23 }
 0x358   : > { %v3123_v22 = vsel %vm2437_vm12, %v3122_v0, %v8378_v7  ;;  %3237 = vperm.xlu1 %5335, %v9609_v57   ;;  %v3033_v52 = vsel %vm2437_vm12, %v3032_v63, %v8062_v2  ;;  %v3045_v0 = vperm.slane %v3039_v39, %v7785_v50  ;;  %v3124_v28 = vrot.slane %v8378_v7, 4 }
 0x359   : > { %3138 = vrot.lane.b32.xlu0 %v3123_v22, %s5957_s11  ;;  %v3037_v37 = vperm.slane %v3033_v52, %v7771_v33  ;;  %v9355_v33 = vperm.slane %v8152_v62, 2  ;;  %v3187_v7 = vperm.slane %v8038_v17, 0  ;;  %v3239_v52 = vperm.slane %v8225_v35, 0 }
 0x35a   : > { %v3064_v24 = vrot.slane %v3045_v0, 4  ;;  %v8458_v39 = vsel %vm2437_vm12, %v8372_v30, %v3124_v28  ;;  %v9353_v30 = vperm.slane %v8038_v17, 3  ;;  %v3600_v28 = vperm.slane %v8270_v38, 1 }
 0x35b   : > { %v3053_v27 = vsel %vm2437_vm12, %v3037_v37, %v3052_v9  ;;  %v3050_v34 = vrot.slane %v3037_v37, 4  ;;  %v9351_v9 = vperm.slane %v8291_v61, 3 }
 0x35c   : > { %v3061_v22 = vperm.slane %v3053_v27, %v7785_v50 }
 0x35d   : > { %v3051_v60 = vsel %vm2437_vm12, %v3050_v34, %v3031_v1 }
 0x35e   : > { %v8432_v57 = vsel %vm2437_vm12, %v3061_v22, %v3068_v53  ;;  %v3057_v59 = vperm.slane %v3051_v60, %v7785_v50  ;;  %v3066_v4 = vrot.slane %v3061_v22, 4 }
 0x35f   : > { %3631 = vperm.xlu2 %5334, %v3626_v18  }
 0x360   : > { %3637 = vperm.xlu1 %5335, %v3626_v18   ;;  %v3101_v18 = vperm.slane %v3095_v26, %v7785_v50  ;;  %v8442_v23 = vsel %vm2437_vm12, %v3057_v59, %v3064_v24  ;;  %v8445_v16 = vsel %vm2437_vm12, %v3066_v4, %v3049_v5  ;;  %v3062_v47 = vrot.slane %v3057_v59, 4 }
 0x361   : > { %3683 = vperm.xlu0 %5326, %v9361_v51   ;;  %v9354_v50 = vperm.slane %v8336_v36, 2  ;;  %v9352_v5 = vperm.slane %v8402_v6, 3  ;;  %v3639_v26 = vperm.slane %v8225_v35, 1  ;;  %v3252_v24 = vperm.slane %v8402_v6, 0 }
 0x362   : > { %v8449_v56 = vsel %vm2437_vm12, %v3062_v47, %v3045_v0  ;;  %v3120_v8 = vrot.slane %v3101_v18, 4  ;;  %v8454_v1 = vsel %vm2437_vm12, %v3118_v41, %v3101_v18  ;;  %v3343_v4 = vperm.slane %v8278_v48, 0 }
 0x363   : > { %v3200_v47 = vperm.slane %v8270_v38, 0 }
 0x364   : > { %v3121_v63 = vsel %vm2437_vm12, %v3113_v21, %v3120_v8  ;;  %vm9611_vm12 = vcmask 261120  }
 0x365   : > { %vm9612_vm1 = vmmov %vm9611_vm12 }
 0x366   : > { %vm9614_vm13 = vmmov %vm9612_vm1 }
 0x367   : > { %5337 = vset.pattern.permute.xlu2 %v7929_v45  ;;  %vm9615_vm11 = vmmov %vm9612_vm1 }
 0x368   : > { %5336 = vset.pattern.permute.xlu1 %v7925_v49  ;;  %vm9619_vm14 = vmmov %vm9612_vm1 }
 0x369   : > { %3748 = vperm.xlu0 %5326, %v9357_v31   ;;  %vm9620_vm10 = vmmov %vm9612_vm1 }
 0x36a   : > { %vm9624_vm15 = vmmov %vm9612_vm1 }
 0x36b   : > { %vm9625_vm3 = vmmov %vm9612_vm1 }
 0x36c   : > { %vm9630_vm7 = vmmov %vm9612_vm1 }
 0x36d   : > { %vm9631_vm9 = vmmov %vm9612_vm1 }
 0x36e   : > { %vm9635_vm4 = vmmov %vm9612_vm1 }
 0x36f   : > { %3289 = vperm.xlu2 %5337, %v3278_v42   ;;  %vm9636_vm5 = vmmov %vm9612_vm1 }
 0x370   : > { %3283 = vperm.xlu1 %5336, %v3278_v42   ;;  %v3587_v42 = vperm.slane %v8038_v17, 1  ;;  %v8479_v37 = vpop.permute.xlu1 %3172  ;;  %v8484_v13 = vpop.permute.xlu0 %3166  ;;  %vm9642_vm2 = vmmov %vm9612_vm1 }
 0x371   : > { %4005 = vperm.xlu0 %5326, %v9356_v46   ;;  %v8477_v40 = vpop.permute.xlu2 %3224  ;;  %vm9643_vm0 = vmmov %vm9612_vm1 }
 0x372   : > { %vm9645_vm8 = vmmov %vm9643_vm0 }
 0x373   : > { %vm9646_vm6 = vmmov %vm9643_vm0 }
 0x377   : > { %3341 = vperm.xlu2 %5337, %v3330_v11  }
 0x378   : > { %3335 = vperm.xlu1 %5336, %v3330_v11  }
 0x379   : > { %4070 = vperm.xlu0 %5326, %v9355_v33  }
 0x37f   : > { %5338 = vset.pattern.permute.xlu2 %v7925_v49 }
 0x380   : > { %5339 = vset.pattern.permute.xlu1 %v7929_v45 }
 0x381   : > { %3130 = vrot.lane.b32.xlu0 %v3121_v63, %s5958_s12  ;;  %v8486_v27 = vpop.permute.xlu2 %3566 }
 0x387   : > { %3192 = vperm.xlu2 %5338, %v3187_v7  }
 0x388   : > { %3250 = vperm.xlu1 %5339, %v3239_v52  }
 0x389   : > { %4135 = vperm.xlu0 %5326, %v9354_v50   ;;  %v8492_v34 = vpop.permute.xlu0 %3618  ;;  %v9360_v50 = vperm.slane %v8062_v2, 2  ;;  %v9647_v2 = vld [vmem:[#allocation26_spill] sm:$0xff] }
 0x38a   : > { %v8488_v0 = vpop.permute.xlu1 %3218 }
 0x38f   : > { %3244 = vperm.xlu2 %5338, %v3239_v52  }
 0x390   : > { %5340 = vset.pattern.permute.xlu1 %v7925_v49 }
 0x391   : > { %4392 = vperm.xlu0 %5326, %v9353_v30   ;;  %v8495_v22 = vpop.permute.xlu2 %3276 }
 0x393   : > { %v3232_v60 = vpop.permute.xlu0 %3231 }
 0x397   : > { %5341 = vset.pattern.permute.xlu2 %v7929_v45 }
 0x398   : > { %3592 = vperm.xlu1 %5340, %v3587_v42  }
 0x399   : > { %4457 = vperm.xlu0 %5326, %v9352_v5  }
 0x39a   : > { %v8497_v53 = vpop.permute.xlu1 %3572 }
 0x39f   : > { %3598 = vperm.xlu2 %5341, %v3587_v42  }
 0x3a0   : > { %5343 = vset.pattern.permute.xlu1 %v7929_v45 }
 0x3a1   : > { %4522 = vperm.xlu0 %5326, %v9351_v9   ;;  %v8502_v54 = vpop.permute.xlu2 %3322 }
 0x3a2   : > { %v8505_v59 = vpop.permute.xlu1 %3624  ;;  %v8509_v18 = vpop.permute.xlu0 %3296 }
 0x3a7   : > { %5342 = vset.pattern.permute.xlu2 %v7925_v49 }
 0x3a8   : > { %3302 = vperm.xlu1 %5343, %v3291_v58  }
 0x3a9   : > { %5380 = vset.pattern.permute.xlu0 %v7929_v45  ;;  %v8512_v58 = vpop.permute.xlu2 %3179 }
 0x3af   : > { %3644 = vperm.xlu2 %5342, %v3639_v26  }
 0x3b0   : > { %5344 = vset.pattern.permute.xlu1 %v7925_v49 }
 0x3b1   : > { %3198 = vperm.xlu0 %5380, %v3187_v7   ;;  %v8523_v41 = vpop.permute.xlu2 %3579 }
 0x3b2   : > { %v8514_v11 = vpop.permute.xlu1 %3270 }
 0x3b7   : > { %5345 = vset.pattern.permute.xlu2 %v7929_v45 }
 0x3b8   : > { %3348 = vperm.xlu1 %5344, %v3343_v4  }
 0x3b9   : > { %3263 = vperm.xlu0 %5380, %v3252_v24   ;;  %v3632_v9 = vpop.permute.xlu2 %3631 }
 0x3bc   : > { %v8519_v21 = vpop.permute.xlu0 %3361 }
 0x3bf   : > { %3354 = vperm.xlu2 %5345, %v3343_v4  }
 0x3c0   : > { %3205 = vperm.xlu1 %5344, %v3200_v47  }
 0x3c1   : > { %3328 = vperm.xlu0 %5380, %v3317_v20   ;;  %v3379_v20 = vmul.f32 %v3232_v60, %v6978_v25 }
 0x3c2   : > { %v8521_v8 = vpop.permute.xlu1 %3185 }
 0x3c3   : > { %v3446_v42 = vsel %vm9611_vm12, %v3379_v20, 0.0  ;;  %vm9648_vm12 = vmmov %vm9643_vm0 }
 0x3c7   : > { %3211 = vperm.xlu2 %5345, %v3200_v47   ;;  %v3779_v47 = vmul.f32 %v3632_v9, %v6978_v25  ;;  %v9368_v25 = vperm.slane %v8000_v3, 3 }
 0x3c8   : > { %3605 = vperm.xlu1 %5344, %v3600_v28  }
 0x3c9   : > { %3585 = vperm.xlu0 %5380, %v3574_v44   ;;  %v3846_v20 = vsel %vm9614_vm13, %v3779_v47, 0.0  ;;  %v3290_v9 = vpop.permute.xlu2 %3289  ;;  %vm9654_vm13 = vmmov %vm9643_vm0 }
 0x3ca   : > { %v3238_v7 = vpop.permute.xlu1 %3237  ;;  %v3388_v47 = vmul.f32 %v3290_v9, %v7095_v32  ;;  %v9622_v9 = vld [vmem:[#allocation33_spill] sm:$0xff] }
 0x3cb   : > { %v8528_v63 = vpop.permute.xlu0 %3138  ;;  %v3380_v52 = vmul.f32 %v3238_v7, %v7015_v12  ;;  %v9359_v7 = vperm.slane %v8356_v10, 1 }
 0x3cc   : > { %v3483_v46 = vsel %vm9619_vm14, %v3388_v47, 0.0  ;;  %vm9659_vm14 = vmmov %vm9643_vm0 }
 0x3cd   : > { %v3447_v4 = vsel %vm9612_vm1, %v3380_v52, 0.0  ;;  %vm9649_vm1 = vmmov %vm9643_vm0 }
 0x3ce   : > { %v8534_v5 = vadd.f32 %v3447_v4, %v3446_v42  ;;  %v3304_v42 = vperm.slane %v8356_v10, 0 }
 0x3cf   : > { %5346 = vset.pattern.permute.xlu2 %v7925_v49 }
 0x3d0   : > { %5349 = vset.pattern.permute.xlu1 %v7929_v45 }
 0x3d1   : > { %3650 = vperm.xlu0 %5380, %v3639_v26   ;;  %v3342_v33 = vpop.permute.xlu2 %3341 }
 0x3d2   : > { %v3638_v60 = vpop.permute.xlu1 %3637 }
 0x3d3   : > { %v8537_v44 = vpop.permute.xlu0 %3683  ;;  %v3780_v30 = vmul.f32 %v3638_v60, %v7015_v12  ;;  %v9358_v60 = vperm.slane %v7942_v29, 2 }
 0x3d4   : > { %9613 = vst [vmem:[#allocation50_spill] sm:$0xff] %v8537_v44 }
 0x3d5   : > { %v3847_v26 = vsel %vm9615_vm11, %v3780_v30, 0.0  ;;  %vm9655_vm11 = vmmov %vm9643_vm0 }
 0x3d6   : > { %v8547_v52 = vadd.f32 %v3847_v26, %v3846_v20  ;;  %v9618_v20 = vld [vmem:[#allocation29_spill] sm:$0xff] }
 0x3d7   : > { %3257 = vperm.xlu2 %5346, %v3252_v24  }
 0x3d8   : > { %3315 = vperm.xlu1 %5349, %v3304_v42  }
 0x3d9   : > { %3715 = vperm.xlu0 %5380, %v9359_v7  }
 0x3db   : > { %v8550_v4 = vpop.permute.xlu0 %3748 }
 0x3dc   : > { %9616 = vst [vmem:[#allocation51_spill] sm:$0xff] %v8550_v4 }
 0x3df   : > { %5347 = vset.pattern.permute.xlu2 %v7929_v45 }
 0x3e0   : > { %3367 = vperm.xlu1 %5349, %v3356_v19  }
 0x3e1   : > { %3972 = vperm.xlu0 %5380, %v9358_v60   ;;  %v3193_v51 = vpop.permute.xlu2 %3192 }
 0x3e2   : > { %v3284_v24 = vpop.permute.xlu1 %3283 }
 0x3e3   : > { %v8556_v30 = vpop.permute.xlu0 %4005  ;;  %v3387_v26 = vmul.f32 %v3284_v24, %v9618_v20  ;;  %v3396_v24 = vmul.f32 %v3342_v33, %v9622_v9  ;;  %v9661_v20 = vld [vmem:[#allocation32_spill] sm:$0xff] }
 0x3e4   : > { %9617 = vst [vmem:[#allocation52_spill] sm:$0xff] %v8556_v30 }
 0x3e5   : > { %v3482_v31 = vsel %vm9620_vm10, %v3387_v26, 0.0  ;;  %v9623_v26 = vld [vmem:[#allocation28_spill] sm:$0xff]  ;;  %vm9660_vm10 = vmmov %vm9643_vm0 }
 0x3e6   : > { %v8570_v60 = vadd.f32 %v3483_v46, %v3482_v31  ;;  %v3519_v31 = vsel %vm9624_vm15, %v3396_v24, 0.0  ;;  %vm9664_vm15 = vmmov %vm9643_vm0 }
 0x3e7   : > { %3611 = vperm.xlu2 %5347, %v3600_v28  }
 0x3e8   : > { %3144 = vrot.lane.b32.xlu1 %v8432_v57, %s5959_s14  ;;  %v9367_v57 = vperm.slane %v8329_v15, 2 }
 0x3e9   : > { %4037 = vperm.xlu0 %5380, %v9360_v50   ;;  %5350 = vset.pattern.permute.xlu1 %v7925_v49  ;;  %v9362_v50 = vperm.slane %v8186_v14, 2  ;;  %v3245_v24 = vpop.permute.xlu2 %3244 }
 0x3ea   : > { %v3336_v47 = vpop.permute.xlu1 %3335 }
 0x3eb   : > { %v8572_v19 = vpop.permute.xlu0 %4070  ;;  %v3395_v7 = vmul.f32 %v3336_v47, %v9623_v26  ;;  %v9627_v47 = vld [vmem:[#allocation36_spill] sm:$0xff] }
 0x3ec   : > { %9621 = vst [vmem:[#allocation53_spill] sm:$0xff] %v8572_v19  ;;  %v9629_v19 = vld [vmem:[#allocation13_spill] sm:$0xff] }
 0x3ed   : > { %v3518_v46 = vsel %vm9625_vm3, %v3395_v7, 0.0  ;;  %v3652_v7 = vperm.slane %v8402_v6, 1  ;;  %vm9668_vm3 = vmmov %vm9643_vm0 }
 0x3ee   : > { %v8584_v28 = vadd.f32 %v3519_v31, %v3518_v46  ;;  %v3381_v31 = vmul.f32 %v3245_v24, %v9627_v47  ;;  %v9369_v24 = vperm.slane %v8366_v55, 3 }
 0x3ef   : > { %5348 = vset.pattern.permute.xlu2 %v7925_v49 }
 0x3f0   : > { %9626 = vst [vmem:[#allocation54_spill] sm:$0xff] %v8584_v28  ;;  %3128 = vrot.lane.b32.xlu1 %v8442_v23, %s5958_s12  ;;  %v3455_v23 = vsel %vm9630_vm7, %v3381_v31, 0.0  ;;  %vm9669_vm7 = vmmov %vm9643_vm0 }
 0x3f1   : > { %4102 = vperm.xlu0 %5380, %v9362_v50  }
 0x3f3   : > { %v8587_v33 = vpop.permute.xlu0 %3130 }
 0x3f7   : > { %3309 = vperm.xlu2 %5348, %v3304_v42   ;;  %v3665_v42 = vperm.slane %v8152_v62, 1  ;;  %v9641_v62 = vld [vmem:[#allocation21_spill] sm:$0xff] }
 0x3f8   : > { %3657 = vperm.xlu1 %5350, %v3652_v7  }
 0x3f9   : > { %4167 = vperm.xlu0 %5380, %v9367_v57  }
 0x3fa   : > { %v3251_v50 = vpop.permute.xlu1 %3250 }
 0x3fb   : > { %v8596_v46 = vpop.permute.xlu0 %4135  ;;  %v3382_v12 = vmul.f32 %v3251_v50, %v9629_v19 }
 0x3fc   : > { %9628 = vst [vmem:[#allocation55_spill] sm:$0xff] %v8596_v46  ;;  %v9372_v46 = vperm.slane %v8278_v48, 3 }
 0x3fd   : > { %v3456_v30 = vsel %vm9631_vm9, %v3382_v12, 0.0  ;;  %v3599_v12 = vpop.permute.xlu2 %3598  ;;  %vm9670_vm9 = vmmov %vm9643_vm0 }
 0x3fe   : > { %v8604_v57 = vadd.f32 %v3456_v30, %v3455_v23  ;;  %v9633_v30 = vld [vmem:[#allocation38_spill] sm:$0xff] }
 0x3ff   : > { %3136 = vrot.lane.b32.xlu2 %v8445_v16, %s5957_s11  ;;  %v3774_v31 = vmul.f32 %v3599_v12, %v9633_v30  ;;  %v9634_v16 = vld [vmem:[#allocation37_spill] sm:$0xff]  ;;  %v3691_v12 = vperm.slane %v8186_v14, 1 }
 0x400   : > { %3670 = vperm.xlu1 %5350, %v3665_v42   ;;  %5351 = vset.pattern.permute.xlu2 %v7929_v45 }
 0x401   : > { %4424 = vperm.xlu0 %5380, %v9368_v25  }
 0x403   : > { %v8610_v50 = vpop.permute.xlu0 %4392 }
 0x404   : > { %9632 = vst [vmem:[#allocation56_spill] sm:$0xff] %v8610_v50  ;;  %v3820_v50 = vsel %vm9635_vm4, %v3774_v31, 0.0  ;;  %vm9671_vm4 = vmmov %vm9643_vm0 }
 0x407   : > { %3146 = vrot.lane.b32.xlu2 %v8458_v39, %s5959_s14  ;;  %v9638_v39 = vperm.slane %v8366_v55, 1  ;;  %v9644_v55 = vld [vmem:[#allocation22_spill] sm:$0xff] }
 0x408   : > { %5352 = vset.pattern.permute.xlu1 %v7929_v45 }
 0x409   : > { %4489 = vperm.xlu0 %5380, %v9369_v24  }
 0x40a   : > { %v3593_v23 = vpop.permute.xlu1 %3592 }
 0x40b   : > { %v3773_v25 = vmul.f32 %v3593_v23, %v9634_v16  ;;  %v8623_v26 = vpop.permute.xlu0 %4457  ;;  %v8632_v23 = vpop.permute.xlu2 %3644 }
 0x40c   : > { %9637 = vst [vmem:[#allocation57_spill] sm:$0xff] %v8623_v26 }
 0x40d   : > { %v3819_v4 = vsel %vm9636_vm5, %v3773_v25, 0.0  ;;  %v9640_v25 = vld [vmem:[#allocation34_spill] sm:$0xff]  ;;  %vm9672_vm5 = vmmov %vm9643_vm0 }
 0x40e   : > { %v8627_v24 = vadd.f32 %v3820_v50, %v3819_v4  ;;  %v3389_v31 = vmul.f32 %v8509_v18, %v9640_v25  ;;  %v3373_v50 = vmul.f32 %v3193_v51, %v9634_v16  ;;  %v3385_v18 = vmul.f32 %v8514_v11, %v9644_v55  ;;  %v9650_v11 = vld [vmem:[#allocation14_spill] sm:$0xff]  ;;  %v9653_v25 = vld [vmem:[#allocation23_spill] sm:$0xff] }
 0x40f   : > { %3663 = vperm.xlu2 %5351, %v3652_v7  }
 0x410   : > { %3689 = vperm.xlu1 %5352, %v9638_v39   ;;  %v3491_v4 = vsel %vm9642_vm2, %v3389_v31, 0.0  ;;  %vm9674_vm2 = vmmov %vm9643_vm0 }
 0x411   : > { %4554 = vperm.xlu0 %5380, %v9372_v46  }
 0x413   : > { %v8634_v9 = vpop.permute.xlu0 %4522 }
 0x414   : > { %9639 = vst [vmem:[#allocation58_spill] sm:$0xff] %v8634_v9 }
 0x417   : > { %3676 = vperm.xlu2 %5351, %v3665_v42  }
 0x418   : > { %3702 = vperm.xlu1 %5352, %v3691_v12  }
 0x419   : > { %v3355_v14 = vpop.permute.xlu2 %3354 }
 0x41a   : > { %v3303_v26 = vpop.permute.xlu1 %3302 }
 0x41b   : > { %v3390_v46 = vmul.f32 %v3303_v26, %v9641_v62  ;;  %v3419_v26 = vsel %vm9645_vm8, %v3373_v50, 0.0  ;;  %v3398_v50 = vmul.f32 %v3355_v14, %v9650_v11  ;;  %v9652_v62 = vld [vmem:[#allocation16_spill] sm:$0xff]  ;;  %v9394_v14 = vperm.slane %v8336_v36, 1  ;;  %v9657_v11 = vld [vmem:[#allocation43_spill] sm:$0xff]  ;;  %vm9677_vm8 = vmmov %vm9643_vm0 }
 0x41d   : > { %v3492_v7 = vsel %vm9643_vm0, %v3390_v46, 0.0  ;;  %v3386_v46 = vmul.f32 %v8495_v22, %v9647_v2  ;;  %v3485_v22 = vrot.slane %v8570_v60, 4 }
 0x41e   : > { %v3493_v39 = vadd.f32 %v3492_v7, %v3491_v4  ;;  %v3473_v4 = vsel %vm9648_vm12, %v3385_v18, 0.0  ;;  %v9385_v7 = vperm.slane %v8291_v61, 1  ;;  %v3369_v18 = vmul.f32 %v8484_v13, %v9652_v62  ;;  %vm9679_vm12 = vmmov %vm9643_vm0 }
 0x41f   : > { %5353 = vset.pattern.permute.xlu2 %v7925_v49  ;;  %v3474_v16 = vsel %vm9649_vm1, %v3386_v46, 0.0  ;;  %v3370_v46 = vmul.f32 %v8479_v37, %v9653_v25  ;;  %vm9680_vm1 = vmmov %vm9643_vm0 }
 0x420   : > { %5354 = vset.pattern.permute.xlu1 %v7925_v49  ;;  %v3494_v35 = vrot.slane %v3493_v39, 4  ;;  %v3401_v37 = vsel %vm9659_vm14, %v3369_v18, 0.0  ;;  %v9665_v18 = vld [vmem:[#allocation19_spill] sm:$0xff]  ;;  %vm4777_vm14 = vcmask 1041409  }
 0x421   : > { %v3402_v44 = vsel %vm9660_vm10, %v3370_v46, 0.0  ;;  %vm9684_vm10 = vmmov %vm9643_vm0 }
 0x422   : > { %v3403_v46 = vadd.f32 %v3402_v44, %v3401_v37 }
 0x423   : > { %v3199_v42 = vpop.permute.xlu0 %3198 }
 0x424   : > { %v3374_v9 = vmul.f32 %v3199_v42, %v9633_v30  ;;  %v3475_v30 = vadd.f32 %v3474_v16, %v3473_v4  ;;  %v3528_v16 = vsel %vm9654_vm13, %v3398_v50, 0.0  ;;  %vm9681_vm13 = vmmov %vm9643_vm0 }
 0x426   : > { %v3420_v31 = vsel %vm9646_vm6, %v3374_v9, 0.0  ;;  %v3212_v9 = vpop.permute.xlu2 %3211  ;;  %vm9678_vm6 = vmmov %vm9643_vm0 }
 0x427   : > { %v8651_v51 = vadd.f32 %v3420_v31, %v3419_v26  ;;  %3696 = vperm.xlu2 %5353, %v3691_v12   ;;  %v9651_v26 = vld [vmem:[#allocation12_spill] sm:$0xff]  ;;  %v3476_v12 = vrot.slane %v3475_v30, 4 }
 0x428   : > { %3722 = vperm.xlu1 %5354, %v9385_v7  }
 0x429   : > { %v3477_v50 = vadd.f32 %v3476_v12, %v3475_v30  ;;  %v9666_v12 = vld [vmem:[#allocation17_spill] sm:$0xff] }
 0x42a   : > { %v3349_v6 = vpop.permute.xlu1 %3348 }
 0x42b   : > { %v3264_v42 = vpop.permute.xlu0 %3263  ;;  %v3397_v31 = vmul.f32 %v3349_v6, %v9651_v26  ;;  %v3486_v6 = vadd.f32 %v3485_v22, %v8570_v60  ;;  %v9658_v26 = vperm.slane %v8356_v10, 1  ;;  %v9663_v22 = vld [vmem:[#allocation27_spill] sm:$0xff] }
 0x42c   : > { %v3384_v32 = vmul.f32 %v3264_v42, %v9657_v11  ;;  %v9662_v42 = vld [vmem:[#allocation42_spill] sm:$0xff] }
 0x42d   : > { %v3527_v4 = vsel %vm9655_vm11, %v3397_v31, 0.0  ;;  %v3372_v31 = vmul.f32 %v8521_v8, %v9661_v20  ;;  %v3487_v30 = vrot.slane %v3486_v6, 2  ;;  %v9667_v8 = vld [vmem:[#allocation18_spill] sm:$0xff]  ;;  %vm9682_vm11 = vmmov %vm9643_vm0 }
 0x42e   : > { %v8667_v7 = vadd.f32 %v3528_v16, %v3527_v4  ;;  %v3495_v16 = vadd.f32 %v3494_v35, %v3493_v39  ;;  %v3376_v4 = vmul.f32 %v3212_v9, %v9662_v42  ;;  %v3465_v3 = vsel %vm9664_vm15, %v3384_v32, 0.0 }
 0x42f   : > { %3709 = vperm.xlu2 %5353, %v9658_v26   ;;  %v3371_v26 = vmul.f32 %v8512_v58, %v9663_v22  ;;  %v3377_v38 = vmul.f32 %v8488_v0, %v9667_v8  ;;  %v3411_v35 = vsel %vm9668_vm3, %v3372_v31, 0.0  ;;  %v3488_v0 = vadd.f32 %v3487_v30, %v3486_v6  ;;  %vm9685_vm3 = vmmov %vm9643_vm0 }
 0x430   : > { %9656 = vst [vmem:[#allocation16_spill] sm:$0xff] %v8667_v7  ;;  %3735 = vperm.xlu1 %5354, %v9394_v14   ;;  %v3478_v14 = vrot.slane %v3477_v50, 2  ;;  %v3496_v9 = vrot.slane %v3495_v16, 2  ;;  %v3429_v58 = vsel %vm9670_vm9, %v3376_v4, 0.0  ;;  %v3422_v6 = vrot.slane %v8651_v51, 4  ;;  %vm9689_vm9 = vmmov %vm9643_vm0 }
 0x431   : > { %v3258_v60 = vpop.permute.xlu2 %3257  ;;  %v3410_v44 = vsel %vm9672_vm5, %v3371_v26, 0.0  ;;  %v3437_v4 = vsel %vm9674_vm2, %v3377_v38, 0.0  ;;  %v3489_v26 = vrot.slane %v3488_v0, 1  ;;  %v3770_v38 = vmul.f32 %v8497_v53, %v9653_v25  ;;  %vm9693_vm5 = vmmov %vm9643_vm0 }
 0x432   : > { %v3206_v10 = vpop.permute.xlu1 %3205  ;;  %v3383_v55 = vmul.f32 %v3258_v60, %v9665_v18  ;;  %v9673_v60 = vld [vmem:[#allocation25_spill] sm:$0xff]  ;;  %v3412_v18 = vadd.f32 %v3411_v35, %v3410_v44  ;;  %v3479_v7 = vadd.f32 %v3478_v14, %v3477_v50  ;;  %v3769_v14 = vmul.f32 %v8486_v27, %v9652_v62  ;;  %vm9694_vm2 = vmmov %vm9643_vm0 }
 0x433   : > { %v8674_v13 = vpop.permute.xlu0 %3328  ;;  %v3375_v2 = vmul.f32 %v3206_v10, %v9666_v12  ;;  %v3378_v10 = vmul.f32 %v8477_v40, %v9673_v60  ;;  %v3781_v50 = vmul.f32 %v8632_v23, %v9627_v47  ;;  %v3490_v35 = vadd.f32 %v3489_v26, %v3488_v0 }
 0x434   : > { %v3464_v39 = vsel %vm9669_vm7, %v3383_v55, 0.0  ;;  %v3404_v55 = vrot.slane %v3403_v46, 4  ;;  %v3423_v47 = vadd.f32 %v3422_v6, %v8651_v51  ;;  %v3802_v26 = vsel %vm9680_vm1, %v3770_v38, 0.0  ;;  %vm9686_vm7 = vmmov %vm9643_vm0 }
 0x435   : > { %v3428_v11 = vsel %vm9671_vm4, %v3375_v2, 0.0  ;;  %v8694_v32 = vadd.f32 %v3465_v3, %v3464_v39  ;;  %v3497_v2 = vadd.f32 %v3496_v9, %v3495_v16  ;;  %v3438_v3 = vsel %vm9643_vm0, %v3378_v10, 0.0  ;;  %vm9691_vm4 = vmmov %vm9643_vm0 }
 0x436   : > { %v3430_v37 = vadd.f32 %v3429_v58, %v3428_v11  ;;  %v3413_v39 = vrot.slane %v3412_v18, 4  ;;  %v3439_v11 = vadd.f32 %v3438_v3, %v3437_v4  ;;  %v3480_v58 = vrot.slane %v3479_v7, 1 }
 0x437   : > { %5355 = vset.pattern.permute.xlu2 %v7929_v45  ;;  %v3405_v28 = vadd.f32 %v3404_v55, %v3403_v46  ;;  %v3498_v40 = vrot.slane %v3497_v2, 1  ;;  %v9675_v9 = vperm.slane %v8291_v61, 1  ;;  %v9676_v4 = vperm.slane %v8278_v48, 1 }
 0x438   : > { %5356 = vset.pattern.permute.xlu1 %v7929_v45  ;;  %v3414_v16 = vadd.f32 %v3413_v39, %v3412_v18  ;;  %v3440_v46 = vrot.slane %v3439_v11, 4  ;;  %v3481_v10 = vadd.f32 %v3480_v58, %v3479_v7  ;;  %v3801_v18 = vsel %vm9677_vm8, %v3769_v14, 0.0 }
 0x439   : > { %v3406_v3 = vrot.slane %v3405_v28, 2  ;;  %v3499_v23 = vadd.f32 %v3498_v40, %v3497_v2  ;;  %v3855_v0 = vsel %vm9678_vm6, %v3781_v50, 0.0  ;;  %5706 = vtanh.f32 %v3490_v35 }
 0x43a   : > { %v3606_v30 = vpop.permute.xlu1 %3605  ;;  %v3415_v58 = vrot.slane %v3414_v16, 2  ;;  %5708 = vtanh.f32 %v3481_v10  ;;  %v3424_v40 = vrot.slane %v3423_v47, 2  ;;  %v3431_v6 = vrot.slane %v3430_v37, 4 }
 0x43b   : > { %v3586_v31 = vpop.permute.xlu0 %3585  ;;  %v3775_v55 = vmul.f32 %v3606_v30, %v9666_v12  ;;  %5710 = vtanh.f32 %v3499_v23  ;;  %v3407_v50 = vadd.f32 %v3406_v3, %v3405_v28  ;;  %v9683_v35 = vperm.slane %v8336_v36, 1 }
 0x43c   : > { %v3416_v38 = vadd.f32 %v3415_v58, %v3414_v16  ;;  %v3425_v10 = vadd.f32 %v3424_v40, %v3423_v47  ;;  %v3772_v23 = vmul.f32 %v3586_v31, %v9661_v20  ;;  %v3778_v16 = vmul.f32 %v8505_v59, %v9673_v60 }
 0x43d   : > { %v3828_v2 = vsel %vm9681_vm13, %v3775_v55, 0.0  ;;  %v3432_v55 = vadd.f32 %v3431_v6, %v3430_v37  ;;  %v3467_v47 = vrot.slane %v8694_v32, 4  ;;  %v3777_v37 = vmul.f32 %v8492_v34, %v9667_v8  ;;  %vm9702_vm13 = vmmov %vm9643_vm0 }
 0x43e   : > { %v3417_v58 = vrot.slane %v3416_v38, 1  ;;  %v3426_v59 = vrot.slane %v3425_v10, 1  ;;  %v3811_v6 = vsel %vm9684_vm10, %v3772_v23, 0.0  ;;  %vm4779_vm15 = vcmask 1042434   ;;  %vm9704_vm10 = vmmov %vm9643_vm0 }
 0x43f   : > { %3728 = vperm.xlu2 %5355, %v9675_v9   ;;  %v3441_v9 = vadd.f32 %v3440_v46, %v3439_v11  ;;  %v3449_v11 = vrot.slane %v8534_v5, 4  ;;  %v5707_v46 = vpop.eup %5706  ;;  %v3433_v40 = vrot.slane %v3432_v55, 2  ;;  %vm3150_vm8 = vcmask 130048  }
 0x440   : > { %3754 = vperm.xlu1 %5356, %v9676_v4   ;;  %v9398_v4 = vperm.slane %v8329_v15, 1  ;;  %v5709_v3 = vpop.eup %5708  ;;  %vm3155_vm6 = vcmask 392192   ;;  %vm3158_vm1 = vcmask 523264  }
 0x441   : > { %v3612_v53 = vpop.permute.xlu2 %3611 }
 0x442   : > { %v3776_v39 = vmul.f32 %v3612_v53, %v9662_v42  ;;  %v3408_v53 = vrot.slane %v3407_v50, 1 }
 0x443   : > { %v3651_v44 = vpop.permute.xlu0 %3650 }
 0x444   : > { %v3782_v27 = vmul.f32 %v3651_v44, %v9629_v19  ;;  %v3829_v51 = vsel %vm9682_vm11, %v3776_v39, 0.0  ;;  %v3803_v44 = vadd.f32 %v3802_v26, %v3801_v18  ;;  %v3771_v26 = vmul.f32 %v8523_v41, %v9663_v22  ;;  %vm9703_vm11 = vmmov %vm9643_vm0 }
 0x445   : > { %v8726_v14 = vadd.f32 %v3829_v51, %v3828_v2  ;;  %v3450_v2 = vadd.f32 %v3449_v11, %v8534_v5  ;;  %v4791_v51 = vsel %vm4777_vm14, %v5707_v46, %v5709_v3  ;;  %v3838_v41 = vsel %vm9685_vm3, %v3778_v16, 0.0  ;;  %v9688_v3 = vld [vmem:[#allocation40_spill] sm:$0xff] }
 0x446   : > { %v3856_v7 = vsel %vm9679_vm12, %v3782_v27, 0.0  ;;  %v3442_v27 = vrot.slane %v3441_v9, 2  ;;  %v3804_v18 = vrot.slane %v3803_v44, 4  ;;  %v3810_v34 = vsel %vm9686_vm7, %v3771_v26, 0.0  ;;  %vm9700_vm12 = vmmov %vm9643_vm0 }
 0x447   : > { %v8722_v30 = vadd.f32 %v3856_v7, %v3855_v0  ;;  %3741 = vperm.xlu2 %5355, %v9683_v35   ;;  %v3458_v0 = vrot.slane %v8604_v57, 4  ;;  %v5711_v7 = vpop.eup %5710  ;;  %v3468_v11 = vadd.f32 %v3467_v47, %v8694_v32  ;;  %v3409_v46 = vadd.f32 %v3408_v53, %v3407_v50  ;;  %v9690_v32 = vld [vmem:[#allocation39_spill] sm:$0xff] }
 0x448   : > { %3767 = vperm.xlu1 %5356, %v9398_v4   ;;  %v3443_v31 = vadd.f32 %v3442_v27, %v3441_v9  ;;  %v3805_v35 = vadd.f32 %v3804_v18, %v3803_v44  ;;  %v8750_v4 = vsel %vm4779_vm15, %v5711_v7, %v4791_v51  ;;  %v3418_v9 = vadd.f32 %v3417_v58, %v3416_v38  ;;  %v9687_v27 = vld [vmem:[#allocation41_spill] sm:$0xff] }
 0x449   : > { %v3459_v28 = vadd.f32 %v3458_v0, %v8604_v57  ;;  %v3399_v5 = vmul.f32 %v8519_v21, %v9687_v27  ;;  %v3451_v23 = vrot.slane %v3450_v2, 2  ;;  %v3812_v44 = vadd.f32 %v3811_v6, %v3810_v34  ;;  %v9692_v6 = vld [vmem:[#allocation44_spill] sm:$0xff] }
 0x44a   : > { %v3316_v39 = vpop.permute.xlu1 %3315  ;;  %v3837_v57 = vsel %vm9689_vm9, %v3777_v37, 0.0  ;;  %v3444_v16 = vrot.slane %v3443_v31, 1  ;;  %v3427_v0 = vadd.f32 %v3426_v59, %v3425_v10  ;;  %v3434_v7 = vadd.f32 %v3433_v40, %v3432_v55 }
 0x44b   : > { %v3392_v18 = vmul.f32 %v3316_v39, %v9688_v3  ;;  %v3806_v26 = vrot.slane %v3805_v35, 2  ;;  %v3839_v58 = vadd.f32 %v3838_v41, %v3837_v57  ;;  %v3460_v21 = vrot.slane %v3459_v28, 2 }
 0x44c   : > { %5712 = vtanh.f32 %v3418_v9  ;;  %v3536_v50 = vsel %vm9691_vm4, %v3399_v5, 0.0  ;;  %v3469_v53 = vrot.slane %v3468_v11, 2  ;;  %v3452_v34 = vadd.f32 %v3451_v23, %v3450_v2 }
 0x44d   : > { %v3813_v19 = vrot.slane %v3812_v44, 4  ;;  %v3501_v37 = vsel %vm9693_vm5, %v3392_v18, 0.0  ;;  %5714 = vtanh.f32 %v3427_v0  ;;  %v3435_v55 = vrot.slane %v3434_v7, 1 }
 0x44e   : > { %5716 = vtanh.f32 %v3409_v46  ;;  %v3445_v41 = vadd.f32 %v3444_v16, %v3443_v31  ;;  %v3461_v9 = vadd.f32 %v3460_v21, %v3459_v28  ;;  %v3840_v5 = vrot.slane %v3839_v58, 4  ;;  %v9697_v16 = vld [vmem:[#allocation20_spill] sm:$0xff] }
 0x44f   : > { %5357 = vset.pattern.permute.xlu2 %v7925_v49  ;;  %v3470_v2 = vadd.f32 %v3469_v53, %v3468_v11  ;;  %v9695_v23 = vperm.slane %v8329_v15, 1  ;;  %v3807_v18 = vadd.f32 %v3806_v26, %v3805_v35  ;;  %v9696_v0 = vperm.slane %v8274_v43, 2 }
 0x450   : > { %5358 = vset.pattern.permute.xlu1 %v7925_v49  ;;  %v3831_v31 = vrot.slane %v8726_v14, 4  ;;  %5718 = vtanh.f32 %v3445_v41  ;;  %v3393_v11 = vmul.f32 %v8502_v54, %v9697_v16  ;;  %v3849_v21 = vrot.slane %v8547_v52, 4 }
 0x451   : > { %v3310_v38 = vpop.permute.xlu2 %3309  ;;  %v3462_v35 = vrot.slane %v3461_v9, 1  ;;  %v3841_v26 = vadd.f32 %v3840_v5, %v3839_v58  ;;  %vm4781_vm3 = vcmask 1043459   ;;  %vm4783_vm7 = vcmask 1044484  }
 0x452   : > { %v3368_v51 = vpop.permute.xlu1 %3367  ;;  %v3391_v47 = vmul.f32 %v3310_v38, %v9690_v32  ;;  %v3822_v38 = vrot.slane %v8627_v24, 4  ;;  %v3850_v58 = vadd.f32 %v3849_v21, %v8547_v52  ;;  %vm4785_vm9 = vcmask 1045509  }
 0x453   : > { %v3400_v39 = vmul.f32 %v3368_v51, %v9692_v6  ;;  %v3814_v51 = vadd.f32 %v3813_v19, %v3812_v44  ;;  %v3463_v5 = vadd.f32 %v3462_v35, %v3461_v9  ;;  %v9701_v9 = vperm.slane %v8038_v17, 2 }
 0x454   : > { %v3500_v10 = vsel %vm9694_vm2, %v3391_v47, 0.0  ;;  %v5713_v47 = vpop.eup %5712  ;;  %vm4787_vm4 = vcmask 1046534   ;;  %vm4789_vm5 = vcmask 1047559   ;;  %vm9710_vm2 = vmmov %vm9643_vm0 }
 0x455   : > { %v3537_v59 = vsel %vm9643_vm0, %v3400_v39, 0.0  ;;  %v8766_v40 = vadd.f32 %v3501_v37, %v3500_v10  ;;  %v3453_v39 = vrot.slane %v3452_v34, 1  ;;  %v3436_v37 = vadd.f32 %v3435_v55, %v3434_v7  ;;  %v5715_v44 = vpop.eup %5714  ;;  %v9698_v55 = vld [vmem:[#allocation24_spill] sm:$0xff] }
 0x456   : > { %v8768_v57 = vadd.f32 %v3537_v59, %v3536_v50  ;;  %v3823_v50 = vadd.f32 %v3822_v38, %v8627_v24  ;;  %v3471_v7 = vrot.slane %v3470_v2, 1  ;;  %v5717_v53 = vpop.eup %5716  ;;  %v3808_v10 = vrot.slane %v3807_v18, 1 }
 0x457   : > { %3761 = vperm.xlu2 %5357, %v9695_v23   ;;  %v3394_v59 = vmul.f32 %v8674_v13, %v9698_v55  ;;  %v3815_v41 = vrot.slane %v3814_v51, 2  ;;  %v3858_v23 = vrot.slane %v8722_v30, 4  ;;  %v3454_v54 = vadd.f32 %v3453_v39, %v3452_v34 }
 0x458   : > { %3979 = vperm.xlu1 %5358, %v9696_v0   ;;  %5720 = vtanh.f32 %v3436_v37  ;;  %v3832_v0 = vadd.f32 %v3831_v31, %v8726_v14  ;;  %v4778_v46 = vsel %vm4777_vm14, %v5713_v47, %v5717_v53  ;;  %v3152_v24 = vsel %vm3150_vm8, %v8454_v1, %v8587_v33  ;;  %v5719_v14 = vpop.eup %5718 }
 0x459   : > { %v3137_v28 = vpop.permute.xlu2 %3136  ;;  %v4780_v38 = vsel %vm4779_vm15, %v5715_v44, %v4778_v46  ;;  %v3842_v13 = vrot.slane %v3841_v26, 2  ;;  %v3824_v15 = vrot.slane %v3823_v50, 2  ;;  %v3472_v8 = vadd.f32 %v3471_v7, %v3470_v2 }
 0x45a   : > { %v3145_v19 = vpop.permute.xlu1 %3144  ;;  %v9699_v34 = vperm.slane %v7942_v29, 2  ;;  %v3510_v39 = vsel %vm9700_vm12, %v3394_v59, 0.0  ;;  %v3816_v47 = vadd.f32 %v3815_v41, %v3814_v51  ;;  %v3859_v52 = vadd.f32 %v3858_v23, %v8722_v30  ;;  %vm9723_vm12 = vmmov %vm9643_vm0 }
 0x45b   : > { %v3509_v1 = vsel %vm9702_vm13, %v3393_v11, 0.0  ;;  %5722 = vtanh.f32 %v3454_v54  ;;  %v3833_v33 = vrot.slane %v3832_v0, 2  ;;  %v3154_v2 = vsel %vm9703_vm11, %v3152_v24, %v8528_v63  ;;  %vm9724_vm13 = vmmov %vm9643_vm0 }
 0x45c   : > { %v8801_v31 = vadd.f32 %v3808_v10, %v3807_v18  ;;  %v3851_v46 = vrot.slane %v3850_v58, 2  ;;  %5724 = vtanh.f32 %v3463_v5  ;;  %v3825_v35 = vadd.f32 %v3824_v15, %v3823_v50  ;;  %vm9729_vm11 = vmmov %vm9643_vm0 }
 0x45d   : > { %5726 = vtanh.f32 %v3472_v8  ;;  %v3511_v44 = vadd.f32 %v3510_v39, %v3509_v1  ;;  %v3843_v63 = vadd.f32 %v3842_v13, %v3841_v26  ;;  %v3817_v18 = vrot.slane %v3816_v47, 1  ;;  %v9706_v1 = vld [vmem:[#allocation16_spill] sm:$0xff] }
 0x45e   : > { %v5721_v21 = vpop.eup %5720  ;;  %v3860_v7 = vrot.slane %v3859_v52, 2  ;;  %v3834_v10 = vadd.f32 %v3833_v33, %v3832_v0  ;;  %v3503_v15 = vrot.slane %v8766_v40, 4  ;;  %v3852_v50 = vadd.f32 %v3851_v46, %v3850_v58 }
 0x45f   : > { %3966 = vperm.xlu2 %5357, %v9699_v34   ;;  %v4782_v41 = vsel %vm4781_vm3, %v5721_v21, %v4780_v38  ;;  %v3826_v26 = vrot.slane %v3825_v35, 1  ;;  %v3512_v54 = vrot.slane %v3511_v44, 4  ;;  %v3818_v5 = vadd.f32 %v3817_v18, %v3816_v47 }
 0x460   : > { %3992 = vperm.xlu1 %5358, %v9701_v9   ;;  %v3835_v13 = vrot.slane %v3834_v10, 1  ;;  %v3504_v38 = vadd.f32 %v3503_v15, %v8766_v40  ;;  %v3844_v9 = vrot.slane %v3843_v63, 1  ;;  %v3530_v33 = vrot.slane %v9706_v1, 4 }
 0x461   : > { %v3147_v37 = vpop.permute.xlu2 %3146  ;;  %v5723_v23 = vpop.eup %5722  ;;  %v3827_v21 = vadd.f32 %v3826_v26, %v3825_v35  ;;  %5728 = vtanh.f32 %v3818_v5  ;;  %v9711_v35 = vperm.slane %v8274_v43, 2  ;;  %v9712_v26 = vld [vmem:[#allocation45_spill] sm:$0xff] }
 0x462   : > { %v3129_v51 = vpop.permute.xlu1 %3128  ;;  %v3157_v30 = vsel %vm3155_vm6, %v3154_v2, %v3147_v37  ;;  %v5725_v0 = vpop.eup %5724  ;;  %v9707_v2 = vld [vmem:[#allocation43_spill] sm:$0xff]  ;;  %v3853_v37 = vrot.slane %v3852_v50, 1  ;;  %v3505_v15 = vrot.slane %v3504_v38, 2  ;;  %5730 = vtanh.f32 %v8801_v31 }
 0x463   : > { %v3151_v11 = vsel %vm3150_vm8, %v8449_v56, %v3129_v51  ;;  %3160 = vst.msk [vmem:[%s8808_s17 + $0x8] sm:$0xff] %vm3158_vm1, %v3157_v30  ;;  %v9705_v56 = vld [vmem:[#allocation54_spill] sm:$0xff]  ;;  %v5727_v24 = vpop.eup %5726  ;;  %v3539_v51 = vrot.slane %v8768_v57, 4  ;;  %v9709_v30 = vld [vmem:[#allocation19_spill] sm:$0xff]  ;;  %5732 = vtanh.f32 %v3827_v21  ;;  %vm9716_vm8 = vmmov %vm9643_vm0 }
 0x464   : > { %v3153_v53 = vsel %vm9704_vm10, %v3151_v11, %v3137_v28  ;;  %v3521_v59 = vrot.slane %v9705_v56, 4  ;;  %v4784_v28 = vsel %vm4783_vm7, %v5719_v14, %v4782_v41  ;;  %v3513_v11 = vadd.f32 %v3512_v54, %v3511_v44  ;;  %vm9730_vm10 = vmmov %vm9643_vm0 }
 0x465   : > { %v3156_v8 = vsel %vm3155_vm6, %v3153_v53, %v3145_v19  ;;  %v3861_v19 = vadd.f32 %v3860_v7, %v3859_v52  ;;  %v4786_v58 = vsel %vm4785_vm9, %v5723_v23, %v4784_v28  ;;  %v3836_v7 = vadd.f32 %v3835_v13, %v3834_v10  ;;  %vm9717_vm6 = vmmov %vm9643_vm0 }
 0x466   : > { %3159 = vst.msk [vmem:[%s8808_s17] sm:$0xff] %vm3158_vm1, %v3156_v8  ;;  %v4788_v39 = vsel %vm4787_vm4, %v5725_v0, %v4786_v58  ;;  %v3522_v46 = vadd.f32 %v3521_v59, %v9705_v56  ;;  %v3845_v41 = vadd.f32 %v3844_v9, %v3843_v63  ;;  %v3531_v23 = vadd.f32 %v3530_v33, %v9706_v1 }
 0x467   : > { %5359 = vset.pattern.permute.xlu2 %v7929_v45  ;;  %v8828_v52 = vsel %vm4789_vm5, %v5727_v24, %v4788_v39  ;;  %v3862_v53 = vrot.slane %v3861_v19, 1  ;;  %v3854_v56 = vadd.f32 %v3853_v37, %v3852_v50  ;;  %v3540_v59 = vadd.f32 %v3539_v51, %v8768_v57  ;;  %v5729_v58 = vpop.eup %5728  ;;  %v9714_v50 = vld [vmem:[#allocation26_spill] sm:$0xff] }
 0x468   : > { %5360 = vset.pattern.permute.xlu1 %v7929_v45  ;;  %9708 = vst [vmem:[#allocation41_spill] sm:$0xff] %v8828_v52  ;;  %v3514_v44 = vrot.slane %v3513_v11, 2  ;;  %v9713_v10 = vperm.slane %v9712_v26, 2  ;;  %v3523_v54 = vrot.slane %v3522_v46, 2  ;;  %5734 = vtanh.f32 %v3836_v7  ;;  %v5731_v33 = vpop.eup %5730 }
 0x469   : > { %v3664_v34 = vpop.permute.xlu2 %3663  ;;  %v3863_v0 = vadd.f32 %v3862_v53, %v3861_v19  ;;  %v3506_v63 = vadd.f32 %v3505_v15, %v3504_v38  ;;  %5736 = vtanh.f32 %v3845_v41  ;;  %v3532_v24 = vrot.slane %v3531_v23, 2  ;;  %v5733_v38 = vpop.eup %5732 }
 0x46a   : > { %v3658_v14 = vpop.permute.xlu1 %3657  ;;  %v3784_v47 = vmul.f32 %v3664_v34, %v9707_v2  ;;  %5738 = vtanh.f32 %v3854_v56  ;;  %v3541_v57 = vrot.slane %v3540_v59, 2  ;;  %v9715_v34 = vld [vmem:[#allocation22_spill] sm:$0xff]  ;;  %v3515_v9 = vadd.f32 %v3514_v44, %v3513_v11 }
 0x46b   : > { %v3783_v40 = vmul.f32 %v3658_v14, %v9709_v30  ;;  %v3524_v14 = vadd.f32 %v3523_v54, %v3522_v46  ;;  %5740 = vtanh.f32 %v3863_v0  ;;  %v3533_v37 = vadd.f32 %v3532_v24, %v3531_v23 }
 0x46c   : > { %v3865_v18 = vsel %vm9710_vm2, %v3784_v47, 0.0  ;;  %v3507_v47 = vrot.slane %v3506_v63, 1  ;;  %v3542_v53 = vadd.f32 %v3541_v57, %v3540_v59  ;;  %v9719_v11 = vperm.slane %v8038_v17, 2  ;;  %vm9731_vm2 = vmmov %vm9643_vm0 }
 0x46d   : > { %v3864_v8 = vsel %vm9643_vm0, %v3783_v40, 0.0  ;;  %v9718_v40 = vld [vmem:[#allocation15_spill] sm:$0xff]  ;;  %v3525_v23 = vrot.slane %v3524_v14, 1 }
 0x46e   : > { %v3866_v28 = vadd.f32 %v3865_v18, %v3864_v8  ;;  %v4013_v21 = vperm.slane %v9718_v40, 2  ;;  %v4816_v18 = vsel %vm4777_vm14, %v5729_v58, %v5731_v33  ;;  %v5735_v7 = vpop.eup %5734  ;;  %v3516_v8 = vrot.slane %v3515_v9, 1 }
 0x46f   : > { %3985 = vperm.xlu2 %5359, %v9711_v35   ;;  %v4817_v15 = vsel %vm4779_vm15, %v5733_v38, %v4816_v18  ;;  %v5737_v46 = vpop.eup %5736  ;;  %v3508_v35 = vadd.f32 %v3507_v47, %v3506_v63  ;;  %v3543_v59 = vrot.slane %v3542_v53, 1  ;;  %v3526_v58 = vadd.f32 %v3525_v23, %v3524_v14  ;;  %v9720_v63 = vld [vmem:[#allocation29_spill] sm:$0xff]  ;;  %v3716_v18 = vpop.permute.xlu0 %3715 }
 0x470   : > { %4011 = vperm.xlu1 %5360, %v9713_v10   ;;  %v4818_v41 = vsel %vm4781_vm3, %v5735_v7, %v4817_v15  ;;  %v5739_v56 = vpop.eup %5738  ;;  %v3534_v10 = vrot.slane %v3533_v37, 1  ;;  %v3867_v24 = vrot.slane %v3866_v28, 4 }
 0x471   : > { %v3677_v5 = vpop.permute.xlu2 %3676  ;;  %v4819_v44 = vsel %vm4783_vm7, %v5737_v46, %v4818_v41  ;;  %v5741_v0 = vpop.eup %5740  ;;  %5742 = vtanh.f32 %v3508_v35  ;;  %v3544_v57 = vadd.f32 %v3543_v59, %v3542_v53  ;;  %v9725_v46 = vld [vmem:[#allocation9_spill] sm:$0xff]  ;;  %v3792_v35 = vmul.f32 %v3716_v18, %v9688_v3 }
 0x472   : > { %v3671_v31 = vpop.permute.xlu1 %3670  ;;  %v3786_v13 = vmul.f32 %v3677_v5, %v9714_v50  ;;  %v4820_v54 = vsel %vm4785_vm9, %v5739_v56, %v4819_v44  ;;  %v3517_v5 = vadd.f32 %v3516_v8, %v3515_v9  ;;  %v3868_v33 = vadd.f32 %v3867_v24, %v3866_v28 }
 0x473   : > { %v3785_v39 = vmul.f32 %v3671_v31, %v9715_v34  ;;  %v3535_v31 = vadd.f32 %v3534_v10, %v3533_v37  ;;  %v4039_v8 = vperm.slane %v9725_v46, 2 }
 0x474   : > { %v3874_v1 = vsel %vm9716_vm8, %v3786_v13, 0.0  ;;  %v8857_v13 = vsel %vm4787_vm4, %v5741_v0, %v4820_v54  ;;  %5744 = vtanh.f32 %v3517_v5  ;;  %v3869_v7 = vrot.slane %v3868_v33, 2  ;;  %v9726_v0 = vld [vmem:[#allocation34_spill] sm:$0xff]  ;;  %vm9735_vm8 = vmmov %vm9643_vm0 }
 0x475   : > { %v3873_v19 = vsel %vm9717_vm6, %v3785_v39, 0.0  ;;  %v9721_v39 = vld [vmem:[#allocation50_spill] sm:$0xff]  ;;  %5746 = vtanh.f32 %v3526_v58  ;;  %vm9736_vm6 = vmmov %vm9643_vm0 }
 0x476   : > { %v8846_v51 = vadd.f32 %v3874_v1, %v3873_v19  ;;  %v3787_v1 = vmul.f32 %v9721_v39, %v9720_v63  ;;  %5748 = vtanh.f32 %v3535_v31  ;;  %v9722_v19 = vld [vmem:[#allocation35_spill] sm:$0xff]  ;;  %v3870_v54 = vadd.f32 %v3869_v7, %v3868_v33  ;;  %v9728_v31 = vld [vmem:[#allocation21_spill] sm:$0xff]  ;;  %v9733_v7 = vld [vmem:[#allocation10_spill] sm:$0xff] }
 0x477   : > { %3998 = vperm.xlu2 %5359, %v9719_v11   ;;  %v5743_v14 = vpop.eup %5742  ;;  %5750 = vtanh.f32 %v3544_v57  ;;  %v3901_v39 = vsel %vm9729_vm11, %v3792_v35, 0.0  ;;  %vm9748_vm11 = vmmov %vm9643_vm0 }
 0x478   : > { %4024 = vperm.xlu1 %5360, %v4013_v21   ;;  %v3882_v37 = vsel %vm9723_vm12, %v3787_v1, 0.0  ;;  %v4793_v28 = vsel %vm4781_vm3, %v5743_v14, %v8750_v4  ;;  %vm9742_vm12 = vmmov %vm9643_vm0 }
 0x47a   : > { %v5745_v11 = vpop.eup %5744 }
 0x47b   : > { %v5747_v41 = vpop.eup %5746  ;;  %v4794_v56 = vsel %vm4783_vm7, %v5745_v11, %v4793_v28 }
 0x47c   : > { %v5749_v23 = vpop.eup %5748  ;;  %v4795_v44 = vsel %vm4785_vm9, %v5747_v41, %v4794_v56  ;;  %v3876_v41 = vrot.slane %v8846_v51, 4 }
 0x47d   : > { %v5751_v10 = vpop.eup %5750  ;;  %v4796_v58 = vsel %vm4787_vm4, %v5749_v23, %v4795_v44 }
 0x47f   : > { %5361 = vset.pattern.permute.xlu2 %v7925_v49 }
 0x480   : > { %5362 = vset.pattern.permute.xlu1 %v7925_v49 }
 0x481   : > { %v3697_v47 = vpop.permute.xlu2 %3696 }
 0x482   : > { %v3690_v9 = vpop.permute.xlu1 %3689  ;;  %v3789_v59 = vmul.f32 %v3697_v47, %v9726_v0 }
 0x483   : > { %v3788_v38 = vmul.f32 %v3690_v9, %v9722_v19  ;;  %v3871_v9 = vrot.slane %v3870_v54, 1 }
 0x484   : > { %v3891_v33 = vsel %vm9731_vm2, %v3789_v59, 0.0  ;;  %v3877_v59 = vadd.f32 %v3876_v41, %v8846_v51  ;;  %v9740_v41 = vld [vmem:[#allocation33_spill] sm:$0xff]  ;;  %vm9751_vm2 = vmmov %vm9643_vm0 }
 0x485   : > { %v3883_v53 = vsel %vm9724_vm13, %v3788_v38, 0.0  ;;  %v3872_v11 = vadd.f32 %v3871_v9, %v3870_v54  ;;  %v9738_v9 = vld [vmem:[#allocation11_spill] sm:$0xff]  ;;  %vm9743_vm13 = vmmov %vm9643_vm0 }
 0x486   : > { %v3884_v15 = vadd.f32 %v3883_v53, %v3882_v37  ;;  %v9732_v37 = vld [vmem:[#allocation49_spill] sm:$0xff]  ;;  %v9734_v53 = vperm.slane %v9733_v7, 2 }
 0x487   : > { %4018 = vperm.xlu2 %5361, %v4013_v21   ;;  %v8876_v21 = vsel %vm4789_vm5, %v5751_v10, %v4796_v58  ;;  %v4052_v18 = vperm.slane %v9732_v37, 2  ;;  %5752 = vtanh.f32 %v3872_v11 }
 0x488   : > { %4044 = vperm.xlu1 %5362, %v4039_v8   ;;  %9727 = vst [vmem:[#allocation40_spill] sm:$0xff] %v8876_v21  ;;  %v3885_v28 = vrot.slane %v3884_v15, 4  ;;  %v9744_v21 = vld [vmem:[#allocation48_spill] sm:$0xff] }
 0x489   : > { %v3710_v5 = vpop.permute.xlu2 %3709 }
 0x48a   : > { %v3703_v24 = vpop.permute.xlu1 %3702  ;;  %v3791_v4 = vmul.f32 %v3710_v5, %v9690_v32  ;;  %v3886_v56 = vadd.f32 %v3885_v28, %v3884_v15 }
 0x48b   : > { %v3790_v57 = vmul.f32 %v3703_v24, %v9728_v31 }
 0x48c   : > { %v3900_v1 = vsel %vm9730_vm10, %v3791_v4, 0.0  ;;  %v3887_v58 = vrot.slane %v3886_v56, 2  ;;  %vm9749_vm10 = vmmov %vm9643_vm0 }
 0x48d   : > { %v3892_v47 = vsel %vm9643_vm0, %v3790_v57, 0.0  ;;  %v3902_v14 = vadd.f32 %v3901_v39, %v3900_v1  ;;  %v5753_v10 = vpop.eup %5752  ;;  %v3878_v1 = vrot.slane %v3877_v59, 2 }
 0x48e   : > { %v3893_v38 = vadd.f32 %v3892_v47, %v3891_v33  ;;  %v8896_v15 = vsel %vm4789_vm5, %v5753_v10, %v8857_v13  ;;  %v9739_v33 = vperm.slane %v9738_v9, 2  ;;  %v3888_v51 = vadd.f32 %v3887_v58, %v3886_v56 }
 0x48f   : > { %4031 = vperm.xlu2 %5361, %v9734_v53   ;;  %v3903_v57 = vrot.slane %v3902_v14, 4  ;;  %9737 = vst [vmem:[#allocation39_spill] sm:$0xff] %v8896_v15 }
 0x490   : > { %4057 = vperm.xlu1 %5362, %v4052_v18   ;;  %v3894_v24 = vrot.slane %v3893_v38, 4 }
 0x491   : > { %v3904_v11 = vadd.f32 %v3903_v57, %v3902_v14 }
 0x492   : > { %v3895_v47 = vadd.f32 %v3894_v24, %v3893_v38 }
 0x494   : > { %v3896_v13 = vrot.slane %v3895_v47, 2 }
 0x496   : > { %v3897_v38 = vadd.f32 %v3896_v13, %v3895_v47  ;;  %v9747_v47 = vld [vmem:[#allocation14_spill] sm:$0xff] }
 0x497   : > { %5363 = vset.pattern.permute.xlu2 %v7929_v45 }
 0x498   : > { %5364 = vset.pattern.permute.xlu1 %v7929_v45 }
 0x499   : > { %v3729_v23 = vpop.permute.xlu2 %3728 }
 0x49a   : > { %v3723_v35 = vpop.permute.xlu1 %3722  ;;  %v3794_v44 = vmul.f32 %v3729_v23, %v9698_v55 }
 0x49b   : > { %v3793_v5 = vmul.f32 %v3723_v35, %v9697_v16  ;;  %v3879_v35 = vadd.f32 %v3878_v1, %v3877_v59  ;;  %v3898_v59 = vrot.slane %v3897_v38, 1 }
 0x49c   : > { %v3910_v54 = vsel %vm9735_vm8, %v3794_v44, 0.0  ;;  %v9741_v44 = vld [vmem:[#allocation28_spill] sm:$0xff]  ;;  %vm9757_vm8 = vmmov %vm9643_vm0 }
 0x49d   : > { %v3909_v4 = vsel %vm9736_vm6, %v3793_v5, 0.0  ;;  %v3880_v56 = vrot.slane %v3879_v35, 1  ;;  %vm9759_vm6 = vmmov %vm9643_vm0 }
 0x49e   : > { %v3911_v39 = vadd.f32 %v3910_v54, %v3909_v4  ;;  %v3889_v4 = vrot.slane %v3888_v51, 1 }
 0x49f   : > { %4050 = vperm.xlu2 %5363, %v4039_v8   ;;  %v3905_v8 = vrot.slane %v3904_v11, 2  ;;  %v3881_v24 = vadd.f32 %v3880_v56, %v3879_v35 }
 0x4a0   : > { %4076 = vperm.xlu1 %5364, %v9739_v33   ;;  %v4078_v33 = vperm.slane %v9744_v21, 2  ;;  %v3890_v14 = vadd.f32 %v3889_v4, %v3888_v51  ;;  %v3912_v57 = vrot.slane %v3911_v39, 4 }
 0x4a1   : > { %v3742_v53 = vpop.permute.xlu2 %3741  ;;  %v3906_v58 = vadd.f32 %v3905_v8, %v3904_v11 }
 0x4a2   : > { %v3736_v28 = vpop.permute.xlu1 %3735  ;;  %v3796_v23 = vmul.f32 %v3742_v53, %v9740_v41  ;;  %5754 = vtanh.f32 %v3890_v14  ;;  %v9745_v53 = vld [vmem:[#allocation12_spill] sm:$0xff] }
 0x4a3   : > { %v3795_v5 = vmul.f32 %v3736_v28, %v9741_v44  ;;  %v3907_v1 = vrot.slane %v3906_v58, 1  ;;  %5756 = vtanh.f32 %v3881_v24  ;;  %v9746_v28 = vld [vmem:[#allocation51_spill] sm:$0xff] }
 0x4a4   : > { %v3919_v54 = vsel %vm9742_vm12, %v3796_v23, 0.0  ;;  %v3797_v23 = vmul.f32 %v9746_v28, %v9745_v53  ;;  %v9750_v28 = vld [vmem:[#allocation47_spill] sm:$0xff]  ;;  %vm9760_vm12 = vmmov %vm9643_vm0 }
 0x4a5   : > { %v3918_v10 = vsel %vm9743_vm13, %v3795_v5, 0.0  ;;  %v3899_v5 = vadd.f32 %v3898_v59, %v3897_v38  ;;  %v4104_v15 = vperm.slane %v9750_v28, 2  ;;  %vm9761_vm13 = vmmov %vm9643_vm0 }
 0x4a6   : > { %v3920_v52 = vadd.f32 %v3919_v54, %v3918_v10  ;;  %v3913_v54 = vadd.f32 %v3912_v57, %v3911_v39  ;;  %v3927_v35 = vsel %vm9748_vm11, %v3797_v23, 0.0  ;;  %vm9762_vm11 = vmmov %vm9643_vm0 }
 0x4a7   : > { %4063 = vperm.xlu2 %5363, %v4052_v18   ;;  %v3908_v18 = vadd.f32 %v3907_v1, %v3906_v58  ;;  %5758 = vtanh.f32 %v3899_v5 }
 0x4a8   : > { %4089 = vperm.xlu1 %5364, %v4078_v33   ;;  %v5755_v51 = vpop.eup %5754  ;;  %v3914_v13 = vrot.slane %v3913_v54, 2  ;;  %v3921_v8 = vrot.slane %v3920_v52, 4 }
 0x4a9   : > { %v5757_v4 = vpop.eup %5756  ;;  %5760 = vtanh.f32 %v3908_v18 }
 0x4aa   : > { %v4823_v39 = vsel %vm4777_vm14, %v5755_v51, %v5757_v4  ;;  %v3915_v38 = vadd.f32 %v3914_v13, %v3913_v54  ;;  %v3922_v58 = vadd.f32 %v3921_v8, %v3920_v52  ;;  %v4117_v51 = vperm.slane %v8291_v61, 2  ;;  %v9752_v54 = vld [vmem:[#allocation8_spill] sm:$0xff] }
 0x4ab   : > { %v9753_v52 = vperm.slane %v9752_v54, 2 }
 0x4ad   : > { %v5759_v1 = vpop.eup %5758 }
 0x4af   : > { %5365 = vset.pattern.permute.xlu2 %v7925_v49  ;;  %v5761_v5 = vpop.eup %5760 }
 0x4b0   : > { %5366 = vset.pattern.permute.xlu1 %v7925_v49 }
 0x4b1   : > { %v3762_v24 = vpop.permute.xlu2 %3761 }
 0x4b2   : > { %v3755_v10 = vpop.permute.xlu1 %3754  ;;  %v3799_v59 = vmul.f32 %v3762_v24, %v9687_v27 }
 0x4b3   : > { %v3798_v11 = vmul.f32 %v3755_v10, %v9747_v47  ;;  %v3916_v10 = vrot.slane %v3915_v38, 1 }
 0x4b4   : > { %v3936_v18 = vsel %vm9751_vm2, %v3799_v59, 0.0  ;;  %vm9765_vm2 = vmmov %vm9643_vm0 }
 0x4b5   : > { %v3928_v56 = vsel %vm9749_vm10, %v3798_v11, 0.0  ;;  %v3923_v11 = vrot.slane %v3922_v58, 2  ;;  %v3917_v13 = vadd.f32 %v3916_v10, %v3915_v38  ;;  %vm9763_vm10 = vmmov %vm9643_vm0 }
 0x4b6   : > { %v3929_v14 = vadd.f32 %v3928_v56, %v3927_v35 }
 0x4b7   : > { %4083 = vperm.xlu2 %5365, %v4078_v33   ;;  %v4824_v33 = vsel %vm4779_vm15, %v5759_v1, %v4823_v39  ;;  %v3924_v8 = vadd.f32 %v3923_v11, %v3922_v58  ;;  %5762 = vtanh.f32 %v3917_v13  ;;  %v9754_v58 = vperm.slane %v8336_v36, 2 }
 0x4b8   : > { %4109 = vperm.xlu1 %5366, %v4104_v15   ;;  %v4825_v4 = vsel %vm4781_vm3, %v5761_v5, %v4824_v33 }
 0x4b9   : > { %v3925_v24 = vrot.slane %v3924_v8, 1 }
 0x4ba   : > { %v3768_v57 = vpop.permute.xlu1 %3767 }
 0x4bb   : > { %v3800_v23 = vmul.f32 %v3768_v57, %v9692_v6  ;;  %v3930_v57 = vrot.slane %v3929_v14, 4  ;;  %v3967_v6 = vpop.permute.xlu2 %3966  ;;  %v3926_v59 = vadd.f32 %v3925_v24, %v3924_v8  ;;  %v4143_v8 = vperm.slane %v8278_v48, 2 }
 0x4bd   : > { %v3937_v35 = vsel %vm9643_vm0, %v3800_v23, 0.0  ;;  %v3931_v23 = vadd.f32 %v3930_v57, %v3929_v14  ;;  %5764 = vtanh.f32 %v3926_v59 }
 0x4be   : > { %v3938_v56 = vadd.f32 %v3937_v35, %v3936_v18  ;;  %v5763_v18 = vpop.eup %5762 }
 0x4bf   : > { %4096 = vperm.xlu2 %5365, %v9753_v52   ;;  %v3932_v39 = vrot.slane %v3931_v23, 2  ;;  %v4826_v35 = vsel %vm4783_vm7, %v5763_v18, %v4825_v4  ;;  %v3973_v18 = vpop.permute.xlu0 %3972 }
 0x4c0   : > { %4122 = vperm.xlu1 %5366, %v4117_v51   ;;  %v3939_v1 = vrot.slane %v3938_v56, 4 }
 0x4c1   : > { %v3933_v10 = vadd.f32 %v3932_v39, %v3931_v23 }
 0x4c2   : > { %v3940_v11 = vadd.f32 %v3939_v1, %v3938_v56 }
 0x4c3   : > { %v5765_v33 = vpop.eup %5764  ;;  %v3934_v52 = vrot.slane %v3933_v10, 1 }
 0x4c4   : > { %v3941_v13 = vrot.slane %v3940_v11, 2  ;;  %v4827_v14 = vsel %vm4785_vm9, %v5765_v33, %v4826_v35  ;;  %v4169_v35 = vmul.f32 %v3967_v6, %v9652_v62  ;;  %v4170_v33 = vmul.f32 %v3973_v18, %v9653_v25  ;;  %v9770_v25 = vld [vmem:[#allocation46_spill] sm:$0xff] }
 0x4c5   : > { %v3935_v24 = vadd.f32 %v3934_v52, %v3933_v10  ;;  %v9755_v52 = vld [vmem:[#allocation37_spill] sm:$0xff] }
 0x4c6   : > { %v3942_v57 = vadd.f32 %v3941_v13, %v3940_v11 }
 0x4c7   : > { %5367 = vset.pattern.permute.xlu2 %v7929_v45  ;;  %5766 = vtanh.f32 %v3935_v24  ;;  %v9756_v24 = vld [vmem:[#allocation38_spill] sm:$0xff] }
 0x4c8   : > { %5368 = vset.pattern.permute.xlu1 %v7929_v45 }
 0x4c9   : > { %v3986_v5 = vpop.permute.xlu2 %3985 }
 0x4ca   : > { %v3980_v38 = vpop.permute.xlu1 %3979  ;;  %v4172_v11 = vmul.f32 %v3986_v5, %v9661_v20 }
 0x4cb   : > { %v4171_v10 = vmul.f32 %v3980_v38, %v9663_v22  ;;  %v9758_v38 = vld [vmem:[#allocation52_spill] sm:$0xff]  ;;  %v9766_v22 = vld [vmem:[#allocation30_spill] sm:$0xff] }
 0x4cc   : > { %v4175_v5 = vmul.f32 %v9758_v38, %v9666_v12  ;;  %v4211_v18 = vsel %vm9760_vm12, %v4172_v11, 0.0  ;;  %v9411_v11 = vperm.slane %v8274_v43, 3  ;;  %vm9773_vm12 = vmmov %vm9643_vm0 }
 0x4cd   : > { %v5767_v1 = vpop.eup %5766 }
 0x4cf   : > { %4115 = vperm.xlu2 %5367, %v4104_v15   ;;  %v3943_v15 = vrot.slane %v3942_v57, 1 }
 0x4d0   : > { %4141 = vperm.xlu1 %5368, %v9754_v58   ;;  %v4828_v58 = vsel %vm4787_vm4, %v5767_v1, %v4827_v14 }
 0x4d1   : > { %v3999_v4 = vpop.permute.xlu2 %3998  ;;  %v3944_v56 = vadd.f32 %v3943_v15, %v3942_v57  ;;  %v4201_v15 = vsel %vm9757_vm8, %v4169_v35, 0.0  ;;  %v9764_v35 = vld [vmem:[#allocation18_spill] sm:$0xff]  ;;  %vm9768_vm8 = vmmov %vm9643_vm0 }
 0x4d2   : > { %v3993_v59 = vpop.permute.xlu1 %3992  ;;  %v4174_v57 = vmul.f32 %v3999_v4, %v9756_v24  ;;  %v4202_v4 = vsel %vm9761_vm13, %v4170_v33, 0.0  ;;  %v4228_v33 = vsel %vm9768_vm8, %v4175_v5, 0.0  ;;  %vm9774_vm13 = vmmov %vm9643_vm0 }
 0x4d3   : > { %5768 = vtanh.f32 %v3944_v56  ;;  %v4173_v13 = vmul.f32 %v3993_v59, %v9755_v52  ;;  %v4038_v52 = vpop.permute.xlu0 %4037  ;;  %v4203_v24 = vadd.f32 %v4202_v4, %v4201_v15  ;;  %vm9786_vm8 = vmmov %vm9643_vm0 }
 0x4d7   : > { %4128 = vperm.xlu2 %5367, %v4117_v51   ;;  %v9404_v51 = vperm.slane %v7942_v29, 3 }
 0x4d8   : > { %4154 = vperm.xlu1 %5368, %v4143_v8  }
 0x4d9   : > { %v5769_v1 = vpop.eup %5768 }
 0x4df   : > { %5369 = vset.pattern.permute.xlu2 %v7925_v49 }
 0x4e0   : > { %5370 = vset.pattern.permute.xlu1 %v7925_v49 }
 0x4e1   : > { %v4019_v23 = vpop.permute.xlu2 %4018 }
 0x4e2   : > { %v4012_v39 = vpop.permute.xlu1 %4011 }
 0x4e3   : > { %v4176_v6 = vmul.f32 %v4012_v39, %v9662_v42  ;;  %v4220_v39 = vsel %vm9763_vm10, %v4174_v57, 0.0  ;;  %v4177_v42 = vmul.f32 %v4019_v23, %v9764_v35  ;;  %v9771_v23 = vperm.slane %v9770_v25, 2  ;;  %vm9778_vm10 = vmmov %vm9643_vm0 }
 0x4e5   : > { %v4229_v20 = vsel %vm9765_vm2, %v4176_v6, 0.0  ;;  %vm9781_vm2 = vmmov %vm9643_vm0 }
 0x4e6   : > { %v4230_v15 = vadd.f32 %v4229_v20, %v4228_v33 }
 0x4e7   : > { %4148 = vperm.xlu2 %5369, %v4143_v8   ;;  %v4210_v8 = vsel %vm9759_vm6, %v4171_v10, 0.0  ;;  %vm9772_vm6 = vmmov %vm9643_vm0 }
 0x4e8   : > { %4366 = vperm.xlu1 %5370, %v9404_v51   ;;  %v4219_v51 = vsel %vm9762_vm11, %v4173_v13, 0.0  ;;  %v4212_v12 = vadd.f32 %v4211_v18, %v4210_v8  ;;  %v9769_v13 = vld [vmem:[#allocation31_spill] sm:$0xff]  ;;  %v4237_v6 = vsel %vm9772_vm6, %v4177_v42, 0.0  ;;  %vm9777_vm11 = vmmov %vm9643_vm0 }
 0x4e9   : > { %v4032_v14 = vpop.permute.xlu2 %4031  ;;  %v4221_v57 = vadd.f32 %v4220_v39, %v4219_v51  ;;  %vm9787_vm6 = vmmov %vm9643_vm0 }
 0x4ea   : > { %v4025_v56 = vpop.permute.xlu1 %4024  ;;  %v4179_v38 = vmul.f32 %v4032_v14, %v9766_v22  ;;  %v4204_v14 = vrot.slane %v4203_v24, 4  ;;  %v9776_v22 = vld [vmem:[#allocation36_spill] sm:$0xff] }
 0x4eb   : > { %v4178_v59 = vmul.f32 %v4025_v56, %v9673_v60  ;;  %v8958_v56 = vsel %vm4789_vm5, %v5769_v1, %v4828_v58  ;;  %v4180_v60 = vmul.f32 %v4038_v52, %v9769_v13  ;;  %v4213_v58 = vrot.slane %v4212_v12, 4 }
 0x4ec   : > { %9767 = vst [vmem:[#allocation20_spill] sm:$0xff] %v8958_v56  ;;  %v4246_v18 = vsel %vm9773_vm12, %v4179_v38, 0.0  ;;  %v4222_v5 = vrot.slane %v4221_v57, 4  ;;  %v4205_v51 = vadd.f32 %v4204_v14, %v4203_v24  ;;  %v9775_v56 = vld [vmem:[#allocation13_spill] sm:$0xff]  ;;  %vm9788_vm12 = vmmov %vm9643_vm0 }
 0x4ed   : > { %v4238_v10 = vsel %vm9643_vm0, %v4178_v59, 0.0  ;;  %v4247_v1 = vsel %vm9774_vm13, %v4180_v60, 0.0  ;;  %v4231_v59 = vrot.slane %v4230_v15, 4  ;;  %v4214_v39 = vadd.f32 %v4213_v58, %v4212_v12  ;;  %vm9789_vm13 = vmmov %vm9643_vm0 }
 0x4ee   : > { %v4239_v8 = vadd.f32 %v4238_v10, %v4237_v6  ;;  %v4248_v52 = vadd.f32 %v4247_v1, %v4246_v18  ;;  %v4206_v33 = vrot.slane %v4205_v51, 2 }
 0x4ef   : > { %4161 = vperm.xlu2 %5369, %v9771_v23   ;;  %v4223_v23 = vadd.f32 %v4222_v5, %v4221_v57  ;;  %v4232_v20 = vadd.f32 %v4231_v59, %v4230_v15  ;;  %v4215_v38 = vrot.slane %v4214_v39, 2 }
 0x4f0   : > { %4379 = vperm.xlu1 %5370, %v9411_v11   ;;  %v4240_v4 = vrot.slane %v4239_v8, 4  ;;  %v4249_v42 = vrot.slane %v4248_v52, 4  ;;  %v4207_v57 = vadd.f32 %v4206_v33, %v4205_v51 }
 0x4f1   : > { %v4224_v13 = vrot.slane %v4223_v23, 2  ;;  %v4233_v24 = vrot.slane %v4232_v20, 2  ;;  %v4216_v1 = vadd.f32 %v4215_v38, %v4214_v39 }
 0x4f2   : > { %v4241_v10 = vadd.f32 %v4240_v4, %v4239_v8  ;;  %v4250_v14 = vadd.f32 %v4249_v42, %v4248_v52  ;;  %v9779_v8 = vperm.slane %v7942_v29, 3 }
 0x4f3   : > { %v4225_v59 = vadd.f32 %v4224_v13, %v4223_v23  ;;  %v4234_v4 = vadd.f32 %v4233_v24, %v4232_v20 }
 0x4f4   : > { %v4242_v58 = vrot.slane %v4241_v10, 2  ;;  %v4251_v35 = vrot.slane %v4250_v14, 2 }
 0x4f5   : > { %v4226_v39 = vrot.slane %v4225_v59, 1  ;;  %v4235_v23 = vrot.slane %v4234_v4, 1 }
 0x4f6   : > { %v4243_v52 = vadd.f32 %v4242_v58, %v4241_v10  ;;  %v4252_v29 = vadd.f32 %v4251_v35, %v4250_v14 }
 0x4f7   : > { %5371 = vset.pattern.permute.xlu2 %v7929_v45 }
 0x4f8   : > { %5372 = vset.pattern.permute.xlu1 %v7929_v45 }
 0x4f9   : > { %v4051_v6 = vpop.permute.xlu2 %4050 }
 0x4fa   : > { %v4045_v11 = vpop.permute.xlu1 %4044  ;;  %v4182_v60 = vmul.f32 %v4051_v6, %v9775_v56  ;;  %v9780_v56 = vperm.slane %v8038_v17, 3 }
 0x4fb   : > { %v4181_v18 = vmul.f32 %v4045_v11, %v9776_v22  ;;  %v4208_v11 = vrot.slane %v4207_v57, 1 }
 0x4fc   : > { %v4256_v12 = vsel %vm9777_vm11, %v4182_v60, 0.0  ;;  %v4217_v60 = vrot.slane %v4216_v1, 1  ;;  %vm9790_vm11 = vmmov %vm9643_vm0 }
 0x4fd   : > { %v4255_v15 = vsel %vm9778_vm10, %v4181_v18, 0.0  ;;  %v4209_v24 = vadd.f32 %v4208_v11, %v4207_v57  ;;  %vm9792_vm10 = vmmov %vm9643_vm0 }
 0x4fe   : > { %v4257_v5 = vadd.f32 %v4256_v12, %v4255_v15  ;;  %v4244_v12 = vrot.slane %v4243_v52, 1  ;;  %v4400_v15 = vperm.slane %v9712_v26, 3 }
 0x4ff   : > { %4372 = vperm.xlu2 %5371, %v9779_v8   ;;  %v9782_v8 = vperm.slane %v8274_v43, 3  ;;  %5770 = vtanh.f32 %v4209_v24 }
 0x500   : > { %v4258_v6 = vrot.slane %v4257_v5, 4  ;;  %4398 = vperm.xlu1 %5372, %v9780_v56   ;;  %v4218_v56 = vadd.f32 %v4217_v60, %v4216_v1  ;;  %v4245_v35 = vadd.f32 %v4244_v12, %v4243_v52 }
 0x501   : > { %v4064_v42 = vpop.permute.xlu2 %4063 }
 0x502   : > { %v4259_v51 = vadd.f32 %v4258_v6, %v4257_v5  ;;  %v4058_v33 = vpop.permute.xlu1 %4057  ;;  %v4184_v18 = vmul.f32 %v4064_v42, %v9707_v2  ;;  %v4227_v5 = vadd.f32 %v4226_v39, %v4225_v59  ;;  %v4236_v6 = vadd.f32 %v4235_v23, %v4234_v4 }
 0x503   : > { %v4183_v13 = vmul.f32 %v4058_v33, %v9709_v30  ;;  %v4253_v42 = vrot.slane %v4252_v29, 1  ;;  %5772 = vtanh.f32 %v4218_v56 }
 0x504   : > { %v4260_v38 = vrot.slane %v4259_v51, 2  ;;  %v4265_v20 = vsel %vm9781_vm2, %v4184_v18, 0.0  ;;  %5774 = vtanh.f32 %v4227_v5  ;;  %vm9793_vm2 = vmmov %vm9643_vm0 }
 0x505   : > { %v4264_v17 = vsel %vm9643_vm0, %v4183_v13, 0.0  ;;  %5776 = vtanh.f32 %v4236_v6  ;;  %v4254_v1 = vadd.f32 %v4253_v42, %v4252_v29  ;;  %v5771_v59 = vpop.eup %5770 }
 0x506   : > { %v4261_v10 = vadd.f32 %v4260_v38, %v4259_v51  ;;  %v4266_v58 = vadd.f32 %v4265_v20, %v4264_v17  ;;  %5778 = vtanh.f32 %v4245_v35  ;;  %v4426_v20 = vperm.slane %v9733_v7, 3 }
 0x507   : > { %4385 = vperm.xlu2 %5371, %v9782_v8   ;;  %5780 = vtanh.f32 %v4254_v1  ;;  %v4439_v8 = vperm.slane %v9725_v46, 3  ;;  %v9783_v7 = vperm.slane %v9718_v40, 3  ;;  %v9784_v35 = vperm.slane %v9732_v37, 3  ;;  %v4103_v1 = vpop.permute.xlu0 %4102 }
 0x508   : > { %v4267_v33 = vrot.slane %v4266_v58, 4  ;;  %4411 = vperm.xlu1 %5372, %v4400_v15   ;;  %v4262_v14 = vrot.slane %v4261_v10, 1 }
 0x509   : > { %v5773_v43 = vpop.eup %5772 }
 0x50a   : > { %v4268_v57 = vadd.f32 %v4267_v33, %v4266_v58  ;;  %v4263_v60 = vadd.f32 %v4262_v14, %v4261_v10  ;;  %v5775_v51 = vpop.eup %5774  ;;  %v4852_v13 = vsel %vm4777_vm14, %v5773_v43, %v5771_v59  ;;  %v9785_v59 = vld [vmem:[#allocation53_spill] sm:$0xff] }
 0x50b   : > { %v5777_v52 = vpop.eup %5776  ;;  %v4853_v23 = vsel %vm4779_vm15, %v5775_v51, %v4852_v13  ;;  %v4185_v43 = vmul.f32 %v9785_v59, %v9715_v34 }
 0x50c   : > { %v4269_v11 = vrot.slane %v4268_v57, 2  ;;  %5782 = vtanh.f32 %v4263_v60  ;;  %v5779_v39 = vpop.eup %5778  ;;  %v4854_v29 = vsel %vm4781_vm3, %v5777_v52, %v4853_v23 }
 0x50d   : > { %v5781_v38 = vpop.eup %5780  ;;  %v4855_v24 = vsel %vm4783_vm7, %v5779_v39, %v4854_v29  ;;  %v4273_v29 = vsel %vm9789_vm13, %v4185_v43, 0.0  ;;  %vm9797_vm13 = vmmov %vm9643_vm0 }
 0x50e   : > { %v4270_v26 = vadd.f32 %v4269_v11, %v4268_v57  ;;  %v4856_v17 = vsel %vm4785_vm9, %v5781_v38, %v4855_v24  ;;  %v4465_v57 = vperm.slane %v9738_v9, 3  ;;  %v9791_v24 = vld [vmem:[#allocation55_spill] sm:$0xff] }
 0x50f   : > { %5373 = vset.pattern.permute.xlu2 %v7925_v49 }
 0x510   : > { %v4271_v4 = vrot.slane %v4270_v26, 1  ;;  %5374 = vset.pattern.permute.xlu1 %v7925_v49 }
 0x511   : > { %v4084_v6 = vpop.permute.xlu2 %4083 }
 0x512   : > { %v4272_v18 = vadd.f32 %v4271_v4, %v4270_v26  ;;  %v5783_v12 = vpop.eup %5782  ;;  %v4077_v5 = vpop.permute.xlu1 %4076  ;;  %v4187_v60 = vmul.f32 %v4084_v6, %v9720_v63  ;;  %v4190_v4 = vmul.f32 %v4103_v1, %v9728_v31 }
 0x513   : > { %v4857_v10 = vsel %vm4787_vm4, %v5783_v12, %v4856_v17  ;;  %v4186_v11 = vmul.f32 %v4077_v5, %v9714_v50  ;;  %v4195_v12 = vmul.f32 %v9791_v24, %v9741_v44 }
 0x514   : > { %5784 = vtanh.f32 %v4272_v18  ;;  %v4282_v23 = vsel %vm9788_vm12, %v4187_v60, 0.0  ;;  %v4292_v17 = vsel %vm9792_vm10, %v4190_v4, 0.0  ;;  %vm9796_vm12 = vmmov %vm9643_vm0 }
 0x515   : > { %v4274_v13 = vsel %vm9787_vm6, %v4186_v11, 0.0  ;;  %vm9795_vm6 = vmmov %vm9643_vm0 }
 0x516   : > { %v4275_v5 = vadd.f32 %v4274_v13, %v4273_v29  ;;  %v4504_v13 = vperm.slane %v9750_v28, 3  ;;  %vm9801_vm10 = vmmov %vm9643_vm0 }
 0x517   : > { %4405 = vperm.xlu2 %5373, %v4400_v15  }
 0x518   : > { %4431 = vperm.xlu1 %5374, %v4426_v20   ;;  %v4276_v1 = vrot.slane %v4275_v5, 4 }
 0x519   : > { %v4097_v42 = vpop.permute.xlu2 %4096 }
 0x51a   : > { %v5785_v56 = vpop.eup %5784  ;;  %v4090_v15 = vpop.permute.xlu1 %4089  ;;  %v4189_v37 = vmul.f32 %v4097_v42, %v9726_v0 }
 0x51b   : > { %v4858_v58 = vsel %vm4789_vm5, %v5785_v56, %v4857_v10  ;;  %v4188_v40 = vmul.f32 %v4090_v15, %v9722_v19 }
 0x51c   : > { %4866 = vrot.lane.b32.xlu0 %v4858_v58, %s5960_s23 }
 0x51d   : > { %v4283_v9 = vsel %vm9786_vm8, %v4188_v40, 0.0  ;;  %vm9794_vm8 = vmmov %vm9643_vm0 }
 0x51e   : > { %v4284_v38 = vadd.f32 %v4283_v9, %v4282_v23 }
 0x51f   : > { %4418 = vperm.xlu2 %5373, %v9783_v7  }
 0x520   : > { %4444 = vperm.xlu1 %5374, %v4439_v8   ;;  %v4285_v42 = vrot.slane %v4284_v38, 4 }
 0x527   : > { %5375 = vset.pattern.permute.xlu2 %v7929_v45 }
 0x528   : > { %5376 = vset.pattern.permute.xlu1 %v7929_v45 }
 0x529   : > { %v4116_v14 = vpop.permute.xlu2 %4115 }
 0x52a   : > { %v4110_v33 = vpop.permute.xlu1 %4109  ;;  %v4192_v52 = vmul.f32 %v4116_v14, %v9688_v3  ;;  %v4318_v14 = vsel %vm9797_vm13, %v4195_v12, 0.0  ;;  %vm9816_vm13 = vmmov %vm9643_vm0 }
 0x52b   : > { %v4191_v51 = vmul.f32 %v4110_v33, %v9690_v32 }
 0x52c   : > { %v4301_v10 = vsel %vm9643_vm0, %v4192_v52, 0.0 }
 0x52d   : > { %v4300_v56 = vsel %vm9793_vm2, %v4191_v51, 0.0  ;;  %vm9802_vm2 = vmmov %vm9643_vm0 }
 0x52e   : > { %v4302_v33 = vadd.f32 %v4301_v10, %v4300_v56 }
 0x52f   : > { %4437 = vperm.xlu2 %5375, %v4426_v20   ;;  %v4291_v20 = vsel %vm9790_vm11, %v4189_v37, 0.0  ;;  %v4277_v37 = vadd.f32 %v4276_v1, %v4275_v5  ;;  %vm9799_vm11 = vmmov %vm9643_vm0 }
 0x530   : > { %4463 = vperm.xlu1 %5376, %v9784_v35   ;;  %v4293_v15 = vadd.f32 %v4292_v17, %v4291_v20  ;;  %v4303_v59 = vrot.slane %v4302_v33, 4 }
 0x531   : > { %v4129_v26 = vpop.permute.xlu2 %4128  ;;  %v4278_v23 = vrot.slane %v4277_v37, 2 }
 0x532   : > { %v4123_v46 = vpop.permute.xlu1 %4122  ;;  %v4194_v39 = vmul.f32 %v4129_v26, %v9698_v55  ;;  %v4294_v60 = vrot.slane %v4293_v15, 4  ;;  %v4286_v26 = vadd.f32 %v4285_v42, %v4284_v38  ;;  %v4304_v52 = vadd.f32 %v4303_v59, %v4302_v33 }
 0x533   : > { %v4193_v18 = vmul.f32 %v4123_v46, %v9697_v16  ;;  %v4491_v46 = vperm.slane %v9752_v54, 3  ;;  %v9798_v54 = vperm.slane %v9744_v21, 3  ;;  %v4279_v12 = vadd.f32 %v4278_v23, %v4277_v37 }
 0x534   : > { %v4310_v7 = vsel %vm9795_vm6, %v4194_v39, 0.0  ;;  %v4295_v9 = vadd.f32 %v4294_v60, %v4293_v15  ;;  %v4287_v51 = vrot.slane %v4286_v26, 2  ;;  %v4305_v38 = vrot.slane %v4304_v52, 2  ;;  %vm9814_vm6 = vmmov %vm9643_vm0 }
 0x536   : > { %v4288_v20 = vadd.f32 %v4287_v51, %v4286_v26 }
 0x537   : > { %4450 = vperm.xlu2 %5375, %v4439_v8   ;;  %v4309_v8 = vsel %vm9794_vm8, %v4193_v18, 0.0  ;;  %vm9813_vm8 = vmmov %vm9643_vm0 }
 0x538   : > { %4476 = vperm.xlu1 %5376, %v4465_v57   ;;  %v4311_v40 = vadd.f32 %v4310_v7, %v4309_v8  ;;  %v4289_v10 = vrot.slane %v4288_v20, 1  ;;  %v4280_v7 = vrot.slane %v4279_v12, 1 }
 0x53a   : > { %v4312_v43 = vrot.slane %v4311_v40, 4  ;;  %v4290_v42 = vadd.f32 %v4289_v10, %v4288_v20  ;;  %v4281_v1 = vadd.f32 %v4280_v7, %v4279_v12  ;;  %v4530_v10 = vperm.slane %v8336_v36, 3 }
 0x53c   : > { %v4313_v18 = vadd.f32 %v4312_v43, %v4311_v40  ;;  %v9800_v43 = vld [vmem:[#allocation44_spill] sm:$0xff]  ;;  %5786 = vtanh.f32 %v4290_v42 }
 0x53d   : > { %5788 = vtanh.f32 %v4281_v1 }
 0x53e   : > { %v4314_v24 = vrot.slane %v4313_v18, 2 }
 0x53f   : > { %5377 = vset.pattern.permute.xlu2 %v7925_v49 }
 0x540   : > { %5378 = vset.pattern.permute.xlu1 %v7925_v49  ;;  %v4315_v8 = vadd.f32 %v4314_v24, %v4313_v18 }
 0x541   : > { %v4149_v39 = vpop.permute.xlu2 %4148 }
 0x542   : > { %v4142_v58 = vpop.permute.xlu1 %4141  ;;  %v4197_v40 = vmul.f32 %v4149_v39, %v9745_v53  ;;  %v9803_v39 = vperm.slane %v8291_v61, 3 }
 0x543   : > { %v4196_v6 = vmul.f32 %v4142_v58, %v9740_v41  ;;  %v4306_v58 = vadd.f32 %v4305_v38, %v4304_v52 }
 0x544   : > { %v4327_v51 = vsel %vm9801_vm10, %v4197_v40, 0.0  ;;  %vm9820_vm10 = vmmov %vm9643_vm0 }
 0x545   : > { %v4319_v35 = vsel %vm9796_vm12, %v4196_v6, 0.0  ;;  %v4307_v33 = vrot.slane %v4306_v58, 1  ;;  %vm9815_vm12 = vmmov %vm9643_vm0 }
 0x546   : > { %v4320_v11 = vadd.f32 %v4319_v35, %v4318_v14  ;;  %v4168_v35 = vpop.permute.xlu0 %4167  ;;  %v4316_v14 = vrot.slane %v4315_v8, 1 }
 0x547   : > { %4470 = vperm.xlu2 %5377, %v4465_v57   ;;  %v4296_v57 = vrot.slane %v4295_v9, 2  ;;  %v4200_v37 = vmul.f32 %v4168_v35, %v9800_v43 }
 0x548   : > { %4496 = vperm.xlu1 %5378, %v4491_v46   ;;  %v4321_v4 = vrot.slane %v4320_v11, 4 }
 0x549   : > { %v4297_v56 = vadd.f32 %v4296_v57, %v4295_v9  ;;  %v4162_v15 = vpop.permute.xlu2 %4161  ;;  %v4317_v9 = vadd.f32 %v4316_v14, %v4315_v8  ;;  %v5787_v57 = vpop.eup %5786 }
 0x54a   : > { %v4322_v29 = vadd.f32 %v4321_v4, %v4320_v11  ;;  %v4155_v5 = vpop.permute.xlu1 %4154  ;;  %v4199_v60 = vmul.f32 %v4162_v15, %v9687_v27  ;;  %v4308_v4 = vadd.f32 %v4307_v33, %v4306_v58  ;;  %v5789_v38 = vpop.eup %5788 }
 0x54b   : > { %v4298_v28 = vrot.slane %v4297_v56, 1  ;;  %v4198_v21 = vmul.f32 %v4155_v5, %v9747_v47 }
 0x54c   : > { %v4323_v17 = vrot.slane %v4322_v29, 2  ;;  %v4336_v23 = vsel %vm9802_vm2, %v4199_v60, 0.0  ;;  %vm9823_vm2 = vmmov %vm9643_vm0 }
 0x54d   : > { %v4299_v26 = vadd.f32 %v4298_v28, %v4297_v56  ;;  %v4328_v59 = vsel %vm9799_vm11, %v4198_v21, 0.0  ;;  %vm9818_vm11 = vmmov %vm9643_vm0 }
 0x54e   : > { %v4324_v6 = vadd.f32 %v4323_v17, %v4322_v29  ;;  %v4329_v18 = vadd.f32 %v4328_v59, %v4327_v51  ;;  %v4337_v29 = vsel %vm9643_vm0, %v4200_v37, 0.0 }
 0x54f   : > { %4483 = vperm.xlu2 %5377, %v9798_v54   ;;  %5790 = vtanh.f32 %v4299_v26  ;;  %v4338_v54 = vadd.f32 %v4337_v29, %v4336_v23 }
 0x550   : > { %4509 = vperm.xlu1 %5378, %v4504_v13   ;;  %v4325_v11 = vrot.slane %v4324_v6, 1  ;;  %5792 = vtanh.f32 %v4308_v4  ;;  %v4330_v20 = vrot.slane %v4329_v18, 4  ;;  %v9804_v4 = vperm.slane %v8278_v48, 3 }
 0x551   : > { %5794 = vtanh.f32 %v4317_v9  ;;  %v4339_v17 = vrot.slane %v4338_v54, 4  ;;  %v9805_v9 = vld [vmem:[#allocation39_spill] sm:$0xff] }
 0x552   : > { %v4326_v52 = vadd.f32 %v4325_v11, %v4324_v6  ;;  %v4331_v61 = vadd.f32 %v4330_v20, %v4329_v18  ;;  %v4556_v11 = vperm.slane %v9770_v25, 3  ;;  %v9808_v20 = vld [vmem:[#allocation32_spill] sm:$0xff] }
 0x553   : > { %v4340_v6 = vadd.f32 %v4339_v17, %v4338_v54  ;;  %v9807_v54 = vld [vmem:[#allocation27_spill] sm:$0xff] }
 0x554   : > { %5796 = vtanh.f32 %v4326_v52  ;;  %v4332_v21 = vrot.slane %v4331_v61, 2 }
 0x555   : > { %v5791_v12 = vpop.eup %5790  ;;  %v4341_v33 = vrot.slane %v4340_v6, 2 }
 0x556   : > { %v5793_v58 = vpop.eup %5792  ;;  %v4333_v36 = vadd.f32 %v4332_v21, %v4331_v61  ;;  %v9811_v61 = vld [vmem:[#allocation37_spill] sm:$0xff] }
 0x557   : > { %5379 = vset.pattern.permute.xlu2 %v7929_v45  ;;  %v5795_v5 = vpop.eup %5794 }
 0x558   : > { %5381 = vset.pattern.permute.xlu1 %v7929_v45  ;;  %v4334_v40 = vrot.slane %v4333_v36, 1 }
 0x559   : > { %v4373_v24 = vpop.permute.xlu2 %4372 }
 0x55a   : > { %v4367_v56 = vpop.permute.xlu1 %4366  ;;  %v5797_v8 = vpop.eup %5796  ;;  %v4335_v60 = vadd.f32 %v4334_v40, %v4333_v36  ;;  %v9822_v40 = vld [vmem:[#allocation31_spill] sm:$0xff] }
 0x55b   : > { %v4569_v23 = vmul.f32 %v4367_v56, %v9652_v62 }
 0x55c   : > { %5798 = vtanh.f32 %v4335_v60 }
 0x55f   : > { %4502 = vperm.xlu2 %5379, %v4491_v46   ;;  %v4859_v46 = vsel %vm4777_vm14, %v5787_v57, %v5789_v38 }
 0x560   : > { %4528 = vperm.xlu1 %5381, %v9803_v39   ;;  %v4860_v7 = vsel %vm4779_vm15, %v5791_v12, %v4859_v46  ;;  %v9806_v39 = vld [vmem:[#allocation23_spill] sm:$0xff]  ;;  %v9809_v12 = vld [vmem:[#allocation38_spill] sm:$0xff] }
 0x561   : > { %v4861_v28 = vsel %vm4781_vm3, %v5793_v58, %v4860_v7  ;;  %v4386_v35 = vpop.permute.xlu2 %4385  ;;  %v4570_v29 = vmul.f32 %v4373_v24, %v9806_v39  ;;  %v4601_v24 = vsel %vm9813_vm8, %v4569_v23, 0.0  ;;  %v4425_v7 = vpop.permute.xlu0 %4424  ;;  %vm9825_vm8 = vmmov %vm9643_vm0 }
 0x562   : > { %v4862_v15 = vsel %vm4783_vm7, %v5795_v5, %v4861_v28  ;;  %v4380_v14 = vpop.permute.xlu1 %4379  ;;  %v4572_v38 = vmul.f32 %v4386_v35, %v9808_v20  ;;  %v9812_v5 = vld [vmem:[#allocation56_spill] sm:$0xff]  ;;  %v9817_v28 = vld [vmem:[#allocation17_spill] sm:$0xff] }
 0x563   : > { %v4863_v42 = vsel %vm4785_vm9, %v5797_v8, %v4862_v15  ;;  %v4571_v57 = vmul.f32 %v4380_v14, %v9807_v54  ;;  %v4573_v62 = vmul.f32 %v9812_v5, %v9811_v61  ;;  %v4602_v56 = vsel %vm9814_vm6, %v4570_v29, 0.0  ;;  %v9821_v14 = vld [vmem:[#allocation30_spill] sm:$0xff]  ;;  %vm9826_vm6 = vmmov %vm9643_vm0 }
 0x564   : > { %v4603_v36 = vadd.f32 %v4602_v56, %v4601_v24  ;;  %v9832_v56 = vld [vmem:[#allocation20_spill] sm:$0xff] }
 0x565   : > { %v4619_v60 = vsel %vm9823_vm2, %v4573_v62, 0.0  ;;  %vm9834_vm2 = vmmov %vm9643_vm0 }
 0x567   : > { %4515 = vperm.xlu2 %5379, %v4504_v13   ;;  %v4342_v13 = vadd.f32 %v4341_v33, %v4340_v6  ;;  %v4611_v6 = vsel %vm9816_vm13, %v4572_v38, 0.0  ;;  %vm9828_vm13 = vmmov %vm9643_vm0 }
 0x568   : > { %4541 = vperm.xlu1 %5381, %v4530_v10  }
 0x569   : > { %v4343_v1 = vrot.slane %v4342_v13, 1 }
 0x56b   : > { %v4344_v37 = vadd.f32 %v4343_v1, %v4342_v13 }
 0x56d   : > { %5800 = vtanh.f32 %v4344_v37 }
 0x56f   : > { %5382 = vset.pattern.permute.xlu2 %v7925_v49 }
 0x570   : > { %5383 = vset.pattern.permute.xlu1 %v7925_v49  ;;  %v5799_v49 = vpop.eup %5798 }
 0x571   : > { %v4406_v26 = vpop.permute.xlu2 %4405  ;;  %v4864_v25 = vsel %vm4787_vm4, %v5799_v49, %v4863_v42  ;;  %v9819_v42 = vld [vmem:[#allocation18_spill] sm:$0xff] }
 0x572   : > { %v4399_v59 = vpop.permute.xlu1 %4398  ;;  %v4575_v21 = vmul.f32 %v4406_v26, %v9817_v28 }
 0x573   : > { %v5801_v18 = vpop.eup %5800  ;;  %v4574_v17 = vmul.f32 %v4399_v59, %v9809_v12  ;;  %v9824_v59 = vld [vmem:[#allocation25_spill] sm:$0xff] }
 0x574   : > { %v4865_v48 = vsel %vm4789_vm5, %v5801_v18, %v4864_v25  ;;  %v4578_v37 = vmul.f32 %v4425_v7, %v9824_v59  ;;  %v4628_v49 = vsel %vm9643_vm0, %v4575_v21, 0.0 }
 0x575   : > { %v4620_v15 = vsel %vm9818_vm11, %v4574_v17, 0.0  ;;  %vm9830_vm11 = vmmov %vm9643_vm0 }
 0x576   : > { %v4638_v39 = vsel %vm9828_vm13, %v4578_v37, 0.0  ;;  %vm9839_vm13 = vmmov %vm9643_vm0 }
 0x577   : > { %4535 = vperm.xlu2 %5382, %v4530_v10   ;;  %v9810_v10 = vld [vmem:[#allocation42_spill] sm:$0xff] }
 0x578   : > { %4561 = vperm.xlu1 %5383, %v4556_v11  }
 0x579   : > { %v4419_v51 = vpop.permute.xlu2 %4418 }
 0x57a   : > { %v4412_v52 = vpop.permute.xlu1 %4411  ;;  %v4577_v33 = vmul.f32 %v4419_v51, %v9819_v42  ;;  %v4604_v51 = vrot.slane %v4603_v36, 4 }
 0x57b   : > { %v4576_v46 = vmul.f32 %v4412_v52, %v9810_v10 }
 0x57c   : > { %v4637_v52 = vsel %vm9825_vm8, %v4577_v33, 0.0  ;;  %vm9835_vm8 = vmmov %vm9643_vm0 }
 0x57d   : > { %v4629_v35 = vsel %vm9820_vm10, %v4576_v46, 0.0  ;;  %v4605_v46 = vadd.f32 %v4604_v51, %v4603_v36  ;;  %vm9831_vm10 = vmmov %vm9643_vm0 }
 0x57e   : > { %v4630_v26 = vadd.f32 %v4629_v35, %v4628_v49 }
 0x57f   : > { %4548 = vperm.xlu2 %5382, %v9804_v4  }
 0x580   : > { %4830 = vrot.lane.b32.xlu1 %v9805_v9, %s5957_s11  ;;  %v4621_v9 = vadd.f32 %v4620_v15, %v4619_v60  ;;  %v9833_v60 = vld [vmem:[#allocation57_spill] sm:$0xff] }
 0x581   : > { %v4583_v59 = vmul.f32 %v9833_v60, %v9709_v30 }
 0x582   : > { %v4622_v38 = vrot.slane %v4621_v9, 4 }
 0x584   : > { %v4623_v62 = vadd.f32 %v4622_v38, %v4621_v9 }
 0x587   : > { %5384 = vset.pattern.permute.xlu2 %v7929_v45  ;;  %v4610_v45 = vsel %vm9815_vm12, %v4571_v57, 0.0  ;;  %vm9827_vm12 = vmmov %vm9643_vm0  ;;  %v9829_v57 = vld [vmem:[#allocation13_spill] sm:$0xff] }
 0x588   : > { %4868 = vrot.lane.b32.xlu1 %v4865_v48, %s5960_s23  ;;  %v4612_v4 = vadd.f32 %v4611_v6, %v4610_v45  ;;  %v4639_v48 = vadd.f32 %v4638_v39, %v4637_v52  ;;  %v4606_v45 = vrot.slane %v4605_v46, 2 }
 0x589   : > { %v4438_v58 = vpop.permute.xlu2 %4437 }
 0x58a   : > { %v4432_v8 = vpop.permute.xlu1 %4431  ;;  %v4580_v1 = vmul.f32 %v4438_v58, %v9822_v40  ;;  %v4613_v29 = vrot.slane %v4612_v4, 4  ;;  %v4640_v24 = vrot.slane %v4639_v48, 4  ;;  %v4607_v33 = vadd.f32 %v4606_v45, %v4605_v46 }
 0x58b   : > { %v4579_v13 = vmul.f32 %v4432_v8, %v9821_v14 }
 0x58c   : > { %v4647_v25 = vsel %vm9827_vm12, %v4580_v1, 0.0  ;;  %v4614_v61 = vadd.f32 %v4613_v29, %v4612_v4  ;;  %v4641_v21 = vadd.f32 %v4640_v24, %v4639_v48  ;;  %v4608_v37 = vrot.slane %v4607_v33, 1  ;;  %vm9837_vm12 = vmmov %vm9643_vm0 }
 0x58d   : > { %v4646_v18 = vsel %vm9826_vm6, %v4579_v13, 0.0  ;;  %vm9836_vm6 = vmmov %vm9643_vm0 }
 0x58e   : > { %v4648_v17 = vadd.f32 %v4647_v25, %v4646_v18  ;;  %v4615_v28 = vrot.slane %v4614_v61, 2  ;;  %v4642_v13 = vrot.slane %v4641_v21, 2  ;;  %v4609_v39 = vadd.f32 %v4608_v37, %v4607_v33 }
 0x58f   : > { %4567 = vperm.xlu2 %5384, %v4556_v11   ;;  %v4631_v11 = vrot.slane %v4630_v26, 4 }
 0x590   : > { %v4649_v7 = vrot.slane %v4648_v17, 4  ;;  %v4616_v35 = vadd.f32 %v4615_v28, %v4614_v61  ;;  %v4643_v52 = vadd.f32 %v4642_v13, %v4641_v21  ;;  %5802 = vtanh.f32 %v4609_v39 }
 0x591   : > { %v4451_v23 = vpop.permute.xlu2 %4450  ;;  %v4632_v8 = vadd.f32 %v4631_v11, %v4630_v26 }
 0x592   : > { %v4445_v54 = vpop.permute.xlu1 %4444  ;;  %v4582_v20 = vmul.f32 %v4451_v23, %v9829_v57  ;;  %v4650_v42 = vadd.f32 %v4649_v7, %v4648_v17  ;;  %v4617_v9 = vrot.slane %v4616_v35, 1  ;;  %v4664_v23 = vsel %vm9834_vm2, %v4583_v59, 0.0  ;;  %vm9842_vm2 = vmmov %vm9643_vm0 }
 0x593   : > { %v4581_v12 = vmul.f32 %v4445_v54, %v9776_v22  ;;  %v4624_v22 = vrot.slane %v4623_v62, 2  ;;  %v4633_v15 = vrot.slane %v4632_v8, 2  ;;  %v4644_v30 = vrot.slane %v4643_v52, 1 }
 0x594   : > { %v4656_v10 = vsel %vm9830_vm11, %v4582_v20, 0.0  ;;  %v4651_v1 = vrot.slane %v4650_v42, 2  ;;  %v4618_v57 = vadd.f32 %v4617_v9, %v4616_v35  ;;  %vm9840_vm11 = vmmov %vm9643_vm0 }
 0x595   : > { %v4655_v58 = vsel %vm9831_vm10, %v4581_v12, 0.0  ;;  %v4625_v14 = vadd.f32 %v4624_v22, %v4623_v62  ;;  %v4634_v40 = vadd.f32 %v4633_v15, %v4632_v8  ;;  %vm9841_vm10 = vmmov %vm9643_vm0 }
 0x596   : > { %v4657_v5 = vadd.f32 %v4656_v10, %v4655_v58  ;;  %v4652_v25 = vadd.f32 %v4651_v1, %v4650_v42  ;;  %5804 = vtanh.f32 %v4618_v57  ;;  %v5803_v24 = vpop.eup %5802 }
 0x597   : > { %4832 = vrot.lane.b32.xlu2 %v9832_v56, %s5957_s11  ;;  %v4626_v26 = vrot.slane %v4625_v14, 1  ;;  %v4635_v18 = vrot.slane %v4634_v40, 1 }
 0x598   : > { %v4658_v6 = vrot.slane %v4657_v5, 4  ;;  %v4653_v12 = vrot.slane %v4652_v25, 1 }
 0x599   : > { %v4627_v38 = vadd.f32 %v4626_v26, %v4625_v14  ;;  %v4636_v48 = vadd.f32 %v4635_v18, %v4634_v40 }
 0x59a   : > { %v4659_v36 = vadd.f32 %v4658_v6, %v4657_v5  ;;  %v4654_v46 = vadd.f32 %v4653_v12, %v4652_v25 }
 0x59b   : > { %5806 = vtanh.f32 %v4627_v38 }
 0x59c   : > { %v4660_v4 = vrot.slane %v4659_v36, 2  ;;  %5808 = vtanh.f32 %v4636_v48  ;;  %v5805_v56 = vpop.eup %5804 }
 0x59d   : > { %v4888_v28 = vsel %vm4777_vm14, %v5805_v56, %v5803_v24 }
 0x59e   : > { %v4661_v29 = vadd.f32 %v4660_v4, %v4659_v36 }
 0x5a0   : > { %v4662_v17 = vrot.slane %v4661_v29, 1 }
 0x5a1   : > { %v4471_v5 = vpop.permute.xlu2 %4470  ;;  %v5807_v7 = vpop.eup %5806 }
 0x5a2   : > { %v4464_v49 = vpop.permute.xlu1 %4463  ;;  %v4663_v61 = vadd.f32 %v4662_v17, %v4661_v29  ;;  %v5809_v45 = vpop.eup %5808  ;;  %v4889_v22 = vsel %vm4779_vm15, %v5807_v7, %v4888_v28 }
 0x5a3   : > { %v4584_v51 = vmul.f32 %v4464_v49, %v9707_v2  ;;  %v4645_v2 = vadd.f32 %v4644_v30, %v4643_v52  ;;  %v4890_v15 = vsel %vm4781_vm3, %v5809_v45, %v4889_v22  ;;  %v4490_v49 = vpop.permute.xlu0 %4489 }
 0x5a4   : > { %v4588_v52 = vmul.f32 %v4490_v49, %v9722_v19 }
 0x5a5   : > { %v4665_v54 = vsel %vm9643_vm0, %v4584_v51, 0.0  ;;  %5810 = vtanh.f32 %v4645_v2 }
 0x5a6   : > { %v4666_v20 = vadd.f32 %v4665_v54, %v4664_v23  ;;  %5812 = vtanh.f32 %v4654_v46  ;;  %v4585_v23 = vmul.f32 %v4471_v5, %v9715_v34 }
 0x5a7   : > { %5814 = vtanh.f32 %v4663_v61 }
 0x5a8   : > { %v4667_v11 = vrot.slane %v4666_v20, 4 }
 0x5a9   : > { %v4484_v36 = vpop.permute.xlu2 %4483 }
 0x5aa   : > { %v4668_v10 = vadd.f32 %v4667_v11, %v4666_v20  ;;  %v4477_v35 = vpop.permute.xlu1 %4476  ;;  %v4587_v26 = vmul.f32 %v4484_v36, %v9720_v63  ;;  %v4683_v63 = vsel %vm9836_vm6, %v4588_v52, 0.0  ;;  %vm9844_vm6 = vmmov %vm9643_vm0 }
 0x5ab   : > { %v5811_v21 = vpop.eup %5810  ;;  %v4586_v51 = vmul.f32 %v4477_v35, %v9714_v50  ;;  %v4555_v48 = vpop.permute.xlu0 %4554 }
 0x5ac   : > { %v4669_v58 = vrot.slane %v4668_v10, 2  ;;  %v5813_v42 = vpop.eup %5812  ;;  %v4891_v14 = vsel %vm4783_vm7, %v5811_v21, %v4890_v15  ;;  %v4682_v39 = vsel %vm9835_vm8, %v4587_v26, 0.0  ;;  %vm9843_vm8 = vmmov %vm9643_vm0 }
 0x5ad   : > { %v5815_v33 = vpop.eup %5814  ;;  %v4892_v13 = vsel %vm4785_vm9, %v5813_v42, %v4891_v14  ;;  %v4674_v19 = vsel %vm9837_vm12, %v4586_v51, 0.0  ;;  %vm9845_vm12 = vmmov %vm9643_vm0 }
 0x5ae   : > { %v4670_v62 = vadd.f32 %v4669_v58, %v4668_v10  ;;  %v4893_v1 = vsel %vm4787_vm4, %v5815_v33, %v4892_v13 }
 0x5b0   : > { %v4671_v8 = vrot.slane %v4670_v62, 1 }
 0x5b2   : > { %v4672_v6 = vadd.f32 %v4671_v8, %v4670_v62 }
 0x5b4   : > { %5816 = vtanh.f32 %v4672_v6 }
 0x5b9   : > { %v4503_v59 = vpop.permute.xlu2 %4502 }
 0x5ba   : > { %v5817_v40 = vpop.eup %5816  ;;  %v4497_v37 = vpop.permute.xlu1 %4496  ;;  %v4590_v25 = vmul.f32 %v4503_v59, %v9728_v31  ;;  %v4684_v31 = vadd.f32 %v4683_v63, %v4682_v39 }
 0x5bb   : > { %v4894_v60 = vsel %vm4789_vm5, %v5817_v40, %v4893_v1  ;;  %v4589_v18 = vmul.f32 %v4497_v37, %v9726_v0  ;;  %v9838_v0 = vld [vmem:[#allocation58_spill] sm:$0xff] }
 0x5bc   : > { %4902 = vrot.lane.b32.xlu2 %v4894_v60, %s5952_s6  ;;  %v4593_v38 = vmul.f32 %v9838_v0, %v9697_v16  ;;  %v4692_v30 = vsel %vm9840_vm11, %v4590_v25, 0.0  ;;  %v4598_v16 = vmul.f32 %v4555_v48, %v9747_v47  ;;  %v4685_v2 = vrot.slane %v4684_v31, 4  ;;  %vm9847_vm11 = vmmov %vm9643_vm0 }
 0x5bd   : > { %v4691_v34 = vsel %vm9839_vm13, %v4589_v18, 0.0  ;;  %vm9846_vm13 = vmmov %vm9643_vm0 }
 0x5be   : > { %v4693_v10 = vadd.f32 %v4692_v30, %v4691_v34  ;;  %v4728_v45 = vsel %vm9845_vm12, %v4598_v16, 0.0  ;;  %v4686_v6 = vadd.f32 %v4685_v2, %v4684_v31  ;;  %v9850_v2 = vld [vmem:[#allocation40_spill] sm:$0xff] }
 0x5c0   : > { %v4694_v8 = vrot.slane %v4693_v10, 4  ;;  %v4687_v14 = vrot.slane %v4686_v6, 2 }
 0x5c1   : > { %v4516_v4 = vpop.permute.xlu2 %4515 }
 0x5c2   : > { %v4510_v9 = vpop.permute.xlu1 %4509  ;;  %v4592_v54 = vmul.f32 %v4516_v4, %v9688_v3  ;;  %v4695_v36 = vadd.f32 %v4694_v8, %v4693_v10  ;;  %v4688_v37 = vadd.f32 %v4687_v14, %v4686_v6  ;;  %v9852_v14 = vld [vmem:[#allocation41_spill] sm:$0xff] }
 0x5c3   : > { %v4591_v29 = vmul.f32 %v4510_v9, %v9690_v32  ;;  %v4673_v32 = vsel %vm9841_vm10, %v4585_v23, 0.0  ;;  %vm9848_vm10 = vmmov %vm9643_vm0 }
 0x5c4   : > { %v4701_v12 = vsel %vm9643_vm0, %v4592_v54, 0.0  ;;  %v4675_v11 = vadd.f32 %v4674_v19, %v4673_v32  ;;  %v4696_v60 = vrot.slane %v4695_v36, 2  ;;  %v4689_v18 = vrot.slane %v4688_v37, 1 }
 0x5c5   : > { %v4700_v3 = vsel %vm9842_vm2, %v4591_v29, 0.0  ;;  %vm9849_vm2 = vmmov %vm9643_vm0 }
 0x5c6   : > { %v4702_v46 = vadd.f32 %v4701_v12, %v4700_v3  ;;  %v4676_v62 = vrot.slane %v4675_v11, 4  ;;  %v4697_v52 = vadd.f32 %v4696_v60, %v4695_v36 }
 0x5c8   : > { %v4703_v28 = vrot.slane %v4702_v46, 4  ;;  %v4677_v42 = vadd.f32 %v4676_v62, %v4675_v11  ;;  %v4698_v63 = vrot.slane %v4697_v52, 1 }
 0x5ca   : > { %v4704_v35 = vadd.f32 %v4703_v28, %v4702_v46  ;;  %v4678_v40 = vrot.slane %v4677_v42, 2  ;;  %v4699_v12 = vadd.f32 %v4698_v63, %v4697_v52 }
 0x5cc   : > { %v4705_v59 = vrot.slane %v4704_v35, 2  ;;  %v4679_v49 = vadd.f32 %v4678_v40, %v4677_v42 }
 0x5ce   : > { %v4706_v51 = vadd.f32 %v4705_v59, %v4704_v35  ;;  %v4680_v29 = vrot.slane %v4679_v49, 1 }
 0x5d0   : > { %v4681_v48 = vadd.f32 %v4680_v29, %v4679_v49 }
 0x5d1   : > { %v4536_v57 = vpop.permute.xlu2 %4535 }
 0x5d2   : > { %v4529_v20 = vpop.permute.xlu1 %4528  ;;  %v4595_v61 = vmul.f32 %v4536_v57, %v9741_v44 }
 0x5d3   : > { %v4594_v50 = vmul.f32 %v4529_v20, %v9698_v55  ;;  %v4709_v55 = vsel %vm9844_vm6, %v4593_v38, 0.0  ;;  %v4690_v38 = vadd.f32 %v4689_v18, %v4688_v37 }
 0x5d4   : > { %v4718_v21 = vsel %vm9847_vm11, %v4595_v61, 0.0 }
 0x5d5   : > { %v4710_v17 = vsel %vm9843_vm8, %v4594_v50, 0.0  ;;  %v4707_v50 = vrot.slane %v4706_v51, 1  ;;  %5818 = vtanh.f32 %v4690_v38  ;;  %vm9851_vm8 = vmmov %vm9643_vm0 }
 0x5d6   : > { %v4711_v58 = vadd.f32 %v4710_v17, %v4709_v55  ;;  %5820 = vtanh.f32 %v4681_v48 }
 0x5d7   : > { %v4708_v11 = vadd.f32 %v4707_v50, %v4706_v51  ;;  %5822 = vtanh.f32 %v4699_v12 }
 0x5d8   : > { %v4712_v47 = vrot.slane %v4711_v58, 4 }
 0x5d9   : > { %v4549_v5 = vpop.permute.xlu2 %4548  ;;  %5824 = vtanh.f32 %v4708_v11 }
 0x5da   : > { %v4542_v24 = vpop.permute.xlu1 %4541  ;;  %v4597_v56 = vmul.f32 %v4549_v5, %v9745_v53  ;;  %v4713_v13 = vadd.f32 %v4712_v47, %v4711_v58 }
 0x5db   : > { %v4596_v7 = vmul.f32 %v4542_v24, %v9740_v41  ;;  %v5819_v62 = vpop.eup %5818 }
 0x5dc   : > { %v4727_v22 = vsel %vm9846_vm13, %v4597_v56, 0.0  ;;  %v4714_v4 = vrot.slane %v4713_v13, 2  ;;  %v5821_v24 = vpop.eup %5820 }
 0x5dd   : > { %v4719_v15 = vsel %vm9848_vm10, %v4596_v7, 0.0  ;;  %v4729_v44 = vadd.f32 %v4728_v45, %v4727_v22  ;;  %v5823_v8 = vpop.eup %5822  ;;  %v4895_v28 = vsel %vm4777_vm14, %v5819_v62, %v5821_v24  ;;  %vm9853_vm14 = vmmov %vm9643_vm0 }
 0x5de   : > { %v4720_v33 = vadd.f32 %v4719_v15, %v4718_v21  ;;  %v4715_v25 = vadd.f32 %v4714_v4, %v4713_v13  ;;  %v4896_v47 = vsel %vm4779_vm15, %v5823_v8, %v4895_v28  ;;  %vm4912_vm15 = vcmask 785408  }
 0x5df   : > { %v4730_v41 = vrot.slane %v4729_v44, 4  ;;  %v5825_v7 = vpop.eup %5824 }
 0x5e0   : > { %v4721_v53 = vrot.slane %v4720_v33, 4  ;;  %v4716_v31 = vrot.slane %v4715_v25, 1  ;;  %v4897_v21 = vsel %vm4781_vm3, %v5825_v7, %v4896_v47 }
 0x5e1   : > { %v4731_v9 = vadd.f32 %v4730_v41, %v4729_v44  ;;  %v4867_v41 = vpop.permute.xlu0 %4866 }
 0x5e2   : > { %v4722_v1 = vadd.f32 %v4721_v53, %v4720_v33  ;;  %v4717_v10 = vadd.f32 %v4716_v31, %v4715_v25 }
 0x5e3   : > { %v4732_v23 = vrot.slane %v4731_v9, 2 }
 0x5e4   : > { %v4723_v26 = vrot.slane %v4722_v1, 2  ;;  %5826 = vtanh.f32 %v4717_v10 }
 0x5e5   : > { %v4733_v34 = vadd.f32 %v4732_v23, %v4731_v9 }
 0x5e6   : > { %v4724_v54 = vadd.f32 %v4723_v26, %v4722_v1 }
 0x5e8   : > { %v4725_v32 = vrot.slane %v4724_v54, 1 }
 0x5e9   : > { %v4568_v39 = vpop.permute.xlu2 %4567 }
 0x5ea   : > { %v4562_v57 = vpop.permute.xlu1 %4561  ;;  %v4600_v20 = vmul.f32 %v4568_v39, %v9800_v43  ;;  %v4734_v43 = vrot.slane %v4733_v34, 1  ;;  %v5827_v6 = vpop.eup %5826 }
 0x5eb   : > { %v4599_v19 = vmul.f32 %v4562_v57, %v9687_v27  ;;  %v4726_v27 = vadd.f32 %v4725_v32, %v4724_v54  ;;  %v4898_v15 = vsel %vm4783_vm7, %v5827_v6, %v4897_v21 }
 0x5ec   : > { %v4737_v0 = vsel %vm9849_vm2, %v4600_v20, 0.0  ;;  %v4735_v61 = vadd.f32 %v4734_v43, %v4733_v34 }
 0x5ed   : > { %v4736_v30 = vsel %vm9643_vm0, %v4599_v19, 0.0  ;;  %5828 = vtanh.f32 %v4726_v27 }
 0x5ee   : > { %v4738_v3 = vadd.f32 %v4737_v0, %v4736_v30  ;;  %5830 = vtanh.f32 %v4735_v61 }
 0x5f0   : > { %v4739_v17 = vrot.slane %v4738_v3, 4 }
 0x5f1   : > { %v4833_v55 = vpop.permute.xlu2 %4832 }
 0x5f2   : > { %v4740_v16 = vadd.f32 %v4739_v17, %v4738_v3  ;;  %v4909_v46 = vsel %vm9851_vm8, %v9850_v2, %v4833_v55  ;;  %v4831_v53 = vpop.permute.xlu1 %4830 }
 0x5f3   : > { %v5829_v22 = vpop.eup %5828  ;;  %v4908_v13 = vsel %vm9853_vm14, %v9852_v14, %v4831_v53 }
 0x5f4   : > { %v4741_v58 = vrot.slane %v4740_v16, 2  ;;  %v5831_v44 = vpop.eup %5830  ;;  %v4899_v42 = vsel %vm4785_vm9, %v5829_v22, %v4898_v15  ;;  %v4910_v40 = vsel %vm3158_vm1, %v4908_v13, %v4867_v41 }
 0x5f5   : > { %v4900_v36 = vsel %vm4787_vm4, %v5831_v44, %v4899_v42 }
 0x5f6   : > { %v4742_v5 = vadd.f32 %v4741_v58, %v4740_v16 }
 0x5f8   : > { %v4743_v56 = vrot.slane %v4742_v5, 1 }
 0x5fa   : > { %v4744_v45 = vadd.f32 %v4743_v56, %v4742_v5  ;;  %v4869_v59 = vpop.permute.xlu1 %4868 }
 0x5fb   : > { %v4911_v37 = vsel %vm3158_vm1, %v4909_v46, %v4869_v59 }
 0x5fc   : > { %5832 = vtanh.f32 %v4744_v45 }
 0x602   : > { %v5833_v33 = vpop.eup %5832 }
 0x603   : > { %v4901_v35 = vsel %vm4789_vm5, %v5833_v33, %v4900_v36 }
 0x604   : > { %4904 = vrot.lane.b32.xlu0 %v4901_v35, %s5952_s6  ;;  %s4931_s6 = ssub.s32 (%p6035_p5), 5, %s6069_s16 }
 0x605   : > { %p4932_p12 = scmp.lt.s32.totalorder (%p6035_p5), %s4931_s6, 2 }
 0x616   : > { %v4903_v1 = vpop.permute.xlu2 %4902 }
 0x617   : > { %v4913_v60 = vsel %vm4912_vm15, %v4910_v40, %v4903_v1 }
 0x618   : > { %4915 = vst [vmem:[%s262_s25] sm:$0xff] %v4913_v60 }
 0x674   : > { %4929 = sbr.rel (!%p6035_p5) target bundleno = 1689 (0x699), region = 40 }
 0x676   : > { %v4905_v4 = vpop.permute.xlu0 %4904 }
 0x677   : > { %v4914_v9 = vsel %vm4912_vm15, %v4911_v37, %v4905_v4 }
 0x678   : > { %4916 = vst [vmem:[%s262_s25 + $0x8] sm:$0xff] %v4914_v9 }
 0x679   : > { %s9867_s6 = smov (!%p4932_p12, %s4931_s6), 2 }
 0x67a   : > { %s5209_s7 = sshll.u32 %s9867_s6, 3 }
 0x67b   : > { %s4935_s8 = ssub.s32 16, %s5209_s7 }
 0x67c   : > { %s4936_s9 = sshll.u32 %s4935_s8, 4 }
 0x67d   : > { %4937 = vsyncadd %s9412_s26, %s4936_s9  ;;  %p9169_p13 = scmp.ne.s32.totalorder %s5209_s7, 0  ;;  %s5240_s11 = sshll.u32 %s6018_s22, 4 }
 0x67e   : > { %s4940_s15 = scalar_lea.hbm %s9269_s4, %s5240_s11  ;;  %s4942_s23 = sshll.u32 %s262_s25, 4  ;;  %s9177_s23 = int_to_ptr.vmem [resolvable:$true] %s4942_s23 }
 0x67f   : > { %s4944_s8 = sshll.u32 %s4940_s15, 4  ;;  %s9413_s9 = sshll.u32 %s9867_s6, 7  ;;  %s9179_s8 = int_to_ptr.hbm [resolvable:$true] %s4944_s8 }
 0x680   : > { %s5834_s30 = sshra.s32 %s9177_s23, 4  ;;  %s5836_s7 = sshrl.u32 %s9413_s9, 4  ;;  %s5835_s30 = int_to_ptr.vmem [resolvable:$true] %s5834_s30 }
 0x681   : > { %s5841_s26 = scalar_lea.vmem %s5835_s30, %s5836_s7  ;;  %s5961_s0 = smov [#allocation2]  }
 0x682   : > { %p5842_p0 = scmp.ne.s32.totalorder %s5835_s30, %s5841_s26  ;;  %s5845_s12 = scalar_lea.vmem %s5961_s0, 32 }
 0x683   : > { %p5847_p3 = scmp.lt.s32.totalorder %s5845_s12, %s5841_s26 }
 0x684   : > { %p5843_p1 = pnand %p5842_p0, %p9169_p13 }
 0x686   : > { %p5844_p2 = pneg %p5843_p1 }
 0x688   : > { %p5849_p4 = pnand %p5847_p3, %p5844_p2 }
 0x68a   : > { %5852 = shalt.err (!%p5849_p4)
}
 0x68b   : > { %s5853_s25 = sshra.s32 %s9179_s8, 4  ;;  %s5864_s30 = scalar_lea.hbm %s9269_s4, 40  ;;  %s5854_s25 = int_to_ptr.hbm [resolvable:$true] %s5853_s25 }
 0x68c   : > { %s5860_s11 = scalar_lea.hbm %s5854_s25, %s5836_s7  ;;  %p5865_p10 = scmp.lt.s32.totalorder %s5854_s25, %s9269_s4 }
 0x68d   : > { %p5861_p7 = scmp.ne.s32.totalorder %s5854_s25, %s5860_s11  ;;  %p5866_p11 = scmp.lt.s32.totalorder %s5864_s30, %s5860_s11 }
 0x68f   : > { %p5862_p8 = pnand %p5861_p7, %p9169_p13  ;;  %p5867_p12 = por %p5866_p11, %p5865_p10 }
 0x691   : > { %p5863_p9 = pneg %p5862_p8 }
 0x693   : > { %p5868_p0 = pnand %p5867_p12, %p5863_p9 }
 0x695   : > { %5871 = shalt.err (!%p5868_p0)
}
 0x696   : > { %s5962_s0 = smov 128   ;;  %s5963_s26 = smov 8  }
 0x697   : > { %s9855_s7 = scalar_lea.sflag [#allocation3], %s8568_s13  ;;  %s9856_s12 = sshll.u32 %s9867_s6, 7 }
 0x698   : > { %4950 = dma.vmem_to_hbm [thread:$0]  (%p9169_p13), %s9177_s23, %s9856_s12, %s9179_s8, %s9855_s7, %s5962_s0, %s5962_s0, %s5963_s26  }
 0x699 PF: > { %4953 = sbr.rel (!%p6035_p5) target bundleno = 1726 (0x6be), region = 44  ;;  %s4955_s1 = ssub.s32 (%p6035_p5), 5, %s6069_s16 }
 0x69a   : > { %p4956_p1 = scmp.lt.s32.totalorder (%p6035_p5), %s4955_s1, 2  ;;  %s9857_s14 = scalar_lea.sflag (%p6035_p5), [#allocation5], %s8568_s13 }
 0x69e   : > { %s9869_s1 = smov (!%p4956_p1, %s4955_s1), 2 }
 0x69f   : > { %s5215_s9 = sshll.u32 %s9869_s1, 3 }
 0x6a0   : > { %s4959_s25 = ssub.s32 16, %s5215_s9 }
 0x6a1   : > { %s4960_s11 = sshll.u32 %s4959_s25, 4 }
 0x6a2   : > { %4961 = vsyncadd %s9857_s14, %s4960_s11  ;;  %p9212_p13 = scmp.ne.s32.totalorder %s5215_s9, 0  ;;  %s5241_s28 = sshll.u32 %s6018_s22, 4 }
 0x6a3   : > { %s4964_s23 = scalar_lea.hbm %s9270_s5, %s5241_s28  ;;  %s4966_s8 = sshll.u32 %s8808_s17, 4  ;;  %s9221_s8 = int_to_ptr.vmem [resolvable:$true] %s4966_s8 }
 0x6a4   : > { %s4968_s15 = sshll.u32 %s4964_s23, 4  ;;  %s5219_s30 = sshll.u32 %s9869_s1, 7  ;;  %s9223_s15 = int_to_ptr.hbm [resolvable:$true] %s4968_s15 }
 0x6a5   : > { %s5873_s0 = sshra.s32 %s9221_s8, 4  ;;  %s5875_s26 = sshrl.u32 %s5219_s30, 4  ;;  %s5874_s0 = int_to_ptr.vmem [resolvable:$true] %s5873_s0 }
 0x6a6   : > { %s5880_s7 = scalar_lea.vmem %s5874_s0, %s5875_s26  ;;  %s5964_s22 = smov [#allocation4]  }
 0x6a7   : > { %p5881_p5 = scmp.ne.s32.totalorder %s5874_s0, %s5880_s7  ;;  %s5884_s12 = scalar_lea.vmem %s5964_s22, 32 }
 0x6a8   : > { %p5886_p4 = scmp.lt.s32.totalorder %s5884_s12, %s5880_s7 }
 0x6a9   : > { %p5882_p2 = pnand %p5881_p5, %p9212_p13 }
 0x6ab   : > { %p5883_p3 = pneg %p5882_p2 }
 0x6ad   : > { %p5888_p7 = pnand %p5886_p4, %p5883_p3 }
 0x6af   : > { %5891 = shalt.err (!%p5888_p7)
}
 0x6b0   : > { %s5892_s17 = sshra.s32 %s9223_s15, 4  ;;  %s5903_s14 = scalar_lea.hbm %s9270_s5, 40  ;;  %s5893_s17 = int_to_ptr.hbm [resolvable:$true] %s5892_s17 }
 0x6b1   : > { %s5899_s9 = scalar_lea.hbm %s5893_s17, %s5875_s26  ;;  %p5904_p11 = scmp.lt.s32.totalorder %s5893_s17, %s9270_s5 }
 0x6b2   : > { %p5900_p8 = scmp.ne.s32.totalorder %s5893_s17, %s5899_s9  ;;  %p5905_p12 = scmp.lt.s32.totalorder %s5903_s14, %s5899_s9 }
 0x6b4   : > { %p5901_p9 = pnand %p5900_p8, %p9212_p13  ;;  %p5906_p0 = por %p5905_p12, %p5904_p11 }
 0x6b6   : > { %p5902_p10 = pneg %p5901_p9 }
 0x6b8   : > { %p5907_p1 = pnand %p5906_p0, %p5902_p10 }
 0x6ba   : > { %5910 = shalt.err (!%p5907_p1)
}
 0x6bb   : > { %s5965_s10 = smov 128   ;;  %s5966_s23 = smov 8  }
 0x6bc   : > { %s9859_s0 = scalar_lea.sflag [#allocation5], %s8568_s13 }
 0x6bd   : > { %4974 = dma.vmem_to_hbm [thread:$0]  (%p9212_p13), %s9221_s8, %s5219_s30, %s9223_s15, %s9859_s0, %s5965_s10, %s5965_s10, %s5966_s23  }
 0x6be PF: > { %p5264_p5 = scmp.ge.s32.totalorder %s5950_s21, 2  ;;  %s4983_s26 = sand.u32 1, %s5938_s18  }
 0x6bf   : > { %s4984_s7 = scalar_lea.sflag [#allocation3], %s4983_s26 }
 0x6c0   : > { %p5258_p2 = pnand %p5264_p5, %p6039_p6 }
 0x6c2   : > { %p5259_p3 = pneg %p5258_p2 }
 0x6c4   : > { %5929 = dma.done.wait (%p5259_p3), %s4984_s7, 256  }
 0x6c5   : > { %5931 = vsyncadd (%p5259_p3), %s4984_s7, 4294967040  ;;  %s4994_s22 = scalar_lea.sflag [#allocation5], %s4983_s26 }
 0x6c6   : > { %5933 = dma.done.wait (%p5259_p3), %s4994_s22, 256  }
 0x6c7   : > { %5935 = vsyncadd (%p5259_p3), %s4994_s22, 4294967040  ;;  %p19_p13 = scmp.ge.s32.totalorder %s6022_s24, 5   ;;  %s9860_s18 = smov %s5942_s19 }
 0x6c8   : > { %s9861_s19 = smov %s5946_s20  ;;  %s9862_s20 = smov %s6033_s27 }
 0x6c9   : > { %s9863_s21 = smov %s6022_s24  ;;  %21 = sbr.rel (!%p19_p13) target bundleno = 8 (0x8), region = 91 }
 0x6ce   :  { %5000 = vsyncpa [#allocation3], 1 }
 0x6cf   :  { %5002 = vsyncpa [#allocation3 + $0x1], 1 }
 0x6d0   :  { %5003 = vsyncpa [#allocation5], 1 }
 0x6d1   :  { %5005 = vsyncpa [#allocation5 + $0x1], 1 }

</bundles_post_ra>
